<compile_context>
chip_gen: v6e
topology: v6e:2x2x1
jax: 0.10.0
libtpu: 0.0.40
codegen_flags: <defaults>
</compile_context>

<pallas_src>
import functools
import math

import jax
import jax.numpy as jnp
from jax.experimental import pallas as pl
from jax.experimental.pallas import tpu as pltpu  # noqa: F401  (imported for completeness)


# --------------------------- in-kernel math helpers ---------------------------

def _mm(x, w, b):
    return jnp.dot(x, w, preferred_element_type=jnp.float32) + b


def _scalar_head(h, w2, b2):
    # [M, D] x [D, 1] done as a VPU multiply + lane reduction (keeps N=1 matmuls off the MXU).
    return jnp.sum(h * w2.reshape(1, -1), axis=-1, keepdims=True) + b2


def _mlp2_to_scalar(x, w1, b1, w2, b2):
    # MLP(in -> D -> 1): matmul + ReLU, then reduction head.
    return _scalar_head(jnp.maximum(_mm(x, w1, b1), 0.0), w2, b2)


def _conf_mlp(x1, w1, b1, w2, b2):
    # MLP(1 -> D -> H): first layer has in_dim == 1, i.e. an outer product ->
    # VPU broadcast multiply-add instead of an MXU matmul.
    h = jnp.maximum(x1 * w1 + b1, 0.0)
    return _mm(h, w2, b2)


def _layernorm(x, g, b, eps=1e-5):
    mean = jnp.mean(x, axis=-1, keepdims=True)
    xc = x - mean
    var = jnp.mean(xc * xc, axis=-1, keepdims=True)
    return xc * jax.lax.rsqrt(var + eps) * g + b


def _gated_mha(qproj, kproj, vproj, qc, kc, vc, *, B, H, dh):
    """Sigmoid-gated multi-head attention over L-major token slabs.

    qproj [Mq, H*dh], kproj/vproj [Mk, H*dh], qc [Mq, H], kc/vc [Mk, H]
    (rows are L-major: row = l * B + b).
    Returns (attn_out [Mq, H*dh], ni [Mq, H]).

    Batch separation is enforced with a block-diagonal mask on the logits; masked
    attention weights are exactly zero, so this equals a per-batch softmax.
    """
    Mq = qproj.shape[0]
    Mk = kproj.shape[0]
    D = H * dh
    scale = 1.0 / math.sqrt(dh)

    def to_heads(x, m):
        # [m, H*dh] -> [H, m, dh]: 2D transpose + free leading-dim split + minor-pair transpose.
        return jnp.transpose(x.T.reshape(H, dh, m), (0, 2, 1))

    qh = to_heads(qproj, Mq)                                  # [H, Mq, dh]
    kh = to_heads(kproj, Mk)                                  # [H, Mk, dh]
    vh = to_heads(vproj, Mk)                                  # [H, Mk, dh]
    sq = jax.nn.sigmoid(qc).T                                 # [H, Mq]   query gate
    g = (jax.nn.sigmoid(kc) * jax.nn.sigmoid(vc)).T           # [H, Mk]   key*value gate

    logits = jnp.einsum("hqd,hkd->hqk", qh, kh,
                        preferred_element_type=jnp.float32) * scale      # [H, Mq, Mk]
    row_b = jax.lax.broadcasted_iota(jnp.int32, (Mq, Mk), 0) % B
    col_b = jax.lax.broadcasted_iota(jnp.int32, (Mq, Mk), 1) % B
    logits = jnp.where((row_b == col_b)[None, :, :], logits, -1e30)

    m = jnp.max(logits, axis=-1, keepdims=True)
    e = jnp.exp(logits - m)
    attn = e / jnp.sum(e, axis=-1, keepdims=True)             # exact reciprocal (see review)

    asq = attn * sq[:, :, None]                               # [H, Mq, Mk]
    out_h = jnp.einsum("hqk,hkd->hqd", asq, vh * g[:, :, None],
                       preferred_element_type=jnp.float32)    # [H, Mq, dh]
    ni_h = jnp.sum(asq * g[:, None, :], axis=-1)              # [H, Mq]  VPU/XLU reduction

    attn_out = jnp.transpose(out_h, (0, 2, 1)).reshape(D, Mq).T          # [Mq, H*dh]
    return attn_out, ni_h.T                                              # [Mq, H]


# --------------------------- the single fused kernel ---------------------------

def _decoder_layer_kernel(
    # activations (L-major 2D slabs)
    tgt_ref, qpos_ref, inter_ref, mem_ref, pos_ref, img_ref,
    # ---- self-attention block ----
    sa_wqk, sa_bqk, sa_wv, sa_bv, sa_wo, sa_bo,
    pc1_w1, pc1_b1, qp1_w2, qp1_b2, kp1_w2, kp1_b2,
    qc1_w1, qc1_b1, qc1_w2, qc1_b2,
    kc1_w1, kc1_b1, kc1_w2, kc1_b2,
    vc1_w1, vc1_b1, vc1_w2, vc1_b2,
    u0_w1, u0_b1, u0_w2, u0_b2,
    n1_g, n1_b,
    # ---- cross-attention block ----
    ca_wq, ca_bq, ca_wk, ca_bk, ca_wv, ca_bv, ca_wo, ca_bo,
    qp2_w1, qp2_b1, qp2_w2, qp2_b2,
    kp2_w1, kp2_b1, kp2_w2, kp2_b2,
    qc2_w1, qc2_b1, qc2_w2, qc2_b2,
    kc2_w1, kc2_b1, kc2_w2, kc2_b2,
    vc2_w1, vc2_b1, vc2_w2, vc2_b2,
    u1_w1, u1_b1, u1_w2, u1_b2,
    n2_g, n2_b,
    # ---- FFN block ----
    l1_w, l1_b, l2_w, l2_b,
    u2_w1, u2_b1, u2_w2, u2_b2,
    n3_g, n3_b,
    # ---- outputs ----
    tgt_out, inter_out,
    *, B, H, dh):
    D = H * dh

    tgt = tgt_ref[...]       # [Mq, D]
    qpos = qpos_ref[...]     # [Mq, D]
    inter = inter_ref[...]   # [Mq, 1]
    mem = mem_ref[...]       # [Mk, D]
    pos = pos_ref[...]       # [Mk, D]
    img = img_ref[...]       # [Mk, 1]

    # ===================== self-attention block =====================
    # qpconf1 / kpconf1 share the same input (query_pos): one merged [D, 2D] first layer.
    pc_h = jnp.maximum(_mm(qpos, pc1_w1[...], pc1_b1[...]), 0.0)          # [Mq, 2D]
    qp_out = _scalar_head(pc_h[:, :D], qp1_w2[...], qp1_b2[...])          # [Mq, 1]
    kp_out = _scalar_head(pc_h[:, D:], kp1_w2[...], kp1_b2[...])          # [Mq, 1]

    qc = _conf_mlp(inter + qp_out, qc1_w1[...], qc1_b1[...], qc1_w2[...], qc1_b2[...])
    kc = _conf_mlp(inter + kp_out, kc1_w1[...], kc1_b1[...], kc1_w2[...], kc1_b2[...])
    vc = _conf_mlp(inter,          vc1_w1[...], vc1_b1[...], vc1_w2[...], vc1_b2[...])

    q_in = tgt + qpos                                   # query == key input for self-attn
    qk = _mm(q_in, sa_wqk[...], sa_bqk[...])            # merged Q|K: one [D, 2D] matmul
    vproj = _mm(tgt, sa_wv[...], sa_bv[...])
    attn, ni = _gated_mha(qk[:, :D], qk[:, D:], vproj, qc, kc, vc, B=B, H=H, dh=dh)

    tgt = _layernorm(tgt + _mm(attn, sa_wo[...], sa_bo[...]),
                     n1_g[...], n1_b[...])                                # dropout1 = id
    inter = _mlp2_to_scalar(ni, u0_w1[...], u0_b1[...], u0_w2[...], u0_b2[...]) + inter

    # ===================== cross-attention block =====================
    qp2 = _mlp2_to_scalar(qpos, qp2_w1[...], qp2_b1[...], qp2_w2[...], qp2_b2[...])  # [Mq,1]
    kp2 = _mlp2_to_scalar(pos,  kp2_w1[...], kp2_b1[...], kp2_w2[...], kp2_b2[...])  # [Mk,1]

    qc = _conf_mlp(inter + qp2, qc2_w1[...], qc2_b1[...], qc2_w2[...], qc2_b2[...])
    kc = _conf_mlp(img + kp2,   kc2_w1[...], kc2_b1[...], kc2_w2[...], kc2_b2[...])
    vc = _conf_mlp(img,         vc2_w1[...], vc2_b1[...], vc2_w2[...], vc2_b2[...])

    qproj = _mm(tgt + qpos, ca_wq[...], ca_bq[...])
    kproj = _mm(mem + pos,  ca_wk[...], ca_bk[...])
    vproj = _mm(mem,        ca_wv[...], ca_bv[...])
    attn, ni = _gated_mha(qproj, kproj, vproj, qc, kc, vc, B=B, H=H, dh=dh)

    tgt = _layernorm(tgt + _mm(attn, ca_wo[...], ca_bo[...]),
                     n2_g[...], n2_b[...])                                # dropout2 = id
    inter = _mlp2_to_scalar(ni, u1_w1[...], u1_b1[...], u1_w2[...], u1_b2[...]) + inter

    # ===================== FFN block =====================
    ff = _mm(jnp.maximum(_mm(tgt, l1_w[...], l1_b[...]), 0.0), l2_w[...], l2_b[...])
    tgt = _layernorm(tgt + ff, n3_g[...], n3_b[...])                      # dropout3 = id
    inter = _mlp2_to_scalar(tgt, u2_w1[...], u2_b1[...], u2_w2[...], u2_b2[...]) + inter

    tgt_out[...] = tgt
    inter_out[...] = inter


# --------------------------- wrapper / fused-parameter prep ---------------------------

def _mlp_args(p, names):
    args = []
    for name in names:
        for lyr in p[name]:
            args += [lyr["w"], lyr["b"]]
    return args


def prepare_fused_params(p):
    """One-time weight merging (done at setup, outside the jitted forward)."""
    sa = p["self_attn"]
    args = [
        jnp.concatenate([sa["q"]["w"], sa["k"]["w"]], axis=1),      # merged Q|K weight [D,2D]
        jnp.concatenate([sa["q"]["b"], sa["k"]["b"]], axis=1),      # merged Q|K bias   [1,2D]
        sa["v"]["w"], sa["v"]["b"], sa["o"]["w"], sa["o"]["b"],
        jnp.concatenate([p["qpconf1"][0]["w"], p["kpconf1"][0]["w"]], axis=1),  # [D,2D]
        jnp.concatenate([p["qpconf1"][0]["b"], p["kpconf1"][0]["b"]], axis=1),  # [1,2D]
        p["qpconf1"][1]["w"], p["qpconf1"][1]["b"],
        p["kpconf1"][1]["w"], p["kpconf1"][1]["b"],
    ]
    args += _mlp_args(p, ("qconf1", "kconf1", "vconf1", "update0"))
    args += [p["norm1"]["g"], p["norm1"]["b"]]
    ca = p["cross_attn"]
    args += [ca["q"]["w"], ca["q"]["b"], ca["k"]["w"], ca["k"]["b"],
             ca["v"]["w"], ca["v"]["b"], ca["o"]["w"], ca["o"]["b"]]
    args += _mlp_args(p, ("qpconf2", "kpconf2", "qconf2", "kconf2", "vconf2", "update1"))
    args += [p["norm2"]["g"], p["norm2"]["b"]]
    args += [p["linear1"]["w"], p["linear1"]["b"], p["linear2"]["w"], p["linear2"]["b"]]
    args += _mlp_args(p, ("update2",))
    args += [p["norm3"]["g"], p["norm3"]["b"]]
    return tuple(args)


def decoder_layer_forward(fused, tgt, memory, query_pos, pos, inter, img_inter, nhead):
    # tgt/query_pos: [Lq,B,D]  memory/pos: [Lk,B,D]  inter: [Lq,B,1]  img_inter: [Lk,B,1]
    Lq, B, D = tgt.shape
    Lk = memory.shape[0]
    dh = D // nhead
    Mq = Lq * B

    flat = lambda x: x.reshape(x.shape[0] * x.shape[1], x.shape[2])   # free reshape, L-major

    out_tgt, out_inter = pl.pallas_call(
        functools.partial(_decoder_layer_kernel, B=B, H=nhead, dh=dh),
        out_shape=(jax.ShapeDtypeStruct((Mq, D), jnp.float32),
                   jax.ShapeDtypeStruct((Mq, 1), jnp.float32)),
    )(flat(tgt), flat(query_pos), flat(inter), flat(memory), flat(pos),
      flat(img_inter), *fused)

    return out_tgt.reshape(Lq, B, D), out_inter.reshape(Lq, B, 1)


# --------------------------- parameter init ---------------------------

def init_linear_params(key, in_dim, out_dim):
    kw, kb = jax.random.split(key)
    bound = 1.0 / math.sqrt(in_dim)
    w = jax.random.uniform(kw, (in_dim, out_dim), jnp.float32, -bound, bound)
    b = jax.random.uniform(kb, (1, out_dim), jnp.float32, -bound, bound)
    return {"w": w, "b": b}


def init_mlp2(key, in_dim, hid, out_dim):
    k0, k1 = jax.random.split(key)
    return [init_linear_params(k0, in_dim, hid), init_linear_params(k1, hid, out_dim)]


def init_attn(key, d_model):
    k = jax.random.split(key, 4)
    return {"q": init_linear_params(k[0], d_model, d_model),
            "k": init_linear_params(k[1], d_model, d_model),
            "v": init_linear_params(k[2], d_model, d_model),
            "o": init_linear_params(k[3], d_model, d_model)}


def init_layer_params(key, d_model, nhead, dim_ff):
    ks = iter(jax.random.split(key, 20))
    nk = lambda: next(ks)
    ln = lambda: {"g": jnp.ones((1, d_model), jnp.float32),
                  "b": jnp.zeros((1, d_model), jnp.float32)}
    return {
        "self_attn": init_attn(nk(), d_model),
        "qconf1": init_mlp2(nk(), 1, d_model, nhead),
        "qpconf1": init_mlp2(nk(), d_model, d_model, 1),
        "kconf1": init_mlp2(nk(), 1, d_model, nhead),
        "kpconf1": init_mlp2(nk(), d_model, d_model, 1),
        "vconf1": init_mlp2(nk(), 1, d_model, nhead),
        "cross_attn": init_attn(nk(), d_model),
        "qconf2": init_mlp2(nk(), 1, d_model, nhead),
        "qpconf2": init_mlp2(nk(), d_model, d_model, 1),
        "kconf2": init_mlp2(nk(), 1, d_model, nhead),
        "kpconf2": init_mlp2(nk(), d_model, d_model, 1),
        "vconf2": init_mlp2(nk(), 1, d_model, nhead),
        "linear1": init_linear_params(nk(), d_model, dim_ff),
        "linear2": init_linear_params(nk(), dim_ff, d_model),
        "update0": init_mlp2(nk(), nhead, d_model, 1),
        "update1": init_mlp2(nk(), nhead, d_model, 1),
        "update2": init_mlp2(nk(), d_model, d_model, 1),
        "norm1": ln(), "norm2": ln(), "norm3": ln(),
    }


# --------------------------- plain-JAX reference (self-check) ---------------------------

def _ref_mlp2(x, layers):
    h = jnp.maximum(x @ layers[0]["w"] + layers[0]["b"], 0.0)
    return h @ layers[1]["w"] + layers[1]["b"]


def _ref_layernorm(x, p, eps=1e-5):
    m = x.mean(-1, keepdims=True)
    v = ((x - m) ** 2).mean(-1, keepdims=True)
    return (x - m) / jnp.sqrt(v + eps) * p["g"] + p["b"]


def _ref_gate_attention(query, key, value, qc, kc, vc, p, nhead):
    Lq, B, D = query.shape
    Lk = key.shape[0]
    dh = D // nhead
    qp = query @ p["q"]["w"] + p["q"]["b"]
    kp = key @ p["k"]["w"] + p["k"]["b"]
    vp = value @ p["v"]["w"] + p["v"]["b"]
    heads = lambda x, L: x.reshape(L, B, nhead, dh).transpose(1, 2, 0, 3)   # [B,H,L,dh]
    qh, kh, vh = heads(qp, Lq), heads(kp, Lk), heads(vp, Lk)
    logits = jnp.einsum("bhqd,bhkd->bhqk", qh, kh) / math.sqrt(dh)
    attn = jax.nn.softmax(logits, axis=-1)
    sq = jax.nn.sigmoid(qc).transpose(1, 2, 0)[:, :, :, None]   # [B,H,Lq,1]
    sk = jax.nn.sigmoid(kc).transpose(1, 2, 0)[:, :, None, :]   # [B,H,1,Lk]
    sv = jax.nn.sigmoid(vc).transpose(1, 2, 0)[:, :, None, :]
    gv = attn * sq * sk * sv
    out = jnp.einsum("bhqk,bhkd->bhqd", gv, vh)
    out = out.transpose(2, 0, 1, 3).reshape(Lq, B, D)
    ni = gv.sum(-1).transpose(2, 0, 1)                          # [Lq,B,H]
    return out @ p["o"]["w"] + p["o"]["b"], ni


def ref_forward(p, tgt, memory, query_pos, pos, inter, img_inter, nhead):
    q = tgt + query_pos
    qc = _ref_mlp2(inter + _ref_mlp2(query_pos, p["qpconf1"]), p["qconf1"])
    kc = _ref_mlp2(inter + _ref_mlp2(query_pos, p["kpconf1"]), p["kconf1"])
    vc = _ref_mlp2(inter, p["vconf1"])
    tgt2, ni = _ref_gate_attention(q, q, tgt, qc, kc, vc, p["self_attn"], nhead)
    tgt = _ref_layernorm(tgt + tgt2, p["norm1"])
    inter = _ref_mlp2(ni, p["update0"]) + inter

    qc = _ref_mlp2(inter + _ref_mlp2(query_pos, p["qpconf2"]), p["qconf2"])
    kc = _ref_mlp2(img_inter + _ref_mlp2(pos, p["kpconf2"]), p["kconf2"])
    vc = _ref_mlp2(img_inter, p["vconf2"])
    tgt2, ni = _ref_gate_attention(tgt + query_pos, memory + pos, memory,
                                   qc, kc, vc, p["cross_attn"], nhead)
    tgt = _ref_layernorm(tgt + tgt2, p["norm2"])
    inter = _ref_mlp2(ni, p["update1"]) + inter

    ff = (jnp.maximum(tgt @ p["linear1"]["w"] + p["linear1"]["b"], 0.0)
          @ p["linear2"]["w"] + p["linear2"]["b"])
    tgt = _ref_layernorm(tgt + ff, p["norm3"])
    inter = _ref_mlp2(tgt, p["update2"]) + inter
    return tgt, inter


# --------------------------- main ---------------------------

if __name__ == "__main__":
    d_model, nhead, dim_ff = 32, 4, 64
    Lq, Lk, B = 8, 16, 2

    key = jax.random.PRNGKey(0)
    kparam, kdata = jax.random.split(key)
    params = init_layer_params(kparam, d_model, nhead, dim_ff)
    fused = prepare_fused_params(params)          # one-time merge, outside jit

    ks = jax.random.split(kdata, 6)
    tgt = jax.random.normal(ks[0], (Lq, B, d_model), jnp.float32)
    memory = jax.random.normal(ks[1], (Lk, B, d_model), jnp.float32)
    query_pos = jax.random.normal(ks[2], (Lq, B, d_model), jnp.float32)
    pos = jax.random.normal(ks[3], (Lk, B, d_model), jnp.float32)
    interactiveness = jax.random.normal(ks[4], (Lq, B, 1), jnp.float32)
    img_interactiveness = jax.random.normal(ks[5], (Lk, B, 1), jnp.float32)

    fwd = jax.jit(functools.partial(decoder_layer_forward, nhead=nhead))
    out_tgt, out_inter = fwd(fused, tgt, memory, query_pos, pos,
                             interactiveness, img_interactiveness)
    out_tgt, out_inter = jax.block_until_ready((out_tgt, out_inter))

    assert out_tgt.shape == (Lq, B, d_model)
    assert out_inter.shape == (Lq, B, 1)

    # Cross-check the fused kernel against a plain-JAX reference of the same math.
    # Exact softmax reciprocal inside the kernel -> tight tolerance (was 5e-2).
    ref_tgt, ref_inter = ref_forward(params, tgt, memory, query_pos, pos,
                                     interactiveness, img_interactiveness, nhead)
    assert float(jnp.max(jnp.abs(out_tgt - ref_tgt))) < 1e-3
    assert float(jnp.max(jnp.abs(out_inter - ref_inter))) < 1e-3

    print("KERNEL_OK")
</pallas_src>

<mosaic_0001>
module attributes {stable_mosaic.version = 11 : i64} {
  func.func @_decoder_layer_kernel(%arg0: memref<16x32xf32, #tpu.memory_space<vmem>>, %arg1: memref<16x32xf32, #tpu.memory_space<vmem>>, %arg2: memref<16x1xf32, #tpu.memory_space<vmem>>, %arg3: memref<32x32xf32, #tpu.memory_space<vmem>>, %arg4: memref<32x32xf32, #tpu.memory_space<vmem>>, %arg5: memref<32x1xf32, #tpu.memory_space<vmem>>, %arg6: memref<32x64xf32, #tpu.memory_space<vmem>>, %arg7: memref<1x64xf32, #tpu.memory_space<vmem>>, %arg8: memref<32x32xf32, #tpu.memory_space<vmem>>, %arg9: memref<1x32xf32, #tpu.memory_space<vmem>>, %arg10: memref<32x32xf32, #tpu.memory_space<vmem>>, %arg11: memref<1x32xf32, #tpu.memory_space<vmem>>, %arg12: memref<32x64xf32, #tpu.memory_space<vmem>>, %arg13: memref<1x64xf32, #tpu.memory_space<vmem>>, %arg14: memref<32x1xf32, #tpu.memory_space<vmem>>, %arg15: memref<1x1xf32, #tpu.memory_space<vmem>>, %arg16: memref<32x1xf32, #tpu.memory_space<vmem>>, %arg17: memref<1x1xf32, #tpu.memory_space<vmem>>, %arg18: memref<1x32xf32, #tpu.memory_space<vmem>>, %arg19: memref<1x32xf32, #tpu.memory_space<vmem>>, %arg20: memref<32x4xf32, #tpu.memory_space<vmem>>, %arg21: memref<1x4xf32, #tpu.memory_space<vmem>>, %arg22: memref<1x32xf32, #tpu.memory_space<vmem>>, %arg23: memref<1x32xf32, #tpu.memory_space<vmem>>, %arg24: memref<32x4xf32, #tpu.memory_space<vmem>>, %arg25: memref<1x4xf32, #tpu.memory_space<vmem>>, %arg26: memref<1x32xf32, #tpu.memory_space<vmem>>, %arg27: memref<1x32xf32, #tpu.memory_space<vmem>>, %arg28: memref<32x4xf32, #tpu.memory_space<vmem>>, %arg29: memref<1x4xf32, #tpu.memory_space<vmem>>, %arg30: memref<4x32xf32, #tpu.memory_space<vmem>>, %arg31: memref<1x32xf32, #tpu.memory_space<vmem>>, %arg32: memref<32x1xf32, #tpu.memory_space<vmem>>, %arg33: memref<1x1xf32, #tpu.memory_space<vmem>>, %arg34: memref<1x32xf32, #tpu.memory_space<vmem>>, %arg35: memref<1x32xf32, #tpu.memory_space<vmem>>, %arg36: memref<32x32xf32, #tpu.memory_space<vmem>>, %arg37: memref<1x32xf32, #tpu.memory_space<vmem>>, %arg38: memref<32x32xf32, #tpu.memory_space<vmem>>, %arg39: memref<1x32xf32, #tpu.memory_space<vmem>>, %arg40: memref<32x32xf32, #tpu.memory_space<vmem>>, %arg41: memref<1x32xf32, #tpu.memory_space<vmem>>, %arg42: memref<32x32xf32, #tpu.memory_space<vmem>>, %arg43: memref<1x32xf32, #tpu.memory_space<vmem>>, %arg44: memref<32x32xf32, #tpu.memory_space<vmem>>, %arg45: memref<1x32xf32, #tpu.memory_space<vmem>>, %arg46: memref<32x1xf32, #tpu.memory_space<vmem>>, %arg47: memref<1x1xf32, #tpu.memory_space<vmem>>, %arg48: memref<32x32xf32, #tpu.memory_space<vmem>>, %arg49: memref<1x32xf32, #tpu.memory_space<vmem>>, %arg50: memref<32x1xf32, #tpu.memory_space<vmem>>, %arg51: memref<1x1xf32, #tpu.memory_space<vmem>>, %arg52: memref<1x32xf32, #tpu.memory_space<vmem>>, %arg53: memref<1x32xf32, #tpu.memory_space<vmem>>, %arg54: memref<32x4xf32, #tpu.memory_space<vmem>>, %arg55: memref<1x4xf32, #tpu.memory_space<vmem>>, %arg56: memref<1x32xf32, #tpu.memory_space<vmem>>, %arg57: memref<1x32xf32, #tpu.memory_space<vmem>>, %arg58: memref<32x4xf32, #tpu.memory_space<vmem>>, %arg59: memref<1x4xf32, #tpu.memory_space<vmem>>, %arg60: memref<1x32xf32, #tpu.memory_space<vmem>>, %arg61: memref<1x32xf32, #tpu.memory_space<vmem>>, %arg62: memref<32x4xf32, #tpu.memory_space<vmem>>, %arg63: memref<1x4xf32, #tpu.memory_space<vmem>>, %arg64: memref<4x32xf32, #tpu.memory_space<vmem>>, %arg65: memref<1x32xf32, #tpu.memory_space<vmem>>, %arg66: memref<32x1xf32, #tpu.memory_space<vmem>>, %arg67: memref<1x1xf32, #tpu.memory_space<vmem>>, %arg68: memref<1x32xf32, #tpu.memory_space<vmem>>, %arg69: memref<1x32xf32, #tpu.memory_space<vmem>>, %arg70: memref<32x64xf32, #tpu.memory_space<vmem>>, %arg71: memref<1x64xf32, #tpu.memory_space<vmem>>, %arg72: memref<64x32xf32, #tpu.memory_space<vmem>>, %arg73: memref<1x32xf32, #tpu.memory_space<vmem>>, %arg74: memref<32x32xf32, #tpu.memory_space<vmem>>, %arg75: memref<1x32xf32, #tpu.memory_space<vmem>>, %arg76: memref<32x1xf32, #tpu.memory_space<vmem>>, %arg77: memref<1x1xf32, #tpu.memory_space<vmem>>, %arg78: memref<1x32xf32, #tpu.memory_space<vmem>>, %arg79: memref<1x32xf32, #tpu.memory_space<vmem>>, %arg80: memref<16x32xf32, #tpu.memory_space<vmem>>, %arg81: memref<16x1xf32, #tpu.memory_space<vmem>>) attributes {dimension_semantics = [], scalar_prefetch = 0 : i64, scratch_operands = 0 : i64, tpu.core_type = #tpu.core_type<tc>} {
    %c0 = arith.constant 0 : index
    %c0_0 = arith.constant 0 : index
    %0 = vector.load %arg0[%c0, %c0_0] : memref<16x32xf32, #tpu.memory_space<vmem>>, vector<16x32xf32>
    %c0_1 = arith.constant 0 : index
    %c0_2 = arith.constant 0 : index
    %1 = vector.load %arg1[%c0_1, %c0_2] : memref<16x32xf32, #tpu.memory_space<vmem>>, vector<16x32xf32>
    %c0_3 = arith.constant 0 : index
    %c0_4 = arith.constant 0 : index
    %2 = vector.load %arg2[%c0_3, %c0_4] : memref<16x1xf32, #tpu.memory_space<vmem>>, vector<16x1xf32>
    %c0_5 = arith.constant 0 : index
    %c0_6 = arith.constant 0 : index
    %3 = vector.load %arg3[%c0_5, %c0_6] : memref<32x32xf32, #tpu.memory_space<vmem>>, vector<32x32xf32>
    %c0_7 = arith.constant 0 : index
    %c0_8 = arith.constant 0 : index
    %4 = vector.load %arg4[%c0_7, %c0_8] : memref<32x32xf32, #tpu.memory_space<vmem>>, vector<32x32xf32>
    %c0_9 = arith.constant 0 : index
    %c0_10 = arith.constant 0 : index
    %5 = vector.load %arg5[%c0_9, %c0_10] : memref<32x1xf32, #tpu.memory_space<vmem>>, vector<32x1xf32>
    %c0_11 = arith.constant 0 : index
    %c0_12 = arith.constant 0 : index
    %6 = vector.load %arg12[%c0_11, %c0_12] : memref<32x64xf32, #tpu.memory_space<vmem>>, vector<32x64xf32>
    %c0_13 = arith.constant 0 : index
    %c0_14 = arith.constant 0 : index
    %7 = vector.load %arg13[%c0_13, %c0_14] : memref<1x64xf32, #tpu.memory_space<vmem>>, vector<1x64xf32>
    %cst = arith.constant dense<0.000000e+00> : vector<16x64xf32>
    %8 = tpu.matmul %1, %6, %cst {dimension_numbers = #tpu.dot_dimension_numbers<[1], [0], [0], [1], [0, 0, 1, 1], [], []>} : vector<16x32xf32>, vector<32x64xf32>, vector<16x64xf32> -> vector<16x64xf32>
    %9 = vector.broadcast %7 : vector<1x64xf32> to vector<16x64xf32>
    %10 = arith.addf %8, %9 : vector<16x64xf32>
    %cst_15 = arith.constant 0.000000e+00 : f32
    %11 = vector.broadcast %cst_15 : f32 to vector<16x64xf32>
    %12 = arith.maximumf %10, %11 : vector<16x64xf32>
    %13 = vector.extract_strided_slice %12 {offsets = [0, 0], sizes = [16, 32], strides = [1, 1]} : vector<16x64xf32> to vector<16x32xf32>
    %c0_16 = arith.constant 0 : index
    %c0_17 = arith.constant 0 : index
    %14 = vector.load %arg14[%c0_16, %c0_17] : memref<32x1xf32, #tpu.memory_space<vmem>>, vector<32x1xf32>
    %c0_18 = arith.constant 0 : index
    %c0_19 = arith.constant 0 : index
    %15 = vector.load %arg15[%c0_18, %c0_19] : memref<1x1xf32, #tpu.memory_space<vmem>>, vector<1x1xf32>
    %16 = vector.shape_cast %14 : vector<32x1xf32> to vector<1x32xf32>
    %17 = vector.broadcast %16 : vector<1x32xf32> to vector<16x32xf32>
    %18 = arith.mulf %13, %17 : vector<16x32xf32>
    %cst_20 = arith.constant dense<0.000000e+00> : vector<16xf32>
    %19 = vector.multi_reduction <add>, %18, %cst_20 [1] : vector<16x32xf32> to vector<16xf32>
    %20 = vector.shape_cast %19 : vector<16xf32> to vector<16x1xf32>
    %21 = vector.broadcast %15 : vector<1x1xf32> to vector<16x1xf32>
    %22 = arith.addf %20, %21 : vector<16x1xf32>
    %23 = vector.extract_strided_slice %12 {offsets = [0, 32], sizes = [16, 32], strides = [1, 1]} : vector<16x64xf32> to vector<16x32xf32>
    %c0_21 = arith.constant 0 : index
    %c0_22 = arith.constant 0 : index
    %24 = vector.load %arg16[%c0_21, %c0_22] : memref<32x1xf32, #tpu.memory_space<vmem>>, vector<32x1xf32>
    %c0_23 = arith.constant 0 : index
    %c0_24 = arith.constant 0 : index
    %25 = vector.load %arg17[%c0_23, %c0_24] : memref<1x1xf32, #tpu.memory_space<vmem>>, vector<1x1xf32>
    %26 = vector.shape_cast %24 : vector<32x1xf32> to vector<1x32xf32>
    %27 = vector.broadcast %26 : vector<1x32xf32> to vector<16x32xf32>
    %28 = arith.mulf %23, %27 : vector<16x32xf32>
    %cst_25 = arith.constant dense<0.000000e+00> : vector<16xf32>
    %29 = vector.multi_reduction <add>, %28, %cst_25 [1] : vector<16x32xf32> to vector<16xf32>
    %30 = vector.shape_cast %29 : vector<16xf32> to vector<16x1xf32>
    %31 = vector.broadcast %25 : vector<1x1xf32> to vector<16x1xf32>
    %32 = arith.addf %30, %31 : vector<16x1xf32>
    %33 = arith.addf %2, %22 : vector<16x1xf32>
    %c0_26 = arith.constant 0 : index
    %c0_27 = arith.constant 0 : index
    %34 = vector.load %arg18[%c0_26, %c0_27] : memref<1x32xf32, #tpu.memory_space<vmem>>, vector<1x32xf32>
    %c0_28 = arith.constant 0 : index
    %c0_29 = arith.constant 0 : index
    %35 = vector.load %arg19[%c0_28, %c0_29] : memref<1x32xf32, #tpu.memory_space<vmem>>, vector<1x32xf32>
    %c0_30 = arith.constant 0 : index
    %c0_31 = arith.constant 0 : index
    %36 = vector.load %arg20[%c0_30, %c0_31] : memref<32x4xf32, #tpu.memory_space<vmem>>, vector<32x4xf32>
    %c0_32 = arith.constant 0 : index
    %c0_33 = arith.constant 0 : index
    %37 = vector.load %arg21[%c0_32, %c0_33] : memref<1x4xf32, #tpu.memory_space<vmem>>, vector<1x4xf32>
    %38 = vector.broadcast %33 : vector<16x1xf32> to vector<16x32xf32>
    %39 = vector.broadcast %34 : vector<1x32xf32> to vector<16x32xf32>
    %40 = arith.mulf %38, %39 : vector<16x32xf32>
    %41 = vector.broadcast %35 : vector<1x32xf32> to vector<16x32xf32>
    %42 = arith.addf %40, %41 : vector<16x32xf32>
    %cst_34 = arith.constant 0.000000e+00 : f32
    %43 = vector.broadcast %cst_34 : f32 to vector<16x32xf32>
    %44 = arith.maximumf %42, %43 : vector<16x32xf32>
    %cst_35 = arith.constant dense<0.000000e+00> : vector<16x4xf32>
    %45 = tpu.matmul %44, %36, %cst_35 {dimension_numbers = #tpu.dot_dimension_numbers<[1], [0], [0], [1], [0, 0, 1, 1], [], []>} : vector<16x32xf32>, vector<32x4xf32>, vector<16x4xf32> -> vector<16x4xf32>
    %46 = vector.broadcast %37 : vector<1x4xf32> to vector<16x4xf32>
    %47 = arith.addf %45, %46 : vector<16x4xf32>
    %48 = arith.addf %2, %32 : vector<16x1xf32>
    %c0_36 = arith.constant 0 : index
    %c0_37 = arith.constant 0 : index
    %49 = vector.load %arg22[%c0_36, %c0_37] : memref<1x32xf32, #tpu.memory_space<vmem>>, vector<1x32xf32>
    %c0_38 = arith.constant 0 : index
    %c0_39 = arith.constant 0 : index
    %50 = vector.load %arg23[%c0_38, %c0_39] : memref<1x32xf32, #tpu.memory_space<vmem>>, vector<1x32xf32>
    %c0_40 = arith.constant 0 : index
    %c0_41 = arith.constant 0 : index
    %51 = vector.load %arg24[%c0_40, %c0_41] : memref<32x4xf32, #tpu.memory_space<vmem>>, vector<32x4xf32>
    %c0_42 = arith.constant 0 : index
    %c0_43 = arith.constant 0 : index
    %52 = vector.load %arg25[%c0_42, %c0_43] : memref<1x4xf32, #tpu.memory_space<vmem>>, vector<1x4xf32>
    %53 = vector.broadcast %48 : vector<16x1xf32> to vector<16x32xf32>
    %54 = vector.broadcast %49 : vector<1x32xf32> to vector<16x32xf32>
    %55 = arith.mulf %53, %54 : vector<16x32xf32>
    %56 = vector.broadcast %50 : vector<1x32xf32> to vector<16x32xf32>
    %57 = arith.addf %55, %56 : vector<16x32xf32>
    %cst_44 = arith.constant 0.000000e+00 : f32
    %58 = vector.broadcast %cst_44 : f32 to vector<16x32xf32>
    %59 = arith.maximumf %57, %58 : vector<16x32xf32>
    %cst_45 = arith.constant dense<0.000000e+00> : vector<16x4xf32>
    %60 = tpu.matmul %59, %51, %cst_45 {dimension_numbers = #tpu.dot_dimension_numbers<[1], [0], [0], [1], [0, 0, 1, 1], [], []>} : vector<16x32xf32>, vector<32x4xf32>, vector<16x4xf32> -> vector<16x4xf32>
    %61 = vector.broadcast %52 : vector<1x4xf32> to vector<16x4xf32>
    %62 = arith.addf %60, %61 : vector<16x4xf32>
    %c0_46 = arith.constant 0 : index
    %c0_47 = arith.constant 0 : index
    %63 = vector.load %arg26[%c0_46, %c0_47] : memref<1x32xf32, #tpu.memory_space<vmem>>, vector<1x32xf32>
    %c0_48 = arith.constant 0 : index
    %c0_49 = arith.constant 0 : index
    %64 = vector.load %arg27[%c0_48, %c0_49] : memref<1x32xf32, #tpu.memory_space<vmem>>, vector<1x32xf32>
    %c0_50 = arith.constant 0 : index
    %c0_51 = arith.constant 0 : index
    %65 = vector.load %arg28[%c0_50, %c0_51] : memref<32x4xf32, #tpu.memory_space<vmem>>, vector<32x4xf32>
    %c0_52 = arith.constant 0 : index
    %c0_53 = arith.constant 0 : index
    %66 = vector.load %arg29[%c0_52, %c0_53] : memref<1x4xf32, #tpu.memory_space<vmem>>, vector<1x4xf32>
    %67 = vector.broadcast %2 : vector<16x1xf32> to vector<16x32xf32>
    %68 = vector.broadcast %63 : vector<1x32xf32> to vector<16x32xf32>
    %69 = arith.mulf %67, %68 : vector<16x32xf32>
    %70 = vector.broadcast %64 : vector<1x32xf32> to vector<16x32xf32>
    %71 = arith.addf %69, %70 : vector<16x32xf32>
    %cst_54 = arith.constant 0.000000e+00 : f32
    %72 = vector.broadcast %cst_54 : f32 to vector<16x32xf32>
    %73 = arith.maximumf %71, %72 : vector<16x32xf32>
    %cst_55 = arith.constant dense<0.000000e+00> : vector<16x4xf32>
    %74 = tpu.matmul %73, %65, %cst_55 {dimension_numbers = #tpu.dot_dimension_numbers<[1], [0], [0], [1], [0, 0, 1, 1], [], []>} : vector<16x32xf32>, vector<32x4xf32>, vector<16x4xf32> -> vector<16x4xf32>
    %75 = vector.broadcast %66 : vector<1x4xf32> to vector<16x4xf32>
    %76 = arith.addf %74, %75 : vector<16x4xf32>
    %77 = arith.addf %0, %1 : vector<16x32xf32>
    %c0_56 = arith.constant 0 : index
    %c0_57 = arith.constant 0 : index
    %78 = vector.load %arg6[%c0_56, %c0_57] : memref<32x64xf32, #tpu.memory_space<vmem>>, vector<32x64xf32>
    %c0_58 = arith.constant 0 : index
    %c0_59 = arith.constant 0 : index
    %79 = vector.load %arg7[%c0_58, %c0_59] : memref<1x64xf32, #tpu.memory_space<vmem>>, vector<1x64xf32>
    %cst_60 = arith.constant dense<0.000000e+00> : vector<16x64xf32>
    %80 = tpu.matmul %77, %78, %cst_60 {dimension_numbers = #tpu.dot_dimension_numbers<[1], [0], [0], [1], [0, 0, 1, 1], [], []>} : vector<16x32xf32>, vector<32x64xf32>, vector<16x64xf32> -> vector<16x64xf32>
    %81 = vector.broadcast %79 : vector<1x64xf32> to vector<16x64xf32>
    %82 = arith.addf %80, %81 : vector<16x64xf32>
    %c0_61 = arith.constant 0 : index
    %c0_62 = arith.constant 0 : index
    %83 = vector.load %arg8[%c0_61, %c0_62] : memref<32x32xf32, #tpu.memory_space<vmem>>, vector<32x32xf32>
    %c0_63 = arith.constant 0 : index
    %c0_64 = arith.constant 0 : index
    %84 = vector.load %arg9[%c0_63, %c0_64] : memref<1x32xf32, #tpu.memory_space<vmem>>, vector<1x32xf32>
    %cst_65 = arith.constant dense<0.000000e+00> : vector<16x32xf32>
    %85 = tpu.matmul %0, %83, %cst_65 {dimension_numbers = #tpu.dot_dimension_numbers<[1], [0], [0], [1], [0, 0, 1, 1], [], []>} : vector<16x32xf32>, vector<32x32xf32>, vector<16x32xf32> -> vector<16x32xf32>
    %86 = vector.broadcast %84 : vector<1x32xf32> to vector<16x32xf32>
    %87 = arith.addf %85, %86 : vector<16x32xf32>
    %88 = vector.extract_strided_slice %82 {offsets = [0, 0], sizes = [16, 32], strides = [1, 1]} : vector<16x64xf32> to vector<16x32xf32>
    %89 = vector.extract_strided_slice %82 {offsets = [0, 32], sizes = [16, 32], strides = [1, 1]} : vector<16x64xf32> to vector<16x32xf32>
    %90 = tpu.transpose %88, [1, 0] : vector<16x32xf32> -> vector<32x16xf32>
    %91 = vector.shape_cast %90 : vector<32x16xf32> to vector<4x8x16xf32>
    %92 = tpu.transpose %91, [0, 2, 1] : vector<4x8x16xf32> -> vector<4x16x8xf32>
    %93 = tpu.transpose %89, [1, 0] : vector<16x32xf32> -> vector<32x16xf32>
    %94 = vector.shape_cast %93 : vector<32x16xf32> to vector<4x8x16xf32>
    %95 = tpu.transpose %94, [0, 2, 1] : vector<4x8x16xf32> -> vector<4x16x8xf32>
    %96 = tpu.transpose %87, [1, 0] : vector<16x32xf32> -> vector<32x16xf32>
    %97 = vector.shape_cast %96 : vector<32x16xf32> to vector<4x8x16xf32>
    %98 = tpu.transpose %97, [0, 2, 1] : vector<4x8x16xf32> -> vector<4x16x8xf32>
    %99 = arith.negf %47 : vector<16x4xf32>
    %100 = math.exp %99 : vector<16x4xf32>
    %cst_66 = arith.constant 1.000000e+00 : f32
    %101 = vector.broadcast %cst_66 : f32 to vector<16x4xf32>
    %102 = arith.addf %101, %100 : vector<16x4xf32>
    %103 = arith.divf %101, %102 : vector<16x4xf32>
    %104 = tpu.transpose %103, [1, 0] : vector<16x4xf32> -> vector<4x16xf32>
    %105 = arith.negf %62 : vector<16x4xf32>
    %106 = math.exp %105 : vector<16x4xf32>
    %cst_67 = arith.constant 1.000000e+00 : f32
    %107 = vector.broadcast %cst_67 : f32 to vector<16x4xf32>
    %108 = arith.addf %107, %106 : vector<16x4xf32>
    %109 = arith.divf %107, %108 : vector<16x4xf32>
    %110 = arith.negf %76 : vector<16x4xf32>
    %111 = math.exp %110 : vector<16x4xf32>
    %cst_68 = arith.constant 1.000000e+00 : f32
    %112 = vector.broadcast %cst_68 : f32 to vector<16x4xf32>
    %113 = arith.addf %112, %111 : vector<16x4xf32>
    %114 = arith.divf %112, %113 : vector<16x4xf32>
    %115 = arith.mulf %109, %114 : vector<16x4xf32>
    %116 = tpu.transpose %115, [1, 0] : vector<16x4xf32> -> vector<4x16xf32>
    "tpu.trace_start"() <{level = 10 : i32, message = "hqd,hkd->hqk"}> : () -> ()
    %cst_69 = arith.constant dense<0.000000e+00> : vector<4x16x16xf32>
    %117 = tpu.matmul %92, %95, %cst_69 {dimension_numbers = #tpu.dot_dimension_numbers<[2], [2], [1], [1], [0, 0, 0, 1, 1, 1], [0], [0]>} : vector<4x16x8xf32>, vector<4x16x8xf32>, vector<4x16x16xf32> -> vector<4x16x16xf32>
    "tpu.trace_stop"() : () -> ()
    %cst_70 = arith.constant 0.353553385 : f32
    %118 = vector.broadcast %cst_70 : f32 to vector<4x16x16xf32>
    %119 = arith.mulf %117, %118 : vector<4x16x16xf32>
    %120 = tpu.iota {dimensions = array<i32: 0>} : vector<16x16xi32>
    %c2_i32 = arith.constant 2 : i32
    %c0_i32 = arith.constant 0 : i32
    %121 = arith.cmpi eq, %c2_i32, %c0_i32 : i32
    %c1_i32 = arith.constant 1 : i32
    %122 = arith.select %121, %c1_i32, %c2_i32 : i32
    %123 = vector.broadcast %122 : i32 to vector<16x16xi32>
    %124 = arith.remsi %120, %123 : vector<16x16xi32>
    %c0_i32_71 = arith.constant 0 : i32
    %125 = vector.broadcast %c0_i32_71 : i32 to vector<16x16xi32>
    %126 = arith.cmpi ne, %124, %125 : vector<16x16xi32>
    %c0_i32_72 = arith.constant 0 : i32
    %127 = vector.broadcast %c0_i32_72 : i32 to vector<16x16xi32>
    %128 = arith.cmpi slt, %124, %127 : vector<16x16xi32>
    %c0_i32_73 = arith.constant 0 : i32
    %129 = arith.cmpi slt, %122, %c0_i32_73 : i32
    %130 = vector.broadcast %129 : i1 to vector<16x16xi1>
    %131 = vector.broadcast %130 : vector<16x16xi1> to vector<16x16xi1>
    %132 = arith.xori %128, %131 : vector<16x16xi1>
    %133 = arith.andi %132, %126 : vector<16x16xi1>
    %134 = vector.broadcast %122 : i32 to vector<16x16xi32>
    %135 = arith.addi %124, %134 : vector<16x16xi32>
    %136 = arith.select %133, %135, %124 : vector<16x16xi1>, vector<16x16xi32>
    %137 = tpu.iota {dimensions = array<i32: 1>} : vector<16x16xi32>
    %c2_i32_74 = arith.constant 2 : i32
    %c0_i32_75 = arith.constant 0 : i32
    %138 = arith.cmpi eq, %c2_i32_74, %c0_i32_75 : i32
    %c1_i32_76 = arith.constant 1 : i32
    %139 = arith.select %138, %c1_i32_76, %c2_i32_74 : i32
    %140 = vector.broadcast %139 : i32 to vector<16x16xi32>
    %141 = arith.remsi %137, %140 : vector<16x16xi32>
    %c0_i32_77 = arith.constant 0 : i32
    %142 = vector.broadcast %c0_i32_77 : i32 to vector<16x16xi32>
    %143 = arith.cmpi ne, %141, %142 : vector<16x16xi32>
    %c0_i32_78 = arith.constant 0 : i32
    %144 = vector.broadcast %c0_i32_78 : i32 to vector<16x16xi32>
    %145 = arith.cmpi slt, %141, %144 : vector<16x16xi32>
    %c0_i32_79 = arith.constant 0 : i32
    %146 = arith.cmpi slt, %139, %c0_i32_79 : i32
    %147 = vector.broadcast %146 : i1 to vector<16x16xi1>
    %148 = vector.broadcast %147 : vector<16x16xi1> to vector<16x16xi1>
    %149 = arith.xori %145, %148 : vector<16x16xi1>
    %150 = arith.andi %149, %143 : vector<16x16xi1>
    %151 = vector.broadcast %139 : i32 to vector<16x16xi32>
    %152 = arith.addi %141, %151 : vector<16x16xi32>
    %153 = arith.select %150, %152, %141 : vector<16x16xi1>, vector<16x16xi32>
    %154 = arith.cmpi eq, %136, %153 : vector<16x16xi32>
    %155 = vector.shape_cast %154 : vector<16x16xi1> to vector<1x16x16xi1>
    %cst_80 = arith.constant -1.000000e+30 : f32
    %156 = vector.shape_cast %155 : vector<1x16x16xi1> to vector<1x16x16xi1>
    %157 = vector.broadcast %156 : vector<1x16x16xi1> to vector<4x16x16xi1>
    %158 = vector.broadcast %cst_80 : f32 to vector<4x16x16xf32>
    %159 = arith.select %157, %119, %158 : vector<4x16x16xi1>, vector<4x16x16xf32>
    %cst_81 = arith.constant dense<0xFF800000> : vector<4x16xf32>
    %160 = vector.multi_reduction <maximumf>, %159, %cst_81 [2] : vector<4x16x16xf32> to vector<4x16xf32>
    %161 = vector.shape_cast %160 : vector<4x16xf32> to vector<4x16x1xf32>
    %162 = vector.broadcast %161 : vector<4x16x1xf32> to vector<4x16x16xf32>
    %163 = arith.subf %159, %162 : vector<4x16x16xf32>
    %164 = math.exp %163 : vector<4x16x16xf32>
    %cst_82 = arith.constant dense<0.000000e+00> : vector<4x16xf32>
    %165 = vector.multi_reduction <add>, %164, %cst_82 [2] : vector<4x16x16xf32> to vector<4x16xf32>
    %166 = vector.shape_cast %165 : vector<4x16xf32> to vector<4x16x1xf32>
    %167 = vector.broadcast %166 : vector<4x16x1xf32> to vector<4x16x16xf32>
    %168 = arith.divf %164, %167 : vector<4x16x16xf32>
    %169 = vector.shape_cast %104 : vector<4x16xf32> to vector<4x16x1xf32>
    %170 = vector.broadcast %169 : vector<4x16x1xf32> to vector<4x16x16xf32>
    %171 = arith.mulf %168, %170 : vector<4x16x16xf32>
    %172 = vector.shape_cast %116 : vector<4x16xf32> to vector<4x16x1xf32>
    %173 = vector.broadcast %172 : vector<4x16x1xf32> to vector<4x16x8xf32>
    %174 = arith.mulf %98, %173 : vector<4x16x8xf32>
    "tpu.trace_start"() <{level = 10 : i32, message = "hqk,hkd->hqd"}> : () -> ()
    %cst_83 = arith.constant dense<0.000000e+00> : vector<4x16x8xf32>
    %175 = tpu.matmul %171, %174, %cst_83 {dimension_numbers = #tpu.dot_dimension_numbers<[2], [1], [1], [2], [0, 0, 0, 1, 1, 2], [0], [0]>} : vector<4x16x16xf32>, vector<4x16x8xf32>, vector<4x16x8xf32> -> vector<4x16x8xf32>
    "tpu.trace_stop"() : () -> ()
    %176 = vector.shape_cast %116 : vector<4x16xf32> to vector<4x1x16xf32>
    %177 = vector.broadcast %176 : vector<4x1x16xf32> to vector<4x16x16xf32>
    %178 = arith.mulf %171, %177 : vector<4x16x16xf32>
    %cst_84 = arith.constant dense<0.000000e+00> : vector<4x16xf32>
    %179 = vector.multi_reduction <add>, %178, %cst_84 [2] : vector<4x16x16xf32> to vector<4x16xf32>
    %180 = tpu.transpose %175, [0, 2, 1] : vector<4x16x8xf32> -> vector<4x8x16xf32>
    %181 = vector.shape_cast %180 : vector<4x8x16xf32> to vector<32x16xf32>
    %182 = tpu.transpose %181, [1, 0] : vector<32x16xf32> -> vector<16x32xf32>
    %183 = tpu.transpose %179, [1, 0] : vector<4x16xf32> -> vector<16x4xf32>
    %c0_85 = arith.constant 0 : index
    %c0_86 = arith.constant 0 : index
    %184 = vector.load %arg10[%c0_85, %c0_86] : memref<32x32xf32, #tpu.memory_space<vmem>>, vector<32x32xf32>
    %c0_87 = arith.constant 0 : index
    %c0_88 = arith.constant 0 : index
    %185 = vector.load %arg11[%c0_87, %c0_88] : memref<1x32xf32, #tpu.memory_space<vmem>>, vector<1x32xf32>
    %cst_89 = arith.constant dense<0.000000e+00> : vector<16x32xf32>
    %186 = tpu.matmul %182, %184, %cst_89 {dimension_numbers = #tpu.dot_dimension_numbers<[1], [0], [0], [1], [0, 0, 1, 1], [], []>} : vector<16x32xf32>, vector<32x32xf32>, vector<16x32xf32> -> vector<16x32xf32>
    %187 = vector.broadcast %185 : vector<1x32xf32> to vector<16x32xf32>
    %188 = arith.addf %186, %187 : vector<16x32xf32>
    %189 = arith.addf %0, %188 : vector<16x32xf32>
    %c0_90 = arith.constant 0 : index
    %c0_91 = arith.constant 0 : index
    %190 = vector.load %arg34[%c0_90, %c0_91] : memref<1x32xf32, #tpu.memory_space<vmem>>, vector<1x32xf32>
    %c0_92 = arith.constant 0 : index
    %c0_93 = arith.constant 0 : index
    %191 = vector.load %arg35[%c0_92, %c0_93] : memref<1x32xf32, #tpu.memory_space<vmem>>, vector<1x32xf32>
    %cst_94 = arith.constant dense<0.000000e+00> : vector<16xf32>
    %192 = vector.multi_reduction <add>, %189, %cst_94 [1] : vector<16x32xf32> to vector<16xf32>
    %193 = vector.shape_cast %192 : vector<16xf32> to vector<16x1xf32>
    %cst_95 = arith.constant 3.200000e+01 : f32
    %194 = vector.broadcast %cst_95 : f32 to vector<16x1xf32>
    %195 = arith.divf %193, %194 : vector<16x1xf32>
    %196 = vector.broadcast %195 : vector<16x1xf32> to vector<16x32xf32>
    %197 = arith.subf %189, %196 : vector<16x32xf32>
    %198 = arith.mulf %197, %197 : vector<16x32xf32>
    %cst_96 = arith.constant dense<0.000000e+00> : vector<16xf32>
    %199 = vector.multi_reduction <add>, %198, %cst_96 [1] : vector<16x32xf32> to vector<16xf32>
    %200 = vector.shape_cast %199 : vector<16xf32> to vector<16x1xf32>
    %cst_97 = arith.constant 3.200000e+01 : f32
    %201 = vector.broadcast %cst_97 : f32 to vector<16x1xf32>
    %202 = arith.divf %200, %201 : vector<16x1xf32>
    %cst_98 = arith.constant 9.99999974E-6 : f32
    %203 = vector.broadcast %cst_98 : f32 to vector<16x1xf32>
    %204 = arith.addf %202, %203 : vector<16x1xf32>
    %205 = math.rsqrt %204 : vector<16x1xf32>
    %206 = vector.broadcast %205 : vector<16x1xf32> to vector<16x32xf32>
    %207 = arith.mulf %197, %206 : vector<16x32xf32>
    %208 = vector.broadcast %190 : vector<1x32xf32> to vector<16x32xf32>
    %209 = arith.mulf %207, %208 : vector<16x32xf32>
    %210 = vector.broadcast %191 : vector<1x32xf32> to vector<16x32xf32>
    %211 = arith.addf %209, %210 : vector<16x32xf32>
    %c0_99 = arith.constant 0 : index
    %c0_100 = arith.constant 0 : index
    %212 = vector.load %arg30[%c0_99, %c0_100] : memref<4x32xf32, #tpu.memory_space<vmem>>, vector<4x32xf32>
    %c0_101 = arith.constant 0 : index
    %c0_102 = arith.constant 0 : index
    %213 = vector.load %arg31[%c0_101, %c0_102] : memref<1x32xf32, #tpu.memory_space<vmem>>, vector<1x32xf32>
    %c0_103 = arith.constant 0 : index
    %c0_104 = arith.constant 0 : index
    %214 = vector.load %arg32[%c0_103, %c0_104] : memref<32x1xf32, #tpu.memory_space<vmem>>, vector<32x1xf32>
    %c0_105 = arith.constant 0 : index
    %c0_106 = arith.constant 0 : index
    %215 = vector.load %arg33[%c0_105, %c0_106] : memref<1x1xf32, #tpu.memory_space<vmem>>, vector<1x1xf32>
    %cst_107 = arith.constant dense<0.000000e+00> : vector<16x32xf32>
    %216 = tpu.matmul %183, %212, %cst_107 {dimension_numbers = #tpu.dot_dimension_numbers<[1], [0], [0], [1], [0, 0, 1, 1], [], []>} : vector<16x4xf32>, vector<4x32xf32>, vector<16x32xf32> -> vector<16x32xf32>
    %217 = vector.broadcast %213 : vector<1x32xf32> to vector<16x32xf32>
    %218 = arith.addf %216, %217 : vector<16x32xf32>
    %cst_108 = arith.constant 0.000000e+00 : f32
    %219 = vector.broadcast %cst_108 : f32 to vector<16x32xf32>
    %220 = arith.maximumf %218, %219 : vector<16x32xf32>
    %221 = vector.shape_cast %214 : vector<32x1xf32> to vector<1x32xf32>
    %222 = vector.broadcast %221 : vector<1x32xf32> to vector<16x32xf32>
    %223 = arith.mulf %220, %222 : vector<16x32xf32>
    %cst_109 = arith.constant dense<0.000000e+00> : vector<16xf32>
    %224 = vector.multi_reduction <add>, %223, %cst_109 [1] : vector<16x32xf32> to vector<16xf32>
    %225 = vector.shape_cast %224 : vector<16xf32> to vector<16x1xf32>
    %226 = vector.broadcast %215 : vector<1x1xf32> to vector<16x1xf32>
    %227 = arith.addf %225, %226 : vector<16x1xf32>
    %228 = arith.addf %227, %2 : vector<16x1xf32>
    %c0_110 = arith.constant 0 : index
    %c0_111 = arith.constant 0 : index
    %229 = vector.load %arg44[%c0_110, %c0_111] : memref<32x32xf32, #tpu.memory_space<vmem>>, vector<32x32xf32>
    %c0_112 = arith.constant 0 : index
    %c0_113 = arith.constant 0 : index
    %230 = vector.load %arg45[%c0_112, %c0_113] : memref<1x32xf32, #tpu.memory_space<vmem>>, vector<1x32xf32>
    %c0_114 = arith.constant 0 : index
    %c0_115 = arith.constant 0 : index
    %231 = vector.load %arg46[%c0_114, %c0_115] : memref<32x1xf32, #tpu.memory_space<vmem>>, vector<32x1xf32>
    %c0_116 = arith.constant 0 : index
    %c0_117 = arith.constant 0 : index
    %232 = vector.load %arg47[%c0_116, %c0_117] : memref<1x1xf32, #tpu.memory_space<vmem>>, vector<1x1xf32>
    %cst_118 = arith.constant dense<0.000000e+00> : vector<16x32xf32>
    %233 = tpu.matmul %1, %229, %cst_118 {dimension_numbers = #tpu.dot_dimension_numbers<[1], [0], [0], [1], [0, 0, 1, 1], [], []>} : vector<16x32xf32>, vector<32x32xf32>, vector<16x32xf32> -> vector<16x32xf32>
    %234 = vector.broadcast %230 : vector<1x32xf32> to vector<16x32xf32>
    %235 = arith.addf %233, %234 : vector<16x32xf32>
    %cst_119 = arith.constant 0.000000e+00 : f32
    %236 = vector.broadcast %cst_119 : f32 to vector<16x32xf32>
    %237 = arith.maximumf %235, %236 : vector<16x32xf32>
    %238 = vector.shape_cast %231 : vector<32x1xf32> to vector<1x32xf32>
    %239 = vector.broadcast %238 : vector<1x32xf32> to vector<16x32xf32>
    %240 = arith.mulf %237, %239 : vector<16x32xf32>
    %cst_120 = arith.constant dense<0.000000e+00> : vector<16xf32>
    %241 = vector.multi_reduction <add>, %240, %cst_120 [1] : vector<16x32xf32> to vector<16xf32>
    %242 = vector.shape_cast %241 : vector<16xf32> to vector<16x1xf32>
    %243 = vector.broadcast %232 : vector<1x1xf32> to vector<16x1xf32>
    %244 = arith.addf %242, %243 : vector<16x1xf32>
    %c0_121 = arith.constant 0 : index
    %c0_122 = arith.constant 0 : index
    %245 = vector.load %arg48[%c0_121, %c0_122] : memref<32x32xf32, #tpu.memory_space<vmem>>, vector<32x32xf32>
    %c0_123 = arith.constant 0 : index
    %c0_124 = arith.constant 0 : index
    %246 = vector.load %arg49[%c0_123, %c0_124] : memref<1x32xf32, #tpu.memory_space<vmem>>, vector<1x32xf32>
    %c0_125 = arith.constant 0 : index
    %c0_126 = arith.constant 0 : index
    %247 = vector.load %arg50[%c0_125, %c0_126] : memref<32x1xf32, #tpu.memory_space<vmem>>, vector<32x1xf32>
    %c0_127 = arith.constant 0 : index
    %c0_128 = arith.constant 0 : index
    %248 = vector.load %arg51[%c0_127, %c0_128] : memref<1x1xf32, #tpu.memory_space<vmem>>, vector<1x1xf32>
    %cst_129 = arith.constant dense<0.000000e+00> : vector<32x32xf32>
    %249 = tpu.matmul %4, %245, %cst_129 {dimension_numbers = #tpu.dot_dimension_numbers<[1], [0], [0], [1], [0, 0, 1, 1], [], []>} : vector<32x32xf32>, vector<32x32xf32>, vector<32x32xf32> -> vector<32x32xf32>
    %250 = vector.broadcast %246 : vector<1x32xf32> to vector<32x32xf32>
    %251 = arith.addf %249, %250 : vector<32x32xf32>
    %cst_130 = arith.constant 0.000000e+00 : f32
    %252 = vector.broadcast %cst_130 : f32 to vector<32x32xf32>
    %253 = arith.maximumf %251, %252 : vector<32x32xf32>
    %254 = vector.shape_cast %247 : vector<32x1xf32> to vector<1x32xf32>
    %255 = vector.broadcast %254 : vector<1x32xf32> to vector<32x32xf32>
    %256 = arith.mulf %253, %255 : vector<32x32xf32>
    %cst_131 = arith.constant dense<0.000000e+00> : vector<32xf32>
    %257 = vector.multi_reduction <add>, %256, %cst_131 [1] : vector<32x32xf32> to vector<32xf32>
    %258 = vector.shape_cast %257 : vector<32xf32> to vector<32x1xf32>
    %259 = vector.broadcast %248 : vector<1x1xf32> to vector<32x1xf32>
    %260 = arith.addf %258, %259 : vector<32x1xf32>
    %261 = arith.addf %228, %244 : vector<16x1xf32>
    %c0_132 = arith.constant 0 : index
    %c0_133 = arith.constant 0 : index
    %262 = vector.load %arg52[%c0_132, %c0_133] : memref<1x32xf32, #tpu.memory_space<vmem>>, vector<1x32xf32>
    %c0_134 = arith.constant 0 : index
    %c0_135 = arith.constant 0 : index
    %263 = vector.load %arg53[%c0_134, %c0_135] : memref<1x32xf32, #tpu.memory_space<vmem>>, vector<1x32xf32>
    %c0_136 = arith.constant 0 : index
    %c0_137 = arith.constant 0 : index
    %264 = vector.load %arg54[%c0_136, %c0_137] : memref<32x4xf32, #tpu.memory_space<vmem>>, vector<32x4xf32>
    %c0_138 = arith.constant 0 : index
    %c0_139 = arith.constant 0 : index
    %265 = vector.load %arg55[%c0_138, %c0_139] : memref<1x4xf32, #tpu.memory_space<vmem>>, vector<1x4xf32>
    %266 = vector.broadcast %261 : vector<16x1xf32> to vector<16x32xf32>
    %267 = vector.broadcast %262 : vector<1x32xf32> to vector<16x32xf32>
    %268 = arith.mulf %266, %267 : vector<16x32xf32>
    %269 = vector.broadcast %263 : vector<1x32xf32> to vector<16x32xf32>
    %270 = arith.addf %268, %269 : vector<16x32xf32>
    %cst_140 = arith.constant 0.000000e+00 : f32
    %271 = vector.broadcast %cst_140 : f32 to vector<16x32xf32>
    %272 = arith.maximumf %270, %271 : vector<16x32xf32>
    %cst_141 = arith.constant dense<0.000000e+00> : vector<16x4xf32>
    %273 = tpu.matmul %272, %264, %cst_141 {dimension_numbers = #tpu.dot_dimension_numbers<[1], [0], [0], [1], [0, 0, 1, 1], [], []>} : vector<16x32xf32>, vector<32x4xf32>, vector<16x4xf32> -> vector<16x4xf32>
    %274 = vector.broadcast %265 : vector<1x4xf32> to vector<16x4xf32>
    %275 = arith.addf %273, %274 : vector<16x4xf32>
    %276 = arith.addf %5, %260 : vector<32x1xf32>
    %c0_142 = arith.constant 0 : index
    %c0_143 = arith.constant 0 : index
    %277 = vector.load %arg56[%c0_142, %c0_143] : memref<1x32xf32, #tpu.memory_space<vmem>>, vector<1x32xf32>
    %c0_144 = arith.constant 0 : index
    %c0_145 = arith.constant 0 : index
    %278 = vector.load %arg57[%c0_144, %c0_145] : memref<1x32xf32, #tpu.memory_space<vmem>>, vector<1x32xf32>
    %c0_146 = arith.constant 0 : index
    %c0_147 = arith.constant 0 : index
    %279 = vector.load %arg58[%c0_146, %c0_147] : memref<32x4xf32, #tpu.memory_space<vmem>>, vector<32x4xf32>
    %c0_148 = arith.constant 0 : index
    %c0_149 = arith.constant 0 : index
    %280 = vector.load %arg59[%c0_148, %c0_149] : memref<1x4xf32, #tpu.memory_space<vmem>>, vector<1x4xf32>
    %281 = vector.broadcast %276 : vector<32x1xf32> to vector<32x32xf32>
    %282 = vector.broadcast %277 : vector<1x32xf32> to vector<32x32xf32>
    %283 = arith.mulf %281, %282 : vector<32x32xf32>
    %284 = vector.broadcast %278 : vector<1x32xf32> to vector<32x32xf32>
    %285 = arith.addf %283, %284 : vector<32x32xf32>
    %cst_150 = arith.constant 0.000000e+00 : f32
    %286 = vector.broadcast %cst_150 : f32 to vector<32x32xf32>
    %287 = arith.maximumf %285, %286 : vector<32x32xf32>
    %cst_151 = arith.constant dense<0.000000e+00> : vector<32x4xf32>
    %288 = tpu.matmul %287, %279, %cst_151 {dimension_numbers = #tpu.dot_dimension_numbers<[1], [0], [0], [1], [0, 0, 1, 1], [], []>} : vector<32x32xf32>, vector<32x4xf32>, vector<32x4xf32> -> vector<32x4xf32>
    %289 = vector.broadcast %280 : vector<1x4xf32> to vector<32x4xf32>
    %290 = arith.addf %288, %289 : vector<32x4xf32>
    %c0_152 = arith.constant 0 : index
    %c0_153 = arith.constant 0 : index
    %291 = vector.load %arg60[%c0_152, %c0_153] : memref<1x32xf32, #tpu.memory_space<vmem>>, vector<1x32xf32>
    %c0_154 = arith.constant 0 : index
    %c0_155 = arith.constant 0 : index
    %292 = vector.load %arg61[%c0_154, %c0_155] : memref<1x32xf32, #tpu.memory_space<vmem>>, vector<1x32xf32>
    %c0_156 = arith.constant 0 : index
    %c0_157 = arith.constant 0 : index
    %293 = vector.load %arg62[%c0_156, %c0_157] : memref<32x4xf32, #tpu.memory_space<vmem>>, vector<32x4xf32>
    %c0_158 = arith.constant 0 : index
    %c0_159 = arith.constant 0 : index
    %294 = vector.load %arg63[%c0_158, %c0_159] : memref<1x4xf32, #tpu.memory_space<vmem>>, vector<1x4xf32>
    %295 = vector.broadcast %5 : vector<32x1xf32> to vector<32x32xf32>
    %296 = vector.broadcast %291 : vector<1x32xf32> to vector<32x32xf32>
    %297 = arith.mulf %295, %296 : vector<32x32xf32>
    %298 = vector.broadcast %292 : vector<1x32xf32> to vector<32x32xf32>
    %299 = arith.addf %297, %298 : vector<32x32xf32>
    %cst_160 = arith.constant 0.000000e+00 : f32
    %300 = vector.broadcast %cst_160 : f32 to vector<32x32xf32>
    %301 = arith.maximumf %299, %300 : vector<32x32xf32>
    %cst_161 = arith.constant dense<0.000000e+00> : vector<32x4xf32>
    %302 = tpu.matmul %301, %293, %cst_161 {dimension_numbers = #tpu.dot_dimension_numbers<[1], [0], [0], [1], [0, 0, 1, 1], [], []>} : vector<32x32xf32>, vector<32x4xf32>, vector<32x4xf32> -> vector<32x4xf32>
    %303 = vector.broadcast %294 : vector<1x4xf32> to vector<32x4xf32>
    %304 = arith.addf %302, %303 : vector<32x4xf32>
    %305 = arith.addf %211, %1 : vector<16x32xf32>
    %c0_162 = arith.constant 0 : index
    %c0_163 = arith.constant 0 : index
    %306 = vector.load %arg36[%c0_162, %c0_163] : memref<32x32xf32, #tpu.memory_space<vmem>>, vector<32x32xf32>
    %c0_164 = arith.constant 0 : index
    %c0_165 = arith.constant 0 : index
    %307 = vector.load %arg37[%c0_164, %c0_165] : memref<1x32xf32, #tpu.memory_space<vmem>>, vector<1x32xf32>
    %cst_166 = arith.constant dense<0.000000e+00> : vector<16x32xf32>
    %308 = tpu.matmul %305, %306, %cst_166 {dimension_numbers = #tpu.dot_dimension_numbers<[1], [0], [0], [1], [0, 0, 1, 1], [], []>} : vector<16x32xf32>, vector<32x32xf32>, vector<16x32xf32> -> vector<16x32xf32>
    %309 = vector.broadcast %307 : vector<1x32xf32> to vector<16x32xf32>
    %310 = arith.addf %308, %309 : vector<16x32xf32>
    %311 = arith.addf %3, %4 : vector<32x32xf32>
    %c0_167 = arith.constant 0 : index
    %c0_168 = arith.constant 0 : index
    %312 = vector.load %arg38[%c0_167, %c0_168] : memref<32x32xf32, #tpu.memory_space<vmem>>, vector<32x32xf32>
    %c0_169 = arith.constant 0 : index
    %c0_170 = arith.constant 0 : index
    %313 = vector.load %arg39[%c0_169, %c0_170] : memref<1x32xf32, #tpu.memory_space<vmem>>, vector<1x32xf32>
    %cst_171 = arith.constant dense<0.000000e+00> : vector<32x32xf32>
    %314 = tpu.matmul %311, %312, %cst_171 {dimension_numbers = #tpu.dot_dimension_numbers<[1], [0], [0], [1], [0, 0, 1, 1], [], []>} : vector<32x32xf32>, vector<32x32xf32>, vector<32x32xf32> -> vector<32x32xf32>
    %315 = vector.broadcast %313 : vector<1x32xf32> to vector<32x32xf32>
    %316 = arith.addf %314, %315 : vector<32x32xf32>
    %c0_172 = arith.constant 0 : index
    %c0_173 = arith.constant 0 : index
    %317 = vector.load %arg40[%c0_172, %c0_173] : memref<32x32xf32, #tpu.memory_space<vmem>>, vector<32x32xf32>
    %c0_174 = arith.constant 0 : index
    %c0_175 = arith.constant 0 : index
    %318 = vector.load %arg41[%c0_174, %c0_175] : memref<1x32xf32, #tpu.memory_space<vmem>>, vector<1x32xf32>
    %cst_176 = arith.constant dense<0.000000e+00> : vector<32x32xf32>
    %319 = tpu.matmul %3, %317, %cst_176 {dimension_numbers = #tpu.dot_dimension_numbers<[1], [0], [0], [1], [0, 0, 1, 1], [], []>} : vector<32x32xf32>, vector<32x32xf32>, vector<32x32xf32> -> vector<32x32xf32>
    %320 = vector.broadcast %318 : vector<1x32xf32> to vector<32x32xf32>
    %321 = arith.addf %319, %320 : vector<32x32xf32>
    %322 = tpu.transpose %310, [1, 0] : vector<16x32xf32> -> vector<32x16xf32>
    %323 = vector.shape_cast %322 : vector<32x16xf32> to vector<4x8x16xf32>
    %324 = tpu.transpose %323, [0, 2, 1] : vector<4x8x16xf32> -> vector<4x16x8xf32>
    %325 = tpu.transpose %316, [1, 0] : vector<32x32xf32> -> vector<32x32xf32>
    %326 = vector.shape_cast %325 : vector<32x32xf32> to vector<4x8x32xf32>
    %327 = tpu.transpose %326, [0, 2, 1] : vector<4x8x32xf32> -> vector<4x32x8xf32>
    %328 = tpu.transpose %321, [1, 0] : vector<32x32xf32> -> vector<32x32xf32>
    %329 = vector.shape_cast %328 : vector<32x32xf32> to vector<4x8x32xf32>
    %330 = tpu.transpose %329, [0, 2, 1] : vector<4x8x32xf32> -> vector<4x32x8xf32>
    %331 = arith.negf %275 : vector<16x4xf32>
    %332 = math.exp %331 : vector<16x4xf32>
    %cst_177 = arith.constant 1.000000e+00 : f32
    %333 = vector.broadcast %cst_177 : f32 to vector<16x4xf32>
    %334 = arith.addf %333, %332 : vector<16x4xf32>
    %335 = arith.divf %333, %334 : vector<16x4xf32>
    %336 = tpu.transpose %335, [1, 0] : vector<16x4xf32> -> vector<4x16xf32>
    %337 = arith.negf %290 : vector<32x4xf32>
    %338 = math.exp %337 : vector<32x4xf32>
    %cst_178 = arith.constant 1.000000e+00 : f32
    %339 = vector.broadcast %cst_178 : f32 to vector<32x4xf32>
    %340 = arith.addf %339, %338 : vector<32x4xf32>
    %341 = arith.divf %339, %340 : vector<32x4xf32>
    %342 = arith.negf %304 : vector<32x4xf32>
    %343 = math.exp %342 : vector<32x4xf32>
    %cst_179 = arith.constant 1.000000e+00 : f32
    %344 = vector.broadcast %cst_179 : f32 to vector<32x4xf32>
    %345 = arith.addf %344, %343 : vector<32x4xf32>
    %346 = arith.divf %344, %345 : vector<32x4xf32>
    %347 = arith.mulf %341, %346 : vector<32x4xf32>
    %348 = tpu.transpose %347, [1, 0] : vector<32x4xf32> -> vector<4x32xf32>
    "tpu.trace_start"() <{level = 10 : i32, message = "hqd,hkd->hqk"}> : () -> ()
    %cst_180 = arith.constant dense<0.000000e+00> : vector<4x16x32xf32>
    %349 = tpu.matmul %324, %327, %cst_180 {dimension_numbers = #tpu.dot_dimension_numbers<[2], [2], [1], [1], [0, 0, 0, 1, 1, 1], [0], [0]>} : vector<4x16x8xf32>, vector<4x32x8xf32>, vector<4x16x32xf32> -> vector<4x16x32xf32>
    "tpu.trace_stop"() : () -> ()
    %cst_181 = arith.constant 0.353553385 : f32
    %350 = vector.broadcast %cst_181 : f32 to vector<4x16x32xf32>
    %351 = arith.mulf %349, %350 : vector<4x16x32xf32>
    %352 = tpu.iota {dimensions = array<i32: 0>} : vector<16x32xi32>
    %c2_i32_182 = arith.constant 2 : i32
    %c0_i32_183 = arith.constant 0 : i32
    %353 = arith.cmpi eq, %c2_i32_182, %c0_i32_183 : i32
    %c1_i32_184 = arith.constant 1 : i32
    %354 = arith.select %353, %c1_i32_184, %c2_i32_182 : i32
    %355 = vector.broadcast %354 : i32 to vector<16x32xi32>
    %356 = arith.remsi %352, %355 : vector<16x32xi32>
    %c0_i32_185 = arith.constant 0 : i32
    %357 = vector.broadcast %c0_i32_185 : i32 to vector<16x32xi32>
    %358 = arith.cmpi ne, %356, %357 : vector<16x32xi32>
    %c0_i32_186 = arith.constant 0 : i32
    %359 = vector.broadcast %c0_i32_186 : i32 to vector<16x32xi32>
    %360 = arith.cmpi slt, %356, %359 : vector<16x32xi32>
    %c0_i32_187 = arith.constant 0 : i32
    %361 = arith.cmpi slt, %354, %c0_i32_187 : i32
    %362 = vector.broadcast %361 : i1 to vector<16x32xi1>
    %363 = vector.broadcast %362 : vector<16x32xi1> to vector<16x32xi1>
    %364 = arith.xori %360, %363 : vector<16x32xi1>
    %365 = arith.andi %364, %358 : vector<16x32xi1>
    %366 = vector.broadcast %354 : i32 to vector<16x32xi32>
    %367 = arith.addi %356, %366 : vector<16x32xi32>
    %368 = arith.select %365, %367, %356 : vector<16x32xi1>, vector<16x32xi32>
    %369 = tpu.iota {dimensions = array<i32: 1>} : vector<16x32xi32>
    %c2_i32_188 = arith.constant 2 : i32
    %c0_i32_189 = arith.constant 0 : i32
    %370 = arith.cmpi eq, %c2_i32_188, %c0_i32_189 : i32
    %c1_i32_190 = arith.constant 1 : i32
    %371 = arith.select %370, %c1_i32_190, %c2_i32_188 : i32
    %372 = vector.broadcast %371 : i32 to vector<16x32xi32>
    %373 = arith.remsi %369, %372 : vector<16x32xi32>
    %c0_i32_191 = arith.constant 0 : i32
    %374 = vector.broadcast %c0_i32_191 : i32 to vector<16x32xi32>
    %375 = arith.cmpi ne, %373, %374 : vector<16x32xi32>
    %c0_i32_192 = arith.constant 0 : i32
    %376 = vector.broadcast %c0_i32_192 : i32 to vector<16x32xi32>
    %377 = arith.cmpi slt, %373, %376 : vector<16x32xi32>
    %c0_i32_193 = arith.constant 0 : i32
    %378 = arith.cmpi slt, %371, %c0_i32_193 : i32
    %379 = vector.broadcast %378 : i1 to vector<16x32xi1>
    %380 = vector.broadcast %379 : vector<16x32xi1> to vector<16x32xi1>
    %381 = arith.xori %377, %380 : vector<16x32xi1>
    %382 = arith.andi %381, %375 : vector<16x32xi1>
    %383 = vector.broadcast %371 : i32 to vector<16x32xi32>
    %384 = arith.addi %373, %383 : vector<16x32xi32>
    %385 = arith.select %382, %384, %373 : vector<16x32xi1>, vector<16x32xi32>
    %386 = arith.cmpi eq, %368, %385 : vector<16x32xi32>
    %387 = vector.shape_cast %386 : vector<16x32xi1> to vector<1x16x32xi1>
    %cst_194 = arith.constant -1.000000e+30 : f32
    %388 = vector.shape_cast %387 : vector<1x16x32xi1> to vector<1x16x32xi1>
    %389 = vector.broadcast %388 : vector<1x16x32xi1> to vector<4x16x32xi1>
    %390 = vector.broadcast %cst_194 : f32 to vector<4x16x32xf32>
    %391 = arith.select %389, %351, %390 : vector<4x16x32xi1>, vector<4x16x32xf32>
    %cst_195 = arith.constant dense<0xFF800000> : vector<4x16xf32>
    %392 = vector.multi_reduction <maximumf>, %391, %cst_195 [2] : vector<4x16x32xf32> to vector<4x16xf32>
    %393 = vector.shape_cast %392 : vector<4x16xf32> to vector<4x16x1xf32>
    %394 = vector.broadcast %393 : vector<4x16x1xf32> to vector<4x16x32xf32>
    %395 = arith.subf %391, %394 : vector<4x16x32xf32>
    %396 = math.exp %395 : vector<4x16x32xf32>
    %cst_196 = arith.constant dense<0.000000e+00> : vector<4x16xf32>
    %397 = vector.multi_reduction <add>, %396, %cst_196 [2] : vector<4x16x32xf32> to vector<4x16xf32>
    %398 = vector.shape_cast %397 : vector<4x16xf32> to vector<4x16x1xf32>
    %399 = vector.broadcast %398 : vector<4x16x1xf32> to vector<4x16x32xf32>
    %400 = arith.divf %396, %399 : vector<4x16x32xf32>
    %401 = vector.shape_cast %336 : vector<4x16xf32> to vector<4x16x1xf32>
    %402 = vector.broadcast %401 : vector<4x16x1xf32> to vector<4x16x32xf32>
    %403 = arith.mulf %400, %402 : vector<4x16x32xf32>
    %404 = vector.shape_cast %348 : vector<4x32xf32> to vector<4x32x1xf32>
    %405 = vector.broadcast %404 : vector<4x32x1xf32> to vector<4x32x8xf32>
    %406 = arith.mulf %330, %405 : vector<4x32x8xf32>
    "tpu.trace_start"() <{level = 10 : i32, message = "hqk,hkd->hqd"}> : () -> ()
    %cst_197 = arith.constant dense<0.000000e+00> : vector<4x16x8xf32>
    %407 = tpu.matmul %403, %406, %cst_197 {dimension_numbers = #tpu.dot_dimension_numbers<[2], [1], [1], [2], [0, 0, 0, 1, 1, 2], [0], [0]>} : vector<4x16x32xf32>, vector<4x32x8xf32>, vector<4x16x8xf32> -> vector<4x16x8xf32>
    "tpu.trace_stop"() : () -> ()
    %408 = vector.shape_cast %348 : vector<4x32xf32> to vector<4x1x32xf32>
    %409 = vector.broadcast %408 : vector<4x1x32xf32> to vector<4x16x32xf32>
    %410 = arith.mulf %403, %409 : vector<4x16x32xf32>
    %cst_198 = arith.constant dense<0.000000e+00> : vector<4x16xf32>
    %411 = vector.multi_reduction <add>, %410, %cst_198 [2] : vector<4x16x32xf32> to vector<4x16xf32>
    %412 = tpu.transpose %407, [0, 2, 1] : vector<4x16x8xf32> -> vector<4x8x16xf32>
    %413 = vector.shape_cast %412 : vector<4x8x16xf32> to vector<32x16xf32>
    %414 = tpu.transpose %413, [1, 0] : vector<32x16xf32> -> vector<16x32xf32>
    %415 = tpu.transpose %411, [1, 0] : vector<4x16xf32> -> vector<16x4xf32>
    %c0_199 = arith.constant 0 : index
    %c0_200 = arith.constant 0 : index
    %416 = vector.load %arg42[%c0_199, %c0_200] : memref<32x32xf32, #tpu.memory_space<vmem>>, vector<32x32xf32>
    %c0_201 = arith.constant 0 : index
    %c0_202 = arith.constant 0 : index
    %417 = vector.load %arg43[%c0_201, %c0_202] : memref<1x32xf32, #tpu.memory_space<vmem>>, vector<1x32xf32>
    %cst_203 = arith.constant dense<0.000000e+00> : vector<16x32xf32>
    %418 = tpu.matmul %414, %416, %cst_203 {dimension_numbers = #tpu.dot_dimension_numbers<[1], [0], [0], [1], [0, 0, 1, 1], [], []>} : vector<16x32xf32>, vector<32x32xf32>, vector<16x32xf32> -> vector<16x32xf32>
    %419 = vector.broadcast %417 : vector<1x32xf32> to vector<16x32xf32>
    %420 = arith.addf %418, %419 : vector<16x32xf32>
    %421 = arith.addf %211, %420 : vector<16x32xf32>
    %c0_204 = arith.constant 0 : index
    %c0_205 = arith.constant 0 : index
    %422 = vector.load %arg68[%c0_204, %c0_205] : memref<1x32xf32, #tpu.memory_space<vmem>>, vector<1x32xf32>
    %c0_206 = arith.constant 0 : index
    %c0_207 = arith.constant 0 : index
    %423 = vector.load %arg69[%c0_206, %c0_207] : memref<1x32xf32, #tpu.memory_space<vmem>>, vector<1x32xf32>
    %cst_208 = arith.constant dense<0.000000e+00> : vector<16xf32>
    %424 = vector.multi_reduction <add>, %421, %cst_208 [1] : vector<16x32xf32> to vector<16xf32>
    %425 = vector.shape_cast %424 : vector<16xf32> to vector<16x1xf32>
    %cst_209 = arith.constant 3.200000e+01 : f32
    %426 = vector.broadcast %cst_209 : f32 to vector<16x1xf32>
    %427 = arith.divf %425, %426 : vector<16x1xf32>
    %428 = vector.broadcast %427 : vector<16x1xf32> to vector<16x32xf32>
    %429 = arith.subf %421, %428 : vector<16x32xf32>
    %430 = arith.mulf %429, %429 : vector<16x32xf32>
    %cst_210 = arith.constant dense<0.000000e+00> : vector<16xf32>
    %431 = vector.multi_reduction <add>, %430, %cst_210 [1] : vector<16x32xf32> to vector<16xf32>
    %432 = vector.shape_cast %431 : vector<16xf32> to vector<16x1xf32>
    %cst_211 = arith.constant 3.200000e+01 : f32
    %433 = vector.broadcast %cst_211 : f32 to vector<16x1xf32>
    %434 = arith.divf %432, %433 : vector<16x1xf32>
    %cst_212 = arith.constant 9.99999974E-6 : f32
    %435 = vector.broadcast %cst_212 : f32 to vector<16x1xf32>
    %436 = arith.addf %434, %435 : vector<16x1xf32>
    %437 = math.rsqrt %436 : vector<16x1xf32>
    %438 = vector.broadcast %437 : vector<16x1xf32> to vector<16x32xf32>
    %439 = arith.mulf %429, %438 : vector<16x32xf32>
    %440 = vector.broadcast %422 : vector<1x32xf32> to vector<16x32xf32>
    %441 = arith.mulf %439, %440 : vector<16x32xf32>
    %442 = vector.broadcast %423 : vector<1x32xf32> to vector<16x32xf32>
    %443 = arith.addf %441, %442 : vector<16x32xf32>
    %c0_213 = arith.constant 0 : index
    %c0_214 = arith.constant 0 : index
    %444 = vector.load %arg64[%c0_213, %c0_214] : memref<4x32xf32, #tpu.memory_space<vmem>>, vector<4x32xf32>
    %c0_215 = arith.constant 0 : index
    %c0_216 = arith.constant 0 : index
    %445 = vector.load %arg65[%c0_215, %c0_216] : memref<1x32xf32, #tpu.memory_space<vmem>>, vector<1x32xf32>
    %c0_217 = arith.constant 0 : index
    %c0_218 = arith.constant 0 : index
    %446 = vector.load %arg66[%c0_217, %c0_218] : memref<32x1xf32, #tpu.memory_space<vmem>>, vector<32x1xf32>
    %c0_219 = arith.constant 0 : index
    %c0_220 = arith.constant 0 : index
    %447 = vector.load %arg67[%c0_219, %c0_220] : memref<1x1xf32, #tpu.memory_space<vmem>>, vector<1x1xf32>
    %cst_221 = arith.constant dense<0.000000e+00> : vector<16x32xf32>
    %448 = tpu.matmul %415, %444, %cst_221 {dimension_numbers = #tpu.dot_dimension_numbers<[1], [0], [0], [1], [0, 0, 1, 1], [], []>} : vector<16x4xf32>, vector<4x32xf32>, vector<16x32xf32> -> vector<16x32xf32>
    %449 = vector.broadcast %445 : vector<1x32xf32> to vector<16x32xf32>
    %450 = arith.addf %448, %449 : vector<16x32xf32>
    %cst_222 = arith.constant 0.000000e+00 : f32
    %451 = vector.broadcast %cst_222 : f32 to vector<16x32xf32>
    %452 = arith.maximumf %450, %451 : vector<16x32xf32>
    %453 = vector.shape_cast %446 : vector<32x1xf32> to vector<1x32xf32>
    %454 = vector.broadcast %453 : vector<1x32xf32> to vector<16x32xf32>
    %455 = arith.mulf %452, %454 : vector<16x32xf32>
    %cst_223 = arith.constant dense<0.000000e+00> : vector<16xf32>
    %456 = vector.multi_reduction <add>, %455, %cst_223 [1] : vector<16x32xf32> to vector<16xf32>
    %457 = vector.shape_cast %456 : vector<16xf32> to vector<16x1xf32>
    %458 = vector.broadcast %447 : vector<1x1xf32> to vector<16x1xf32>
    %459 = arith.addf %457, %458 : vector<16x1xf32>
    %460 = arith.addf %459, %228 : vector<16x1xf32>
    %c0_224 = arith.constant 0 : index
    %c0_225 = arith.constant 0 : index
    %461 = vector.load %arg70[%c0_224, %c0_225] : memref<32x64xf32, #tpu.memory_space<vmem>>, vector<32x64xf32>
    %c0_226 = arith.constant 0 : index
    %c0_227 = arith.constant 0 : index
    %462 = vector.load %arg71[%c0_226, %c0_227] : memref<1x64xf32, #tpu.memory_space<vmem>>, vector<1x64xf32>
    %cst_228 = arith.constant dense<0.000000e+00> : vector<16x64xf32>
    %463 = tpu.matmul %443, %461, %cst_228 {dimension_numbers = #tpu.dot_dimension_numbers<[1], [0], [0], [1], [0, 0, 1, 1], [], []>} : vector<16x32xf32>, vector<32x64xf32>, vector<16x64xf32> -> vector<16x64xf32>
    %464 = vector.broadcast %462 : vector<1x64xf32> to vector<16x64xf32>
    %465 = arith.addf %463, %464 : vector<16x64xf32>
    %cst_229 = arith.constant 0.000000e+00 : f32
    %466 = vector.broadcast %cst_229 : f32 to vector<16x64xf32>
    %467 = arith.maximumf %465, %466 : vector<16x64xf32>
    %c0_230 = arith.constant 0 : index
    %c0_231 = arith.constant 0 : index
    %468 = vector.load %arg72[%c0_230, %c0_231] : memref<64x32xf32, #tpu.memory_space<vmem>>, vector<64x32xf32>
    %c0_232 = arith.constant 0 : index
    %c0_233 = arith.constant 0 : index
    %469 = vector.load %arg73[%c0_232, %c0_233] : memref<1x32xf32, #tpu.memory_space<vmem>>, vector<1x32xf32>
    %cst_234 = arith.constant dense<0.000000e+00> : vector<16x32xf32>
    %470 = tpu.matmul %467, %468, %cst_234 {dimension_numbers = #tpu.dot_dimension_numbers<[1], [0], [0], [1], [0, 0, 1, 1], [], []>} : vector<16x64xf32>, vector<64x32xf32>, vector<16x32xf32> -> vector<16x32xf32>
    %471 = vector.broadcast %469 : vector<1x32xf32> to vector<16x32xf32>
    %472 = arith.addf %470, %471 : vector<16x32xf32>
    %473 = arith.addf %443, %472 : vector<16x32xf32>
    %c0_235 = arith.constant 0 : index
    %c0_236 = arith.constant 0 : index
    %474 = vector.load %arg78[%c0_235, %c0_236] : memref<1x32xf32, #tpu.memory_space<vmem>>, vector<1x32xf32>
    %c0_237 = arith.constant 0 : index
    %c0_238 = arith.constant 0 : index
    %475 = vector.load %arg79[%c0_237, %c0_238] : memref<1x32xf32, #tpu.memory_space<vmem>>, vector<1x32xf32>
    %cst_239 = arith.constant dense<0.000000e+00> : vector<16xf32>
    %476 = vector.multi_reduction <add>, %473, %cst_239 [1] : vector<16x32xf32> to vector<16xf32>
    %477 = vector.shape_cast %476 : vector<16xf32> to vector<16x1xf32>
    %cst_240 = arith.constant 3.200000e+01 : f32
    %478 = vector.broadcast %cst_240 : f32 to vector<16x1xf32>
    %479 = arith.divf %477, %478 : vector<16x1xf32>
    %480 = vector.broadcast %479 : vector<16x1xf32> to vector<16x32xf32>
    %481 = arith.subf %473, %480 : vector<16x32xf32>
    %482 = arith.mulf %481, %481 : vector<16x32xf32>
    %cst_241 = arith.constant dense<0.000000e+00> : vector<16xf32>
    %483 = vector.multi_reduction <add>, %482, %cst_241 [1] : vector<16x32xf32> to vector<16xf32>
    %484 = vector.shape_cast %483 : vector<16xf32> to vector<16x1xf32>
    %cst_242 = arith.constant 3.200000e+01 : f32
    %485 = vector.broadcast %cst_242 : f32 to vector<16x1xf32>
    %486 = arith.divf %484, %485 : vector<16x1xf32>
    %cst_243 = arith.constant 9.99999974E-6 : f32
    %487 = vector.broadcast %cst_243 : f32 to vector<16x1xf32>
    %488 = arith.addf %486, %487 : vector<16x1xf32>
    %489 = math.rsqrt %488 : vector<16x1xf32>
    %490 = vector.broadcast %489 : vector<16x1xf32> to vector<16x32xf32>
    %491 = arith.mulf %481, %490 : vector<16x32xf32>
    %492 = vector.broadcast %474 : vector<1x32xf32> to vector<16x32xf32>
    %493 = arith.mulf %491, %492 : vector<16x32xf32>
    %494 = vector.broadcast %475 : vector<1x32xf32> to vector<16x32xf32>
    %495 = arith.addf %493, %494 : vector<16x32xf32>
    %c0_244 = arith.constant 0 : index
    %c0_245 = arith.constant 0 : index
    %496 = vector.load %arg74[%c0_244, %c0_245] : memref<32x32xf32, #tpu.memory_space<vmem>>, vector<32x32xf32>
    %c0_246 = arith.constant 0 : index
    %c0_247 = arith.constant 0 : index
    %497 = vector.load %arg75[%c0_246, %c0_247] : memref<1x32xf32, #tpu.memory_space<vmem>>, vector<1x32xf32>
    %c0_248 = arith.constant 0 : index
    %c0_249 = arith.constant 0 : index
    %498 = vector.load %arg76[%c0_248, %c0_249] : memref<32x1xf32, #tpu.memory_space<vmem>>, vector<32x1xf32>
    %c0_250 = arith.constant 0 : index
    %c0_251 = arith.constant 0 : index
    %499 = vector.load %arg77[%c0_250, %c0_251] : memref<1x1xf32, #tpu.memory_space<vmem>>, vector<1x1xf32>
    %cst_252 = arith.constant dense<0.000000e+00> : vector<16x32xf32>
    %500 = tpu.matmul %495, %496, %cst_252 {dimension_numbers = #tpu.dot_dimension_numbers<[1], [0], [0], [1], [0, 0, 1, 1], [], []>} : vector<16x32xf32>, vector<32x32xf32>, vector<16x32xf32> -> vector<16x32xf32>
    %501 = vector.broadcast %497 : vector<1x32xf32> to vector<16x32xf32>
    %502 = arith.addf %500, %501 : vector<16x32xf32>
    %cst_253 = arith.constant 0.000000e+00 : f32
    %503 = vector.broadcast %cst_253 : f32 to vector<16x32xf32>
    %504 = arith.maximumf %502, %503 : vector<16x32xf32>
    %505 = vector.shape_cast %498 : vector<32x1xf32> to vector<1x32xf32>
    %506 = vector.broadcast %505 : vector<1x32xf32> to vector<16x32xf32>
    %507 = arith.mulf %504, %506 : vector<16x32xf32>
    %cst_254 = arith.constant dense<0.000000e+00> : vector<16xf32>
    %508 = vector.multi_reduction <add>, %507, %cst_254 [1] : vector<16x32xf32> to vector<16xf32>
    %509 = vector.shape_cast %508 : vector<16xf32> to vector<16x1xf32>
    %510 = vector.broadcast %499 : vector<1x1xf32> to vector<16x1xf32>
    %511 = arith.addf %509, %510 : vector<16x1xf32>
    %512 = arith.addf %511, %460 : vector<16x1xf32>
    %c0_255 = arith.constant 0 : index
    %c0_256 = arith.constant 0 : index
    %513 = vector.load %arg80[%c0_255, %c0_256] : memref<16x32xf32, #tpu.memory_space<vmem>>, vector<16x32xf32>
    tpu.vector_store %arg80[%c0_255, %c0_256], %495 {strides = array<i32>} : memref<16x32xf32, #tpu.memory_space<vmem>>, vector<16x32xf32>,
    %c0_257 = arith.constant 0 : index
    %c0_258 = arith.constant 0 : index
    %514 = vector.load %arg81[%c0_257, %c0_258] : memref<16x1xf32, #tpu.memory_space<vmem>>, vector<16x1xf32>
    tpu.vector_store %arg81[%c0_257, %c0_258], %512 {strides = array<i32>} : memref<16x1xf32, #tpu.memory_space<vmem>>, vector<16x1xf32>,
    return
  }
}

</mosaic_0001>

<bundles_post_ra>
// kernel: decoder_layer_forward.1
= control target key start
LH: loop header
LB: loop body
LE: loop exit
PB: predicated region body
PF: predicated region fallthrough
CT: control target
= control target key end

     0   :  { %s8539_s6 = smov 1   ;;  %s8540_s10 = smov 2   ;;  %s9954_s0 = inlined_call_operand.smem [shape: u32[82], index: -1, kind: input, shape index: {}] }
   0x1   :  { %s8659_s5 = sld [smem:[%s9954_s0]]   ;;  %s8541_s14 = smov 3  }
   0x2   :  { %s8664_s9 = sld [smem:[%s9954_s0 + %s8539_s6]]   ;;  %s8542_s18 = smov 4  }
   0x3   :  { %s8669_s13 = sld [smem:[%s9954_s0 + %s8540_s10]]   ;;  %s8543_s22 = smov 5  }
   0x4   :  { %s8674_s17 = sld [smem:[%s9954_s0 + %s8541_s14]]   ;;  %s8544_s26 = smov 6  }
   0x5   :  { %s8679_s21 = sld [smem:[%s9954_s0 + %s8542_s18]]   ;;  %s8545_s30 = smov 7  }
   0x6   :  { %s8684_s25 = sld [smem:[%s9954_s0 + %s8543_s22]]   ;;  %s8546_s4 = smov 8  }
   0x7   :  { %9988 = sst [smem:[#allocation63_spill]] %s8659_s5  ;;  %s8547_s10 = smov 9  }
   0x8   :  { %9989 = sst [smem:[#allocation64_spill]] %s8664_s9  ;;  %s8548_s15 = smov 10  }
   0x9   :  { %9990 = sst [smem:[#allocation65_spill]] %s8669_s13  ;;  %s8549_s20 = smov 11  }
   0xa   :  { %9991 = sst [smem:[#allocation66_spill]] %s8674_s17  ;;  %s8551_s1 = smov 13  }
   0xb   :  { %9992 = sst [smem:[#allocation67_spill]] %s8679_s21  ;;  %s8552_s7 = smov 14  }
   0xc   :  { %9993 = sst [smem:[#allocation68_spill]] %s8684_s25  ;;  %s8554_s22 = smov 16  }
   0xd   :  { %s8689_s29 = sld [smem:[%s9954_s0 + %s8544_s26]]   ;;  %s8550_s26 = smov 12  }
   0xe   :  { %s8694_s3 = sld [smem:[%s9954_s0 + %s8545_s30]]   ;;  %s8555_s28 = smov 18  }
   0xf   :  { %s8699_s8 = sld [smem:[%s9954_s0 + %s8546_s4]]   ;;  %s8557_s16 = smov 20  }
  0x10   :  { %s8704_s14 = sld [smem:[%s9954_s0 + %s8547_s10]]   ;;  %s8556_s10 = smov 19  }
  0x11   :  { %s8709_s19 = sld [smem:[%s9954_s0 + %s8548_s15]]   ;;  %s8553_s15 = smov 15  }
  0x12   :  { %s8714_s24 = sld [smem:[%s9954_s0 + %s8549_s20]]   ;;  %s8562_s23 = smov 25  }
  0x13   :  { %9994 = sst [smem:[#allocation69_spill]] %s8689_s29  ;;  %s8618_s18 = smov 67  }
  0x14   :  { %9995 = sst [smem:[#allocation70_spill]] %s8694_s3 }
  0x15   :  { %9996 = sst [smem:[#allocation71_spill]] %s8699_s8 }
  0x16   :  { %9997 = sst [smem:[#allocation72_spill]] %s8704_s14  ;;  %s8566_s14 = smov 29  }
  0x17   :  { %9998 = sst [smem:[#allocation73_spill]] %s8709_s19  ;;  %s8565_s19 = smov 28  }
  0x18   :  { %9999 = sst [smem:[#allocation74_spill]] %s8714_s24 }
  0x19   :  { %s8719_s30 = sld [smem:[%s9954_s0 + %s8550_s26]]  }
  0x1a   :  { %s8724_s6 = sld [smem:[%s9954_s0 + %s8551_s1]]   ;;  %s8615_s1 = smov 33  }
  0x1b   :  { %s8729_s12 = sld [smem:[%s9954_s0 + %s8552_s7]]  }
  0x1c   :  { %s6963_s20 = sld [smem:[%s9954_s0 + %s8553_s15]]  }
  0x1d   :  { %s8737_s27 = sld [smem:[%s9954_s0 + %s8554_s22]]   ;;  %s8558_s22 = smov 21  }
  0x1e   :  { %s8742_s4 = sld [smem:[%s9954_s0 + %s8555_s28]]   ;;  %s8559_s28 = smov 22  }
  0x1f   :  { %10000 = sst [smem:[#allocation75_spill]] %s8719_s30 }
  0x20   :  { %10001 = sst [smem:[#allocation76_spill]] %s8724_s6 }
  0x21   :  { %10002 = sst [smem:[#allocation77_spill]] %s8729_s12 }
  0x22   :  { %s8747_s17 = sld [smem:[%s9954_s0 + %s8556_s10]]   ;;  %v169_v0 = vstv %s6963_s20  ;;  %s8560_s10 = smov 23  }
  0x23   :  { %10003 = sst [smem:[#allocation78_spill]] %s8737_s27  ;;  %170 = vst [vmem:[#allocation2] sm:$0x1] %v169_v0  ;;  %s8563_s20 = smov 26  }
  0x24   :  { %10004 = sst [smem:[#allocation79_spill]] %s8742_s4 }
  0x25   :  { %s8752_s25 = sld [smem:[%s9954_s0 + %s8557_s16]]   ;;  %s8561_s16 = smov 24  }
  0x26   :  { %s8757_s24 = sld [smem:[%s9954_s0 + %s8558_s22]]  }
  0x27   :  { %s8762_s21 = sld [smem:[%s9954_s0 + %s8559_s28]]  }
  0x28   :  { %10005 = sst [smem:[#allocation80_spill]] %s8747_s17 }
  0x29   :  { %s8767_s15 = sld [smem:[%s9954_s0 + %s8560_s10]]   ;;  %s8564_s10 = smov 27  }
  0x2a   :  { %s8772_s22 = sld [smem:[%s9954_s0 + %s8561_s16]]  }
  0x2b   :  { %10006 = sst [smem:[#allocation81_spill]] %s8752_s25 }
  0x2c   :  { %10007 = sst [smem:[#allocation82_spill]] %s8757_s24  ;;  %s8568_s24 = smov 31  }
  0x2d   :  { %10008 = sst [smem:[#allocation83_spill]] %s8762_s21 }
  0x2e   :  { %s8777_s28 = sld [smem:[%s9954_s0 + %s8562_s23]]   ;;  %s8619_s23 = smov 77  }
  0x2f   :  { %10009 = sst [smem:[#allocation84_spill]] %s8767_s15 }
  0x30   :  { %10010 = sst [smem:[#allocation85_spill]] %s8772_s22 }
  0x31   :  { %s8782_s7 = sld [smem:[%s9954_s0 + %s8563_s20]]   ;;  %s8567_s20 = smov 30  }
  0x32   :  { %s8787_s8 = sld [smem:[%s9954_s0 + %s8564_s10]]  }
  0x33   :  { %s8792_s17 = sld [smem:[%s9954_s0 + %s8565_s19]]   ;;  %s8569_s19 = smov 32  }
  0x34   :  { %10011 = sst [smem:[#allocation86_spill]] %s8777_s28 }
  0x35   :  { %s8797_s28 = sld [smem:[%s9954_s0 + %s8566_s14]]   ;;  %s8570_s14 = smov 34  }
  0x36   :  { %s8812_s4 = sld [smem:[%s9954_s0 + %s8569_s19]]   ;;  %s8573_s19 = smov 37  }
  0x37   :  { %10012 = sst [smem:[#allocation87_spill]] %s8782_s7 }
  0x38   :  { %10013 = sst [smem:[#allocation88_spill]] %s8787_s8 }
  0x39   :  { %10014 = sst [smem:[#allocation89_spill]] %s8792_s17 }
  0x3a   :  { %s8802_s7 = sld [smem:[%s9954_s0 + %s8567_s20]]   ;;  %s8571_s20 = smov 35  }
  0x3b   :  { %10015 = sst [smem:[#allocation90_spill]] %s8797_s28 }
  0x3c   :  { %s8807_s8 = sld [smem:[%s9954_s0 + %s8568_s24]]   ;;  %s8572_s24 = smov 36  }
  0x3d   :  { %10018 = sst [smem:[#allocation93_spill]] %s8812_s4 }
  0x3e   :  { %s8817_s28 = sld [smem:[%s9954_s0 + %s8570_s14]]   ;;  %s8574_s14 = smov 38  }
  0x3f   :  { %s8832_s4 = sld [smem:[%s9954_s0 + %s8573_s19]]   ;;  %s8577_s19 = smov 41  }
  0x40   :  { %10016 = sst [smem:[#allocation91_spill]] %s8802_s7 }
  0x41   :  { %s8822_s7 = sld [smem:[%s9954_s0 + %s8571_s20]]   ;;  %s8575_s20 = smov 39  }
  0x42   :  { %10017 = sst [smem:[#allocation92_spill]] %s8807_s8 }
  0x43   :  { %s8827_s8 = sld [smem:[%s9954_s0 + %s8572_s24]]   ;;  %s8576_s24 = smov 40  }
  0x44   :  { %10019 = sst [smem:[#allocation94_spill]] %s8817_s28 }
  0x45   :  { %10021 = sst [smem:[#allocation96_spill]] %s8832_s4  ;;  %s8616_s4 = smov 47  }
  0x46   :  { %s8837_s17 = sld [smem:[%s9954_s0 + %s8574_s14]]   ;;  %s8578_s14 = smov 42  }
  0x47   :  { %s8842_s3 = sld [smem:[%s9954_s0 + %s8575_s20]]   ;;  %s8579_s20 = smov 43  }
  0x48   :  { %s8852_s25 = sld [smem:[%s9954_s0 + %s8577_s19]]   ;;  %s8581_s19 = smov 45  }
  0x49   :  { %10020 = sst [smem:[#allocation95_spill]] %s8827_s8 }
  0x4a   :  { %s8847_s8 = sld [smem:[%s9954_s0 + %s8576_s24]]   ;;  %s8580_s24 = smov 44  }
  0x4b   :  { %s8862_s5 = sld [smem:[%s9954_s0 + %s8579_s20]]   ;;  %s8583_s20 = smov 48  }
  0x4c   :  { %10022 = sst [smem:[#allocation97_spill]] %s8837_s17 }
  0x4d   :  { %s8857_s17 = sld [smem:[%s9954_s0 + %s8578_s14]]   ;;  %s8582_s14 = smov 46  }
  0x4e   :  { %10024 = sst [smem:[#allocation99_spill]] %s8852_s25 }
  0x4f   :  { %s8872_s15 = sld [smem:[%s9954_s0 + %s8581_s19]]   ;;  %s8585_s19 = smov 50  }
  0x50   :  { %10023 = sst [smem:[#allocation98_spill]] %s8847_s8 }
  0x51   :  { %s8867_s8 = sld [smem:[%s9954_s0 + %s8580_s24]]   ;;  %s8584_s24 = smov 49  }
  0x52   :  { %s8882_s21 = sld [smem:[%s9954_s0 + %s8583_s20]]   ;;  %s8587_s20 = smov 53  }
  0x53   :  { %10025 = sst [smem:[#allocation100_spill]] %s8857_s17 }
  0x54   :  { %s8877_s17 = sld [smem:[%s9954_s0 + %s8582_s14]]   ;;  %s8586_s14 = smov 52  }
  0x55   :  { %10027 = sst [smem:[#allocation102_spill]] %s8872_s15 }
  0x56   :  { %s8892_s29 = sld [smem:[%s9954_s0 + %s8585_s19]]   ;;  %s8589_s19 = smov 55  }
  0x57   :  { %10026 = sst [smem:[#allocation101_spill]] %s8867_s8 }
  0x58   :  { %10029 = sst [smem:[#allocation104_spill]] %s8882_s21 }
  0x59   :  { %s8887_s8 = sld [smem:[%s9954_s0 + %s8584_s24]]   ;;  %s8588_s24 = smov 54  }
  0x5a   :  { %10028 = sst [smem:[#allocation103_spill]] %s8877_s17 }
  0x5b   :  { %s8897_s17 = sld [smem:[%s9954_s0 + %s8586_s14]]   ;;  %s8590_s14 = smov 56  }
  0x5c   :  { %10030 = sst [smem:[#allocation105_spill]] %s8892_s29 }
  0x5d   :  { %s8902_s21 = sld [smem:[%s9954_s0 + %s8587_s20]]   ;;  %s8591_s20 = smov 57  }
  0x5e   :  { %s8907_s12 = sld [smem:[%s9954_s0 + %s8588_s24]]   ;;  %s8592_s24 = smov 58  }
  0x5f   :  { %s8912_s29 = sld [smem:[%s9954_s0 + %s8589_s19]]   ;;  %s8593_s19 = smov 59  }
  0x60   :  { %s8917_s22 = sld [smem:[%s9954_s0 + %s8590_s14]]   ;;  %s8594_s14 = smov 60  }
  0x61   :  { %10031 = sst [smem:[#allocation106_spill]] %s8897_s17 }
  0x62   :  { %s8922_s13 = sld [smem:[%s9954_s0 + %s8591_s20]]   ;;  %s8595_s20 = smov 61  }
  0x63   :  { %s8932_s6 = sld [smem:[%s9954_s0 + %s8593_s19]]   ;;  %s8597_s19 = smov 63  }
  0x64   :  { %10032 = sst [smem:[#allocation107_spill]] %s8907_s12 }
  0x65   :  { %10033 = sst [smem:[#allocation108_spill]] %s8912_s29 }
  0x66   :  { %s8927_s12 = sld [smem:[%s9954_s0 + %s8592_s24]]   ;;  %s8596_s24 = smov 62  }
  0x67   :  { %s8937_s27 = sld [smem:[%s9954_s0 + %s8594_s14]]   ;;  %s8598_s14 = smov 64  }
  0x68   :  { %10034 = sst [smem:[#allocation109_spill]] %s8922_s13 }
  0x69   :  { %s8942_s9 = sld [smem:[%s9954_s0 + %s8595_s20]]   ;;  %s8599_s20 = smov 65  }
  0x6a   :  { %s8952_s30 = sld [smem:[%s9954_s0 + %s8597_s19]]   ;;  %s8601_s19 = smov 68  }
  0x6b   :  { %s8962_s13 = sld [smem:[%s9954_s0 + %s8599_s20]]   ;;  %s8603_s20 = smov 70  }
  0x6c   :  { %10035 = sst [smem:[#allocation110_spill]] %s8927_s12 }
  0x6d   :  { %10036 = sst [smem:[#allocation111_spill]] %s8937_s27 }
  0x6e   :  { %s8947_s12 = sld [smem:[%s9954_s0 + %s8596_s24]]   ;;  %s8600_s24 = smov 66  }
  0x6f   :  { %s8957_s27 = sld [smem:[%s9954_s0 + %s8598_s14]]   ;;  %s8602_s14 = smov 69  }
  0x70   :  { %10038 = sst [smem:[#allocation113_spill]] %s8952_s30 }
  0x71   :  { %s8972_s30 = sld [smem:[%s9954_s0 + %s8601_s19]]   ;;  %s8605_s19 = smov 72  }
  0x72   :  { %s8982_s29 = sld [smem:[%s9954_s0 + %s8603_s20]]   ;;  %s8607_s20 = smov 74  }
  0x73   :  { %s6995_s11 = sld [smem:[%s9954_s0 + %s8616_s4]]  }
  0x74   :  { %10037 = sst [smem:[#allocation112_spill]] %s8947_s12 }
  0x75   :  { %10039 = sst [smem:[#allocation114_spill]] %s8957_s27 }
  0x76   :  { %s8967_s12 = sld [smem:[%s9954_s0 + %s8600_s24]]   ;;  %s8604_s24 = smov 71  }
  0x77   :  { %10041 = sst [smem:[#allocation116_spill]] %s8972_s30 }
  0x78   :  { %s8977_s27 = sld [smem:[%s9954_s0 + %s8602_s14]]   ;;  %s8606_s14 = smov 73  }
  0x79   :  { %10042 = sst [smem:[#allocation117_spill]] %s8982_s29  ;;  %v175_v3 = vstv %s6995_s11 }
  0x7a   :  { %s8992_s30 = sld [smem:[%s9954_s0 + %s8605_s19]]   ;;  %s8609_s19 = smov 76   ;;  %176 = vst [vmem:[#allocation5] sm:$0x1] %v175_v3 }
  0x7b   :  { %s8997_s17 = sld [smem:[%s9954_s0 + %s8606_s14]]   ;;  %s8610_s14 = smov 78  }
  0x7c   :  { %10040 = sst [smem:[#allocation115_spill]] %s8967_s12 }
  0x7d   :  { %s8987_s12 = sld [smem:[%s9954_s0 + %s8604_s24]]   ;;  %s8608_s24 = smov 75  }
  0x7e   :  { %s9002_s29 = sld [smem:[%s9954_s0 + %s8607_s20]]   ;;  %s8611_s20 = smov 79  }
  0x7f   :  { %s9017_s15 = sld [smem:[%s9954_s0 + %s8610_s14]]   ;;  %s8614_s14 = smov 17  }
  0x80   :  { %10044 = sst [smem:[#allocation119_spill]] %s8992_s30 }
  0x81   :  { %10045 = sst [smem:[#allocation120_spill]] %s8997_s17 }
  0x82   :  { %s9012_s30 = sld [smem:[%s9954_s0 + %s8609_s19]]   ;;  %s8613_s19 = smov 81  }
  0x83   :  { %10043 = sst [smem:[#allocation118_spill]] %s8987_s12 }
  0x84   :  { %10046 = sst [smem:[#allocation121_spill]] %s9002_s29 }
  0x85   :  { %s9007_s12 = sld [smem:[%s9954_s0 + %s8608_s24]]   ;;  %s8612_s24 = smov 80  }
  0x86   :  { %10049 = sst [smem:[#allocation124_spill]] %s9017_s15 }
  0x87   :  { %s9022_s29 = sld [smem:[%s9954_s0 + %s8611_s20]]  }
  0x88   :  { %10048 = sst [smem:[#allocation123_spill]] %s9012_s30 }
  0x89   :  { %s9032_s30 = sld [smem:[%s9954_s0 + %s8613_s19]]  }
  0x8a   :  { %s6965_s25 = sld [smem:[%s9954_s0 + %s8614_s14]]  }
  0x8b   :  { %10047 = sst [smem:[#allocation122_spill]] %s9007_s12 }
  0x8c   :  { %s9027_s12 = sld [smem:[%s9954_s0 + %s8612_s24]]  }
  0x8d   :  { %10050 = sst [smem:[#allocation125_spill]] %s9022_s29 }
  0x8e   :  { %s6981_s29 = sld [smem:[%s9954_s0 + %s8615_s1]]  }
  0x8f   :  { %10052 = sst [smem:[#allocation127_spill]] %s9032_s30 }
  0x90   :  { %s7015_s14 = sld [smem:[%s9954_s0 + %s8618_s18]]   ;;  %v171_v1 = vstv %s6965_s25 }
  0x91   :  { %s7025_s1 = sld [smem:[%s9954_s0 + %s8619_s23]]   ;;  %172 = vst [vmem:[#allocation3] sm:$0x1] %v171_v1 }
  0x92   :  { %10051 = sst [smem:[#allocation126_spill]] %s9027_s12  ;;  %s8617_s12 = smov 51  }
  0x93   :  { %s6999_s19 = sld [smem:[%s9954_s0 + %s8617_s12]]  }
  0x94   :  { %v173_v2 = vstv %s6981_s29 }
  0x95   :  { %174 = vst [vmem:[#allocation4] sm:$0x1] %v173_v2 }
  0x96   :  { %v179_v5 = vstv %s7015_s14 }
  0x97   :  { %180 = vst [vmem:[#allocation7] sm:$0x1] %v179_v5  ;;  %v181_v6 = vstv %s7025_s1 }
  0x98   :  { %182 = vst [vmem:[#allocation8] sm:$0x1] %v181_v6 }
  0x99   :  { %v177_v4 = vstv %s6999_s19 }
  0x9a   :  { %178 = vst [vmem:[#allocation6] sm:$0x1] %v177_v4 }
  0x9b   :  { %183 = vsyncpa [#allocation10], 0 }
  0x9c   :  { %184 = vsyncpa [#allocation13], 0 }
  0x9d   :  { %185 = vsyncpa [#allocation16], 0 }
  0x9e   :  { %186 = vsyncpa [#allocation19], 0 }
  0x9f   :  { %187 = vsyncpa [#allocation22], 0 }
  0xa0   :  { %188 = vsyncpa [#allocation25], 0 }
  0xa1   :  { %189 = vsyncpa [#allocation28], 0 }
  0xa2   :  { %190 = vsyncpa [#allocation31], 0 }
  0xa3   :  { %191 = vsyncpa [#allocation34], 0 }
  0xa4   :  { %192 = vsyncpa [#allocation37], 0 }
  0xa5   :  { %193 = vsyncpa [#allocation40], 0 }
  0xa6   :  { %194 = vsyncpa [#allocation43], 0 }
  0xa7   :  { %195 = vsyncpa [#allocation46], 0 }
  0xa8   :  { %196 = vsyncpa [#allocation11], 0  ;;  %s8620_s0 = smov [#allocation12]   ;;  %s8621_s25 = smov [#allocation15]  }
  0xa9   :  { %s281_s17 = sshll.u32 %s8620_s0, 4  ;;  %s305_s29 = sshll.u32 %s8621_s25, 4  ;;  %s282_s17 = int_to_ptr.vmem [resolvable:$true] %s281_s17  ;;  %s306_s29 = int_to_ptr.vmem [resolvable:$true] %s305_s29 }
  0xaa   :  { %s7999_s30 = scalar_lea.vmem %s282_s17, 16  ;;  %s8003_s12 = scalar_lea.vmem %s282_s17, 32 }
  0xab   :  { %p8000_p0 = scmp.ne.s32.totalorder %s282_s17, %s7999_s30  ;;  %p8004_p1 = scmp.lt.s32.totalorder %s282_s17, %s282_s17 }
  0xac   :  { %p8005_p2 = scmp.lt.s32.totalorder %s8003_s12, %s7999_s30 }
  0xae   :  { %p8006_p3 = por %p8005_p2, %p8004_p1 }
  0xb0   :  { %p8007_p4 = pnand %p8006_p3, %p8000_p0 }
  0xb2   :  { %8010 = shalt.err (!%p8007_p4)
}
  0xb3   :  { %284 = dma.hbm_to_vmem [thread:$0]  %s8822_s7, 16, %s282_s17, [#allocation13]  }
  0xb4   :  { %s8019_s4 = scalar_lea.vmem %s306_s29, 16  ;;  %s8023_s15 = scalar_lea.vmem %s306_s29, 32 }
  0xb5   :  { %p8020_p5 = scmp.ne.s32.totalorder %s306_s29, %s8019_s4  ;;  %p8024_p6 = scmp.lt.s32.totalorder %s306_s29, %s306_s29 }
  0xb6   :  { %p8025_p7 = scmp.lt.s32.totalorder %s8023_s15, %s8019_s4 }
  0xb8   :  { %p8026_p8 = por %p8025_p7, %p8024_p6 }
  0xba   :  { %p8027_p9 = pnand %p8026_p8, %p8020_p5 }
  0xbc   :  { %8030 = shalt.err (!%p8027_p9)
}
  0xbd   :  { %308 = dma.hbm_to_vmem [thread:$0]  %s8842_s3, 16, %s306_s29, [#allocation16]  }
  0xbe   :  { %s8622_s28 = smov [#allocation18]   ;;  %s8623_s2 = smov [#allocation21]  }
  0xbf   :  { %s329_s20 = sshll.u32 %s8622_s28, 4  ;;  %s357_s10 = sshll.u32 %s8623_s2, 4  ;;  %s330_s20 = int_to_ptr.vmem [resolvable:$true] %s329_s20  ;;  %s358_s10 = int_to_ptr.vmem [resolvable:$true] %s357_s10 }
  0xc0   :  { %s8039_s24 = scalar_lea.vmem %s330_s20, 16  ;;  %s8043_s11 = scalar_lea.vmem %s330_s20, 32 }
  0xc1   :  { %p8040_p10 = scmp.ne.s32.totalorder %s330_s20, %s8039_s24  ;;  %p8044_p11 = scmp.lt.s32.totalorder %s330_s20, %s330_s20 }
  0xc2   :  { %p8045_p12 = scmp.lt.s32.totalorder %s8043_s11, %s8039_s24 }
  0xc4   :  { %p8046_p13 = por %p8045_p12, %p8044_p11 }
  0xc6   :  { %p8047_p0 = pnand %p8046_p13, %p8040_p10 }
  0xc8   :  { %8050 = shalt.err (!%p8047_p0)
}
  0xc9   :  { %332 = dma.hbm_to_vmem [thread:$0]  %s8862_s5, 16, %s330_s20, [#allocation19]  }
  0xca   :  { %s8059_s7 = scalar_lea.vmem %s358_s10, 16  ;;  %s8063_s16 = scalar_lea.vmem %s358_s10, 32 }
  0xcb   :  { %p8060_p1 = scmp.ne.s32.totalorder %s358_s10, %s8059_s7  ;;  %p8064_p2 = scmp.lt.s32.totalorder %s358_s10, %s358_s10 }
  0xcc   :  { %p8065_p3 = scmp.lt.s32.totalorder %s8063_s16, %s8059_s7 }
  0xce   :  { %p8066_p4 = por %p8065_p3, %p8064_p2 }
  0xd0   :  { %p8067_p5 = pnand %p8066_p4, %p8060_p1 }
  0xd2   :  { %8070 = shalt.err (!%p8067_p5)
}
  0xd3   :  { %360 = dma.hbm_to_vmem [thread:$0]  %s8887_s8, 16, %s358_s10, [#allocation22]  }
  0xd4   :  { %s8624_s3 = smov [#allocation24]   ;;  %s8625_s18 = smov [#allocation27]  }
  0xd5   :  { %s381_s19 = sshll.u32 %s8624_s3, 4  ;;  %s403_s14 = sshll.u32 %s8625_s18, 4  ;;  %s382_s19 = int_to_ptr.vmem [resolvable:$true] %s381_s19  ;;  %s404_s14 = int_to_ptr.vmem [resolvable:$true] %s403_s14 }
  0xd6   :  { %s8079_s23 = scalar_lea.vmem %s382_s19, 16  ;;  %s8083_s26 = scalar_lea.vmem %s382_s19, 32 }
  0xd7   :  { %p8080_p6 = scmp.ne.s32.totalorder %s382_s19, %s8079_s23  ;;  %p8084_p7 = scmp.lt.s32.totalorder %s382_s19, %s382_s19 }
  0xd8   :  { %p8085_p8 = scmp.lt.s32.totalorder %s8083_s26, %s8079_s23 }
  0xda   :  { %p8086_p9 = por %p8085_p8, %p8084_p7 }
  0xdc   :  { %p8087_p10 = pnand %p8086_p9, %p8080_p6 }
  0xde   :  { %8090 = shalt.err (!%p8087_p10)
}
  0xdf   :  { %384 = dma.hbm_to_vmem [thread:$0]  %s8902_s21, 16, %s382_s19, [#allocation25]  }
  0xe0   :  { %s8099_s5 = scalar_lea.vmem %s404_s14, 16  ;;  %s8103_s1 = scalar_lea.vmem %s404_s14, 32 }
  0xe1   :  { %p8100_p11 = scmp.ne.s32.totalorder %s404_s14, %s8099_s5  ;;  %p8104_p12 = scmp.lt.s32.totalorder %s404_s14, %s404_s14 }
  0xe2   :  { %p8105_p13 = scmp.lt.s32.totalorder %s8103_s1, %s8099_s5 }
  0xe4   :  { %p8106_p0 = por %p8105_p13, %p8104_p12 }
  0xe6   :  { %p8107_p1 = pnand %p8106_p0, %p8100_p11 }
  0xe8   :  { %8110 = shalt.err (!%p8107_p1)
}
  0xe9   :  { %406 = dma.hbm_to_vmem [thread:$0]  %s8917_s22, 16, %s404_s14, [#allocation28]  }
  0xea   :  { %s8626_s8 = smov [#allocation30]   ;;  %s8627_s17 = smov [#allocation33]  }
  0xeb   :  { %s425_s0 = sshll.u32 %s8626_s8, 4  ;;  %s445_s25 = sshll.u32 %s8627_s17, 4  ;;  %s426_s0 = int_to_ptr.vmem [resolvable:$true] %s425_s0  ;;  %s446_s25 = int_to_ptr.vmem [resolvable:$true] %s445_s25 }
  0xec   :  { %s8119_s29 = scalar_lea.vmem %s426_s0, 16  ;;  %s8123_s30 = scalar_lea.vmem %s426_s0, 32 }
  0xed   :  { %p8120_p2 = scmp.ne.s32.totalorder %s426_s0, %s8119_s29  ;;  %p8124_p3 = scmp.lt.s32.totalorder %s426_s0, %s426_s0 }
  0xee   :  { %p8125_p4 = scmp.lt.s32.totalorder %s8123_s30, %s8119_s29 }
  0xf0   :  { %p8126_p5 = por %p8125_p4, %p8124_p3 }
  0xf2   :  { %p8127_p6 = pnand %p8126_p5, %p8120_p2 }
  0xf4   :  { %8130 = shalt.err (!%p8127_p6)
}
  0xf5   :  { %428 = dma.hbm_to_vmem [thread:$0]  %s8932_s6, 16, %s426_s0, [#allocation31]  }
  0xf6   :  { %s8139_s21 = scalar_lea.vmem %s446_s25, 16  ;;  %s8143_s12 = scalar_lea.vmem %s446_s25, 32 }
  0xf7   :  { %p8140_p7 = scmp.ne.s32.totalorder %s446_s25, %s8139_s21  ;;  %p8144_p8 = scmp.lt.s32.totalorder %s446_s25, %s446_s25 }
  0xf8   :  { %p8145_p9 = scmp.lt.s32.totalorder %s8143_s12, %s8139_s21 }
  0xfa   :  { %p8146_p10 = por %p8145_p9, %p8144_p8 }
  0xfc   :  { %p8147_p11 = pnand %p8146_p10, %p8140_p7 }
  0xfe   :  { %8150 = shalt.err (!%p8147_p11)
}
  0xff   :  { %448 = dma.hbm_to_vmem [thread:$0]  %s8942_s9, 16, %s446_s25, [#allocation34]  }
 0x100   :  { %s8628_s22 = smov [#allocation36]   ;;  %s8629_s15 = smov [#allocation39]  }
 0x101   :  { %s469_s4 = sshll.u32 %s8628_s22, 4  ;;  %s493_s28 = sshll.u32 %s8629_s15, 4  ;;  %s470_s4 = int_to_ptr.vmem [resolvable:$true] %s469_s4  ;;  %s494_s28 = int_to_ptr.vmem [resolvable:$true] %s493_s28 }
 0x102   :  { %s8159_s20 = scalar_lea.vmem %s470_s4, 16  ;;  %s8163_s2 = scalar_lea.vmem %s470_s4, 32 }
 0x103   :  { %p8160_p12 = scmp.ne.s32.totalorder %s470_s4, %s8159_s20  ;;  %p8164_p13 = scmp.lt.s32.totalorder %s470_s4, %s470_s4 }
 0x104   :  { %p8165_p0 = scmp.lt.s32.totalorder %s8163_s2, %s8159_s20 }
 0x106   :  { %p8166_p1 = por %p8165_p0, %p8164_p13 }
 0x108   :  { %p8167_p2 = pnand %p8166_p1, %p8160_p12 }
 0x10a   :  { %8170 = shalt.err (!%p8167_p2)
}
 0x10b   :  { %472 = dma.hbm_to_vmem [thread:$0]  %s8962_s13, 16, %s470_s4, [#allocation37]  }
 0x10c   :  { %s8179_s6 = scalar_lea.vmem %s494_s28, 16  ;;  %s8183_s10 = scalar_lea.vmem %s494_s28, 32 }
 0x10d   :  { %p8180_p3 = scmp.ne.s32.totalorder %s494_s28, %s8179_s6  ;;  %p8184_p4 = scmp.lt.s32.totalorder %s494_s28, %s494_s28 }
 0x10e   :  { %p8185_p5 = scmp.lt.s32.totalorder %s8183_s10, %s8179_s6 }
 0x110   :  { %p8186_p6 = por %p8185_p5, %p8184_p4 }
 0x112   :  { %p8187_p7 = pnand %p8186_p6, %p8180_p3 }
 0x114   :  { %8190 = shalt.err (!%p8187_p7)
}
 0x115   :  { %496 = dma.hbm_to_vmem [thread:$0]  %s8977_s27, 16, %s494_s28, [#allocation40]  }
 0x116   :  { %s8630_s9 = smov [#allocation42]   ;;  %s8631_s11 = smov [#allocation45]  }
 0x117   :  { %s517_s24 = sshll.u32 %s8630_s9, 4  ;;  %s543_s7 = sshll.u32 %s8631_s11, 4  ;;  %s518_s24 = int_to_ptr.vmem [resolvable:$true] %s517_s24  ;;  %s544_s7 = int_to_ptr.vmem [resolvable:$true] %s543_s7 }
 0x118   :  { %s8199_s16 = scalar_lea.vmem %s518_s24, 16  ;;  %s8203_s3 = scalar_lea.vmem %s518_s24, 32 }
 0x119   :  { %p8200_p8 = scmp.ne.s32.totalorder %s518_s24, %s8199_s16  ;;  %p8204_p9 = scmp.lt.s32.totalorder %s518_s24, %s518_s24 }
 0x11a   :  { %p8205_p10 = scmp.lt.s32.totalorder %s8203_s3, %s8199_s16 }
 0x11c   :  { %p8206_p11 = por %p8205_p10, %p8204_p9 }
 0x11e   :  { %p8207_p12 = pnand %p8206_p11, %p8200_p8 }
 0x120   :  { %8210 = shalt.err (!%p8207_p12)
}
 0x121   :  { %s10053_s13 = sld [smem:[#allocation120_spill]]  ;;  %s8219_s19 = scalar_lea.vmem %s544_s7, 16 }
 0x122   :  { %p8220_p13 = scmp.ne.s32.totalorder %s544_s7, %s8219_s19  ;;  %s8223_s18 = scalar_lea.vmem %s544_s7, 32 }
 0x123   :  { %p8224_p0 = scmp.lt.s32.totalorder %s544_s7, %s544_s7  ;;  %p8225_p1 = scmp.lt.s32.totalorder %s8223_s18, %s8219_s19 }
 0x125   :  { %p8226_p2 = por %p8225_p1, %p8224_p0 }
 0x127   :  { %520 = dma.hbm_to_vmem [thread:$0]  %s10053_s13, 16, %s518_s24, [#allocation43]  }
 0x128   :  { %p8227_p3 = pnand %p8226_p2, %p8220_p13 }
 0x12a   :  { %8230 = shalt.err (!%p8227_p3)
}
 0x12b   :  { %s10054_s27 = sld [smem:[#allocation124_spill]]  ;;  %s8632_s14 = smov [#allocation9]  }
 0x12c   :  { %s271_s23 = sshll.u32 %s8632_s14, 4  ;;  %s8633_s26 = smov [#allocation14]   ;;  %s272_s23 = int_to_ptr.vmem [resolvable:$true] %s271_s23 }
 0x12d   :  { %s293_s5 = sshll.u32 %s8633_s26, 4  ;;  %s8239_s1 = scalar_lea.vmem %s272_s23, 16  ;;  %s294_s5 = int_to_ptr.vmem [resolvable:$true] %s293_s5 }
 0x12e   :  { %p8240_p4 = scmp.ne.s32.totalorder %s272_s23, %s8239_s1  ;;  %s8243_s8 = scalar_lea.vmem %s272_s23, 32 }
 0x12f   :  { %p8244_p5 = scmp.lt.s32.totalorder %s272_s23, %s272_s23  ;;  %p8245_p6 = scmp.lt.s32.totalorder %s8243_s8, %s8239_s1 }
 0x131   :  { %546 = dma.hbm_to_vmem [thread:$0]  %s10054_s27, 16, %s544_s7, [#allocation46]  }
 0x132   :  { %p8246_p7 = por %p8245_p6, %p8244_p5 }
 0x134   :  { %p8247_p8 = pnand %p8246_p7, %p8240_p4 }
 0x136   :  { %8250 = shalt.err (!%p8247_p8)
}
 0x137   :  { %s10055_s0 = sld [smem:[#allocation94_spill]]  ;;  %s8259_s17 = scalar_lea.vmem %s294_s5, 16 }
 0x138   :  { %p8260_p9 = scmp.ne.s32.totalorder %s294_s5, %s8259_s17  ;;  %s8263_s25 = scalar_lea.vmem %s294_s5, 32 }
 0x139   :  { %p8264_p10 = scmp.lt.s32.totalorder %s294_s5, %s294_s5  ;;  %p8265_p11 = scmp.lt.s32.totalorder %s8263_s25, %s8259_s17 }
 0x13b   :  { %p8266_p12 = por %p8265_p11, %p8264_p10 }
 0x13d   :  { %274 = dma.hbm_to_vmem [thread:$0]  %s10055_s0, 16, %s272_s23, [#allocation10]  }
 0x13e   :  { %p8267_p13 = pnand %p8266_p12, %p8260_p9 }
 0x140   :  { %8270 = shalt.err (!%p8267_p13)
}
 0x141   :  { %s10056_s29 = sld [smem:[#allocation96_spill]]  ;;  %s8634_s30 = smov [#allocation17]  }
 0x142   :  { %s317_s21 = sshll.u32 %s8634_s30, 4  ;;  %s8635_s12 = smov [#allocation20]   ;;  %s318_s21 = int_to_ptr.vmem [resolvable:$true] %s317_s21 }
 0x143   :  { %s341_s22 = sshll.u32 %s8635_s12, 4  ;;  %s8279_s4 = scalar_lea.vmem %s318_s21, 16  ;;  %s342_s22 = int_to_ptr.vmem [resolvable:$true] %s341_s22 }
 0x144   :  { %p8280_p0 = scmp.ne.s32.totalorder %s318_s21, %s8279_s4  ;;  %s8283_s15 = scalar_lea.vmem %s318_s21, 32 }
 0x145   :  { %p8284_p1 = scmp.lt.s32.totalorder %s318_s21, %s318_s21  ;;  %p8285_p2 = scmp.lt.s32.totalorder %s8283_s15, %s8279_s4 }
 0x147   :  { %296 = dma.hbm_to_vmem [thread:$0]  %s10056_s29, 16, %s294_s5, [#allocation13]  }
 0x148   :  { %p8286_p3 = por %p8285_p2, %p8284_p1 }
 0x14a   :  { %p8287_p4 = pnand %p8286_p3, %p8280_p0 }
 0x14c   :  { %8290 = shalt.err (!%p8287_p4)
}
 0x14d   :  { %s10057_s28 = sld [smem:[#allocation99_spill]]  ;;  %s8299_s20 = scalar_lea.vmem %s342_s22, 16 }
 0x14e   :  { %p8300_p5 = scmp.ne.s32.totalorder %s342_s22, %s8299_s20  ;;  %s8303_s2 = scalar_lea.vmem %s342_s22, 32 }
 0x14f   :  { %p8304_p6 = scmp.lt.s32.totalorder %s342_s22, %s342_s22  ;;  %p8305_p7 = scmp.lt.s32.totalorder %s8303_s2, %s8299_s20 }
 0x151   :  { %p8306_p8 = por %p8305_p7, %p8304_p6 }
 0x153   :  { %320 = dma.hbm_to_vmem [thread:$0]  %s10057_s28, 16, %s318_s21, [#allocation16]  }
 0x154   :  { %p8307_p9 = pnand %p8306_p8, %p8300_p5 }
 0x156   :  { %8310 = shalt.err (!%p8307_p9)
}
 0x157   :  { %s10058_s6 = sld [smem:[#allocation102_spill]]  ;;  %s8636_s10 = smov [#allocation23]  }
 0x158   :  { %s371_s9 = sshll.u32 %s8636_s10, 4  ;;  %s8637_s24 = smov [#allocation26]   ;;  %s372_s9 = int_to_ptr.vmem [resolvable:$true] %s371_s9 }
 0x159   :  { %s393_s11 = sshll.u32 %s8637_s24, 4  ;;  %s8319_s7 = scalar_lea.vmem %s372_s9, 16  ;;  %s394_s11 = int_to_ptr.vmem [resolvable:$true] %s393_s11 }
 0x15a   :  { %p8320_p10 = scmp.ne.s32.totalorder %s372_s9, %s8319_s7  ;;  %s8323_s16 = scalar_lea.vmem %s372_s9, 32 }
 0x15b   :  { %p8324_p11 = scmp.lt.s32.totalorder %s372_s9, %s372_s9  ;;  %p8325_p12 = scmp.lt.s32.totalorder %s8323_s16, %s8319_s7 }
 0x15d   :  { %344 = dma.hbm_to_vmem [thread:$0]  %s10058_s6, 16, %s342_s22, [#allocation19]  }
 0x15e   :  { %p8326_p13 = por %p8325_p12, %p8324_p11 }
 0x160   :  { %p8327_p0 = pnand %p8326_p13, %p8320_p10 }
 0x162   :  { %8330 = shalt.err (!%p8327_p0)
}
 0x163   :  { %s10059_s3 = sld [smem:[#allocation106_spill]]  ;;  %s8339_s13 = scalar_lea.vmem %s394_s11, 16 }
 0x164   :  { %p8340_p1 = scmp.ne.s32.totalorder %s394_s11, %s8339_s13  ;;  %s8343_s19 = scalar_lea.vmem %s394_s11, 32 }
 0x165   :  { %p8344_p2 = scmp.lt.s32.totalorder %s394_s11, %s394_s11  ;;  %p8345_p3 = scmp.lt.s32.totalorder %s8343_s19, %s8339_s13 }
 0x167   :  { %p8346_p4 = por %p8345_p3, %p8344_p2 }
 0x169   :  { %374 = dma.hbm_to_vmem [thread:$0]  %s10059_s3, 16, %s372_s9, [#allocation22]  }
 0x16a   :  { %p8347_p5 = pnand %p8346_p4, %p8340_p1 }
 0x16c   :  { %8350 = shalt.err (!%p8347_p5)
}
 0x16d   :  { %s10060_s18 = sld [smem:[#allocation108_spill]]  ;;  %s8638_s27 = smov [#allocation29]  }
 0x16e   :  { %s413_s14 = sshll.u32 %s8638_s27, 4  ;;  %s8639_s23 = smov [#allocation32]   ;;  %s414_s14 = int_to_ptr.vmem [resolvable:$true] %s413_s14 }
 0x16f   :  { %s435_s26 = sshll.u32 %s8639_s23, 4  ;;  %s8359_s5 = scalar_lea.vmem %s414_s14, 16  ;;  %s436_s26 = int_to_ptr.vmem [resolvable:$true] %s435_s26 }
 0x170   :  { %p8360_p6 = scmp.ne.s32.totalorder %s414_s14, %s8359_s5  ;;  %s8363_s1 = scalar_lea.vmem %s414_s14, 32 }
 0x171   :  { %p8364_p7 = scmp.lt.s32.totalorder %s414_s14, %s414_s14  ;;  %p8365_p8 = scmp.lt.s32.totalorder %s8363_s1, %s8359_s5 }
 0x173   :  { %396 = dma.hbm_to_vmem [thread:$0]  %s10060_s18, 16, %s394_s11, [#allocation25]  }
 0x174   :  { %p8366_p9 = por %p8365_p8, %p8364_p7 }
 0x176   :  { %p8367_p10 = pnand %p8366_p9, %p8360_p6 }
 0x178   :  { %8370 = shalt.err (!%p8367_p10)
}
 0x179   :  { %s10061_s8 = sld [smem:[#allocation109_spill]]  ;;  %s8379_s0 = scalar_lea.vmem %s436_s26, 16 }
 0x17a   :  { %p8380_p11 = scmp.ne.s32.totalorder %s436_s26, %s8379_s0  ;;  %s8383_s17 = scalar_lea.vmem %s436_s26, 32 }
 0x17b   :  { %p8384_p12 = scmp.lt.s32.totalorder %s436_s26, %s436_s26  ;;  %p8385_p13 = scmp.lt.s32.totalorder %s8383_s17, %s8379_s0 }
 0x17d   :  { %p8386_p0 = por %p8385_p13, %p8384_p12 }
 0x17f   :  { %416 = dma.hbm_to_vmem [thread:$0]  %s10061_s8, 16, %s414_s14, [#allocation28]  }
 0x180   :  { %p8387_p1 = pnand %p8386_p0, %p8380_p11 }
 0x182   :  { %8390 = shalt.err (!%p8387_p1)
}
 0x183   :  { %s10062_s25 = sld [smem:[#allocation111_spill]]  ;;  %s8640_s29 = smov [#allocation35]  }
 0x184   :  { %s457_s30 = sshll.u32 %s8640_s29, 4  ;;  %s8641_s21 = smov [#allocation38]   ;;  %s458_s30 = int_to_ptr.vmem [resolvable:$true] %s457_s30 }
 0x185   :  { %s483_s12 = sshll.u32 %s8641_s21, 4  ;;  %s8399_s22 = scalar_lea.vmem %s458_s30, 16  ;;  %s484_s12 = int_to_ptr.vmem [resolvable:$true] %s483_s12 }
 0x186   :  { %p8400_p2 = scmp.ne.s32.totalorder %s458_s30, %s8399_s22  ;;  %s8403_s4 = scalar_lea.vmem %s458_s30, 32 }
 0x187   :  { %p8404_p3 = scmp.lt.s32.totalorder %s458_s30, %s458_s30  ;;  %p8405_p4 = scmp.lt.s32.totalorder %s8403_s4, %s8399_s22 }
 0x189   :  { %438 = dma.hbm_to_vmem [thread:$0]  %s10062_s25, 16, %s436_s26, [#allocation31]  }
 0x18a   :  { %p8406_p5 = por %p8405_p4, %p8404_p3 }
 0x18c   :  { %p8407_p6 = pnand %p8406_p5, %p8400_p2 }
 0x18e   :  { %8410 = shalt.err (!%p8407_p6)
}
 0x18f   :  { %s10063_s15 = sld [smem:[#allocation113_spill]]  ;;  %s8419_s28 = scalar_lea.vmem %s484_s12, 16 }
 0x190   :  { %p8420_p7 = scmp.ne.s32.totalorder %s484_s12, %s8419_s28  ;;  %s8423_s20 = scalar_lea.vmem %s484_s12, 32 }
 0x191   :  { %p8424_p8 = scmp.lt.s32.totalorder %s484_s12, %s484_s12  ;;  %p8425_p9 = scmp.lt.s32.totalorder %s8423_s20, %s8419_s28 }
 0x193   :  { %p8426_p10 = por %p8425_p9, %p8424_p8 }
 0x195   :  { %460 = dma.hbm_to_vmem [thread:$0]  %s10063_s15, 16, %s458_s30, [#allocation34]  }
 0x196   :  { %p8427_p11 = pnand %p8426_p10, %p8420_p7 }
 0x198   :  { %8430 = shalt.err (!%p8427_p11)
}
 0x199   :  { %s10064_s2 = sld [smem:[#allocation116_spill]]  ;;  %s8642_s6 = smov [#allocation41]  }
 0x19a   :  { %s505_s10 = sshll.u32 %s8642_s6, 4  ;;  %s8643_s9 = smov [#allocation44]   ;;  %s506_s10 = int_to_ptr.vmem [resolvable:$true] %s505_s10 }
 0x19b   :  { %s529_s24 = sshll.u32 %s8643_s9, 4  ;;  %s8439_s11 = scalar_lea.vmem %s506_s10, 16  ;;  %s530_s24 = int_to_ptr.vmem [resolvable:$true] %s529_s24 }
 0x19c   :  { %p8440_p12 = scmp.ne.s32.totalorder %s506_s10, %s8439_s11  ;;  %s8443_s7 = scalar_lea.vmem %s506_s10, 32 }
 0x19d   :  { %p8444_p13 = scmp.lt.s32.totalorder %s506_s10, %s506_s10  ;;  %p8445_p0 = scmp.lt.s32.totalorder %s8443_s7, %s8439_s11 }
 0x19f   :  { %486 = dma.hbm_to_vmem [thread:$0]  %s10064_s2, 16, %s484_s12, [#allocation37]  }
 0x1a0   :  { %p8446_p1 = por %p8445_p0, %p8444_p13 }
 0x1a2   :  { %p8447_p2 = pnand %p8446_p1, %p8440_p12 }
 0x1a4   :  { %8450 = shalt.err (!%p8447_p2)
}
 0x1a5   :  { %s10065_s16 = sld [smem:[#allocation118_spill]]  ;;  %s8459_s3 = scalar_lea.vmem %s530_s24, 16 }
 0x1a6   :  { %p8460_p3 = scmp.ne.s32.totalorder %s530_s24, %s8459_s3  ;;  %s8463_s13 = scalar_lea.vmem %s530_s24, 32 }
 0x1a7   :  { %p8464_p4 = scmp.lt.s32.totalorder %s530_s24, %s530_s24  ;;  %p8465_p5 = scmp.lt.s32.totalorder %s8463_s13, %s8459_s3 }
 0x1a9   :  { %p8466_p6 = por %p8465_p5, %p8464_p4 }
 0x1ab   :  { %508 = dma.hbm_to_vmem [thread:$0]  %s10065_s16, 16, %s506_s10, [#allocation40]  }
 0x1ac   :  { %p8467_p7 = pnand %p8466_p6, %p8460_p3 }
 0x1ae   :  { %8470 = shalt.err (!%p8467_p7)
}
 0x1af   :  { %s10066_s19 = sld [smem:[#allocation122_spill]]  ;;  %s8644_s18 = smov [#allocation47]  }
 0x1b0   :  { %s553_s27 = sshll.u32 %s8644_s18, 4  ;;  %s554_s27 = int_to_ptr.vmem [resolvable:$true] %s553_s27 }
 0x1b1   :  { %s8479_s14 = scalar_lea.vmem %s554_s27, 16  ;;  %s8483_s23 = scalar_lea.vmem %s554_s27, 32 }
 0x1b2   :  { %p8480_p8 = scmp.ne.s32.totalorder %s554_s27, %s8479_s14  ;;  %p8484_p9 = scmp.lt.s32.totalorder %s554_s27, %s554_s27 }
 0x1b3   :  { %p8485_p10 = scmp.lt.s32.totalorder %s8483_s23, %s8479_s14 }
 0x1b5   :  { %532 = dma.hbm_to_vmem [thread:$0]  %s10066_s19, 16, %s530_s24, [#allocation43]  }
 0x1b6   :  { %p8486_p11 = por %p8485_p10, %p8484_p9 }
 0x1b8   :  { %p8487_p12 = pnand %p8486_p11, %p8480_p8 }
 0x1ba   :  { %8490 = shalt.err (!%p8487_p12)
}
 0x1bb   :  { %s10067_s26 = sld [smem:[#allocation125_spill]] }
 0x1c1   :  { %556 = dma.hbm_to_vmem [thread:$0]  %s10067_s26, 16, %s554_s27, [#allocation46]  }
 0x1c2   :  { %8511 = dma.done.wait [#allocation10], 16  }
 0x1c3   :  { %8512 = vsyncadd [#allocation10], 4294967280 }
 0x1c4   :  { %8513 = dma.done.wait [#allocation13], 32  }
 0x1c5   :  { %8514 = vsyncadd [#allocation13], 4294967264 }
 0x1c6   :  { %8515 = dma.done.wait [#allocation16], 32  }
 0x1c7   :  { %8516 = vsyncadd [#allocation16], 4294967264 }
 0x1c8   :  { %8517 = dma.done.wait [#allocation19], 32  }
 0x1c9   :  { %8518 = vsyncadd [#allocation19], 4294967264 }
 0x1ca   :  { %8519 = dma.done.wait [#allocation22], 32  }
 0x1cb   :  { %8520 = vsyncadd [#allocation22], 4294967264 }
 0x1cc   :  { %8521 = dma.done.wait [#allocation25], 32  }
 0x1cd   :  { %8522 = vsyncadd [#allocation25], 4294967264 }
 0x1ce   :  { %8523 = dma.done.wait [#allocation28], 32  }
 0x1cf   :  { %8524 = vsyncadd [#allocation28], 4294967264 }
 0x1d0   :  { %8525 = dma.done.wait [#allocation31], 32  }
 0x1d1   :  { %8526 = vsyncadd [#allocation31], 4294967264 }
 0x1d2   :  { %8527 = dma.done.wait [#allocation34], 32  }
 0x1d3   :  { %8528 = vsyncadd [#allocation34], 4294967264 }
 0x1d4   :  { %8529 = dma.done.wait [#allocation37], 32  }
 0x1d5   :  { %8530 = vsyncadd [#allocation37], 4294967264 }
 0x1d6   :  { %8531 = dma.done.wait [#allocation40], 32  }
 0x1d7   :  { %8532 = vsyncadd [#allocation40], 4294967264 }
 0x1d8   :  { %8533 = dma.done.wait [#allocation43], 32  }
 0x1d9   :  { %8534 = vsyncadd [#allocation43], 4294967264 }
 0x1da   :  { %8535 = dma.done.wait [#allocation46], 32  }
 0x1db   :  { %8536 = vsyncadd [#allocation46], 4294967264  ;;  %s10068_s5 = sld [smem:[#allocation75_spill]]  ;;  %v8645_v7 = vmov 0   ;;  %vm661_vm0 = vcmask 261120   ;;  %v766_v18 = vlaneseq  ;;  %vm854_vm1 = vcmask 392512  }
 0x1dc   :  { %s10069_s1 = sld [smem:[#allocation64_spill]]  ;;  %7843 = vset.pattern.permute.xlu0 %v8645_v7  ;;  %7844 = vset.pattern.permute.xlu1 %v8645_v7  ;;  %vm861_vm2 = vcmask 458112   ;;  %vm868_vm3 = vcmask 523712   ;;  %s8646_s29 = smov 96   ;;  %v7034_v53 = vld [vmem:[#allocation3] ss:$0 sm:$0xff] }
 0x1dd   :  { %s10070_s8 = sld [smem:[#allocation78_spill]]  ;;  %v9095_v19 = vand.u32 127, %v766_v18  ;;  %v9097_v21 = vshrl.u32 %v766_v18, 7  ;;  %vm777_vm4 = vcmask 130112   ;;  %vm784_vm5 = vcmask 195712  }
 0x1de   :  { %s10071_s0 = sld [smem:[#allocation76_spill]]  ;;  %vm791_vm6 = vcmask 261312   ;;  %vm1919_vm7 = vcmask 64512   ;;  %vm2305_vm9 = vcmask 130048   ;;  %vm793_vm11 = vcmask 1041409  }
 0x1df   :  { %v844_v22 = vadd.s32 4294967264, %v9095_v19  ;;  %v849_v23 = vadd.s32 4294967256, %v9095_v19  ;;  %v856_v24 = vadd.s32 4294967248, %v9095_v19  ;;  %v863_v29 = vadd.s32 4294967240, %v9095_v19  ;;  %s10072_s17 = sld [smem:[#allocation65_spill]] }
 0x1e0   :  { %s10073_s25 = sld [smem:[#allocation85_spill]]  ;;  %vm794_vm12 = vcmask 1042434   ;;  %vm796_vm13 = vcmask 1043459   ;;  %vm3298_vm14 = vcmask 1043456   ;;  %vm3291_vm15 = vcmask 31744  }
 0x1e1   :  { %v653_v8 = vld [vmem:[%s10068_s5 + $0x18] sm:$0xff]  ;;  %v652_v9 = vld [vmem:[%s10068_s5 + $0x10] sm:$0xff]  ;;  %v651_v11 = vld [vmem:[%s10068_s5 + $0x8] sm:$0xff]  ;;  %v847_v25 = vsub.s32 %v844_v22, %v9097_v21  ;;  %v852_v26 = vsub.s32 %v849_v23, %v9097_v21  ;;  %v859_v30 = vsub.s32 %v856_v24, %v9097_v21  ;;  %v866_v33 = vsub.s32 %v863_v29, %v9097_v21  ;;  %s10074_s30 = sld [smem:[#allocation77_spill]] }
 0x1e2   :  { %7376 = vmatprep.subr.mxu0 %v653_v8  ;;  %v9080_v10 = vld [vmem:[%s10069_s1] sm:$0xff]  ;;  %v9091_v17 = vld [vmem:[%s10069_s1 + $0x8] sm:$0xff]  ;;  %s10075_s21 = sld [smem:[#allocation69_spill]]  ;;  %v786_v22 = vadd.s32 4294967272, %v9095_v19 }
 0x1e3   :  { %7377 = vmatpush3.msra.mxu0 %v653_v8  ;;  %7384 = vmatprep.mubr.msk.f32.mxu0 %vm661_vm0, %v9080_v10  ;;  %v823_v12 = vld [vmem:[%s10070_s8] sm:$0xff]  ;;  %v825_v13 = vld [vmem:[%s10070_s8 + $0x10] sm:$0xff]  ;;  %v824_v15 = vld [vmem:[%s10070_s8 + $0x8] sm:$0xff]  ;;  %s10076_s12 = sld [smem:[#allocation83_spill]] }
 0x1e4   :  { %7378 = vmatprep.subr.mxu0 %v652_v9  ;;  %833 = vperm.xlu0 %7843, %v823_v12   ;;  %v650_v14 = vld [vmem:[%s10068_s5] sm:$0xff]  ;;  %v826_v16 = vld [vmem:[%s10070_s8 + $0x18] sm:$0xff]  ;;  %s10077_s22 = sld [smem:[#allocation84_spill]]  ;;  %v772_v12 = vadd.s32 4294967288, %v9095_v19 }
 0x1e5   :  { %7379 = vmatpush3.msra.mxu0 %v652_v9  ;;  %839 = vperm.xlu1 %7844, %v825_v13   ;;  %v7030_v37 = vld [vmem:[%s10071_s0] ss:$0 sm:$0xff]  ;;  %v9123_v54 = vld [vmem:[%s10072_s17 + $0x8] sm:$0xff]  ;;  %s10078_s4 = sld [smem:[#allocation63_spill]] }
 0x1e6   :  { %7380 = vmatprep.subr.mxu0 %v651_v11  ;;  %v1032_v56 = vld [vmem:[%s10073_s25 + $0x18] sm:$0xff]  ;;  %v9127_v58 = vld [vmem:[%s10072_s17] sm:$0xff]  ;;  %v1031_v60 = vld [vmem:[%s10073_s25 + $0x10] sm:$0xff]  ;;  %s10079_s15 = sld [smem:[#allocation81_spill]] }
 0x1e7   :  { %7381 = vmatpush3.msra.mxu0 %v651_v11  ;;  %v1030_v63 = vld [vmem:[%s10073_s25 + $0x8] sm:$0xff]  ;;  %v1029_v2 = vld [vmem:[%s10073_s25] sm:$0xff]  ;;  %v748_v5 = vld [vmem:[%s10074_s30 + $0x18] sm:$0xff]  ;;  %s10080_s28 = sld [smem:[#allocation70_spill]] }
 0x1e8   :  { %7382 = vmatprep.subr.mxu0 %v650_v14  ;;  %836 = vperm.xlu0 %7843, %v824_v15   ;;  %v746_v1 = vld [vmem:[%s10074_s30 + $0x8] sm:$0xff]  ;;  %v745_v3 = vld [vmem:[%s10074_s30] sm:$0xff]  ;;  %v1276_v4 = vld [vmem:[%s10075_s21 + $0x18] sm:$0xff]  ;;  %v779_v15 = vadd.s32 4294967280, %v9095_v19  ;;  %s10081_s20 = sld [smem:[#allocation89_spill]] }
 0x1e9   :  { %7383 = vmatpush3.msra.mxu0 %v650_v14  ;;  %842 = vperm.xlu1 %7844, %v826_v16   ;;  %v747_v6 = vld [vmem:[%s10074_s30 + $0x10] sm:$0xff]  ;;  %v7040_v7 = vld [vmem:[%s10076_s12] ss:$0 sm:$0xff]  ;;  %v9145_v16 = vsub.s32 %v9095_v19, %v9097_v21  ;;  %s10082_s2 = sld [smem:[#allocation79_spill]] }
 0x1ea   :  { %7385 = vmatmul.mubr.msk.f32.vlgmr.msra.gmra.mxu0 %vm661_vm0, %v9091_v17  ;;  %7398 = vmatprep.subr.mxu0 %v1032_v56  ;;  %v7041_v9 = vld [vmem:[%s10077_s22] ss:$0 sm:$0xff]  ;;  %s10083_s6 = sld [smem:[#allocation80_spill]] }
 0x1eb   :  { %7399 = vmatpush3.msra.mxu0 %v1032_v56  ;;  %v9149_v23 = vld [vmem:[%s10078_s4] sm:$0xff]  ;;  %s10084_s10 = sld [smem:[#allocation87_spill]] }
 0x1ec   :  { %7400 = vmatprep.subr.mxu0 %v1031_v60  ;;  %v1271_v29 = vadd.f32 %v9080_v10, %v9149_v23  ;;  %s10085_s9 = sld [smem:[#allocation88_spill]] }
 0x1ed   :  { %7401 = vmatpush3.msra.mxu0 %v1031_v60  ;;  %s10086_s24 = sld [smem:[#allocation71_spill]] }
 0x1ee   :  { %7402 = vmatprep.subr.mxu0 %v1030_v63  ;;  %s10087_s11 = sld [smem:[#allocation82_spill]] }
 0x1ef   :  { %7403 = vmatpush3.msra.mxu0 %v1030_v63  ;;  %s10088_s7 = sld [smem:[#allocation86_spill]] }
 0x1f0   :  { %7404 = vmatprep.subr.mxu0 %v1029_v2  ;;  %s10089_s16 = sld [smem:[#allocation90_spill]] }
 0x1f1   :  { %7405 = vmatpush3.msra.mxu0 %v1029_v2  ;;  %v905_v2 = vld [vmem:[%s10079_s15] sm:$0xff]  ;;  %s10094_s3 = sld [smem:[#allocation72_spill]] }
 0x1f2   :  { %7420 = vmatprep.subr.mxu0 %v1276_v4  ;;  %s10095_s13 = sld [smem:[#allocation91_spill]] }
 0x1f3   :  { %s10096_s19 = sld [smem:[#allocation101_spill]] }
 0x1f4   :  { %s10097_s18 = sld [smem:[#allocation105_spill]] }
 0x1f5   :  { %s10098_s27 = sld [smem:[#allocation93_spill]] }
 0x1f6   :  { %s10099_s14 = sld [smem:[#allocation103_spill]] }
 0x1f7   :  { %s10100_s23 = sld [smem:[#allocation73_spill]] }
 0x1f8   :  { %s10101_s26 = sld [smem:[#allocation104_spill]] }
 0x1f9   :  { %s10102_s5 = sld [smem:[#allocation67_spill]] }
 0x1fa   :  { %s10104_s8 = sld [smem:[#allocation92_spill]] }
 0x1fb   :  { %s10105_s0 = sld [smem:[#allocation68_spill]] }
 0x1fc   :  { %s10106_s25 = sld [smem:[#allocation110_spill]] }
 0x1fd   :  { %s10108_s30 = sld [smem:[#allocation95_spill]] }
 0x1fe   :  { %s10111_s12 = sld [smem:[#allocation97_spill]] }
 0x1ff   :  { %s10112_s22 = sld [smem:[#allocation98_spill]] }
 0x25f   :  { %v834_v20 = vpop.permute.xlu0 %833 }
 0x260   :  { %v840_v27 = vpop.permute.xlu1 %839  ;;  %v848_v31 = vrot.slane %v834_v20, %v847_v25  ;;  %v9152_v25 = vsub.s32 %v772_v12, %v9097_v21 }
 0x261   :  { %v860_v34 = vrot.slane %v840_v27, %v859_v30 }
 0x263   :  { %v837_v28 = vpop.permute.xlu0 %836 }
 0x264   :  { %v853_v32 = vrot.slane %v837_v28, %v852_v26  ;;  %v843_v35 = vpop.permute.xlu1 %842  ;;  %v9155_v28 = vsub.s32 %v779_v15, %v9097_v21  ;;  %v7046_v15 = vld [vmem:[%s10085_s9] ss:$0 sm:$0xff]  ;;  %s8648_s9 = smov [#allocation48]  }
 0x265   :  { %v867_v38 = vrot.slane %v843_v35, %v866_v33 }
 0x266   :  { %v855_v36 = vsel %vm854_vm1, %v853_v32, %v848_v31  ;;  %v9161_v32 = vsub.s32 %v786_v22, %v9097_v21  ;;  %vm6624_vm1 = vcmask 523264  }
 0x267   :  { %v862_v41 = vsel %vm861_vm2, %v860_v34, %v855_v36  ;;  %v1275_v34 = vld [vmem:[%s10075_s21 + $0x10] sm:$0xff] }
 0x268   :  { %v869_v45 = vsel %vm868_vm3, %v867_v38, %v862_v41  ;;  %v1274_v38 = vld [vmem:[%s10075_s21 + $0x8] sm:$0xff] }
 0x2aa   :  { %v7386_v39 = vpop.f32.mrf.mxu0 }
 0x2ab   :  { %v9108_v40 = vadd.f32 %v7386_v39, %v7030_v37 }
 0x2ac   :  { %v734_v42 = vpop.f32.mrf.mxu0 }
 0x2ad   :  { %v744_v43 = vmax.f32 %v9108_v40, 0.0  ;;  %v9111_v44 = vadd.f32 %v7030_v37, %v734_v42  ;;  %v9168_v37 = vld [vmem:[%s10078_s4 + $0x8] sm:$0xff]  ;;  %v1273_v42 = vld [vmem:[%s10075_s21] sm:$0xff]  ;;  %s10109_s21 = sld [smem:[#allocation112_spill]] }
 0x2af   :  { %v878_v46 = vmul.f32 %v869_v45, %v744_v43  ;;  %v743_v47 = vmax.f32 %v9111_v44, 0.0 }
 0x2b1   :  { %v877_v48 = vmul.f32 %v869_v45, %v743_v47  ;;  %883 = vrot.lane.b32.xlu1 %v878_v46, %s8646_s29  ;;  %v1272_v46 = vadd.f32 %v9091_v17, %v9168_v37  ;;  %v7033_v17 = vld [vmem:[#allocation2] ss:$0 sm:$0xff] }
 0x2b3   :  { %881 = vrot.lane.b32.xlu0 %v877_v48, %s8646_s29 }
 0x323   :  { %v884_v49 = vpop.permute.xlu1 %883 }
 0x324   :  { %v890_v50 = vsel %vm661_vm0, %v884_v49, 0.0 }
 0x325   :  { %891 = vadd.xlane.f32.xlu1 %v890_v50  ;;  %v882_v51 = vpop.permute.xlu0 %881 }
 0x326   :  { %v887_v52 = vsel %vm661_vm0, %v882_v51, 0.0 }
 0x327   :  { %888 = vadd.xlane.f32.xlu0 %v887_v52 }
 0x3ae   :  { %v892_v55 = vpop.xlane.xlu1 %891 }
 0x3af   :  { %v900_v57 = vadd.f32 %v7034_v53, %v892_v55  ;;  %v907_v55 = vld [vmem:[%s10079_s15 + $0x10] sm:$0xff] }
 0x3b0   :  { %v889_v59 = vpop.xlane.xlu0 %888 }
 0x3b1   :  { %v1026_v61 = vadd.f32 %v900_v57, %v9123_v54  ;;  %v899_v62 = vadd.f32 %v7034_v53, %v889_v59  ;;  %v7050_v59 = vld [vmem:[%s10080_s28] ss:$0 sm:$0xff]  ;;  %s10115_s28 = sld [smem:[#allocation117_spill]] }
 0x3b3   :  { %v1025_v0 = vadd.f32 %v899_v62, %v9127_v58  ;;  %1041 = vperm.xlu1 %7844, %v1026_v61  }
 0x3b5   :  { %1036 = vperm.xlu0 %7843, %v1025_v0   ;;  %v906_v0 = vld [vmem:[%s10079_s15 + $0x8] sm:$0xff] }
 0x3b7   :  { %758 = vperm.xlu1 %7844, %v746_v1  }
 0x3b9   :  { %755 = vperm.xlu0 %7843, %v745_v3   ;;  %v1154_v3 = vld [vmem:[%s10081_s20 + $0x18] sm:$0xff] }
 0x3bb   :  { %764 = vperm.xlu1 %7844, %v748_v5  }
 0x3bd   :  { %761 = vperm.xlu0 %7843, %v747_v6   ;;  %v7036_v6 = vld [vmem:[%s10083_s6] ss:$0 sm:$0xff]  ;;  %s10118_s6 = sld [smem:[#allocation115_spill]] }
 0x42e   :  { %v1042_v8 = vpop.permute.xlu1 %1041 }
 0x42f   :  { %v1051_v11 = vmul.f32 %v7040_v7, %v1042_v8 }
 0x430   :  { %v1037_v13 = vpop.permute.xlu0 %1036 }
 0x431   :  { %v1050_v14 = vmul.f32 %v7040_v7, %v1037_v13  ;;  %v1059_v18 = vadd.f32 %v7041_v9, %v1051_v11 }
 0x432   :  { %v759_v20 = vpop.permute.xlu1 %758 }
 0x433   :  { %v1058_v24 = vadd.f32 %v7041_v9, %v1050_v14  ;;  %v1061_v30 = vmax.f32 %v1059_v18, 0.0  ;;  %v776_v35 = vrot.slane %v759_v20, %v9152_v25  ;;  %v7045_v14 = vld [vmem:[%s10084_s10] ss:$0 sm:$0xff]  ;;  %s10119_s10 = sld [smem:[#allocation121_spill]] }
 0x434   :  { %v756_v26 = vpop.permute.xlu0 %755 }
 0x435   :  { %v1060_v27 = vmax.f32 %v1058_v24, 0.0  ;;  %v771_v31 = vrot.slane %v756_v26, %v9145_v16 }
 0x436   :  { %v765_v33 = vpop.permute.xlu1 %764 }
 0x437   :  { %7406 = vmatprep.mubr.msk.f32.mxu0 %vm661_vm0, %v1060_v27  ;;  %v778_v39 = vsel %vm777_vm4, %v776_v35, %v771_v31  ;;  %v790_v41 = vrot.slane %v765_v33, %v9161_v32  ;;  %v1153_v31 = vld [vmem:[%s10081_s20 + $0x10] sm:$0xff]  ;;  %v1152_v33 = vld [vmem:[%s10081_s20 + $0x8] sm:$0xff]  ;;  %v1151_v35 = vld [vmem:[%s10081_s20] sm:$0xff]  ;;  %s10116_s20 = sld [smem:[#allocation119_spill]] }
 0x438   :  { %7407 = vmatmul.mubr.msk.f32.vlgmr.msra.gmra.mxu0 %vm661_vm0, %v1061_v30  ;;  %v762_v36 = vpop.permute.xlu0 %761 }
 0x439   :  { %7421 = vmatpush3.msra.mxu0 %v1276_v4  ;;  %v783_v10 = vrot.slane %v762_v36, %v9155_v28  ;;  %7428 = vmatprep.mubr.msk.f32.mxu0 %vm661_vm0, %v1271_v29  ;;  %v7035_v4 = vld [vmem:[%s10082_s2] ss:$0 sm:$0xff]  ;;  %v1368_v36 = vld [vmem:[%s10086_s24 + $0x18] sm:$0xff]  ;;  %s10117_s2 = sld [smem:[#allocation123_spill]] }
 0x43a   :  { %7422 = vmatprep.subr.mxu0 %v1275_v34 }
 0x43b   :  { %7423 = vmatpush3.msra.mxu0 %v1275_v34  ;;  %v785_v45 = vsel %vm784_vm5, %v783_v10, %v778_v39  ;;  %v1366_v39 = vld [vmem:[%s10086_s24 + $0x8] sm:$0xff] }
 0x43c   :  { %7424 = vmatprep.subr.mxu0 %v1274_v38  ;;  %v792_v48 = vsel %vm791_vm6, %v790_v41, %v785_v45 }
 0x43d   :  { %7425 = vmatpush3.msra.mxu0 %v1274_v38  ;;  %v808_v49 = vmul.f32 %v792_v48, %v744_v43  ;;  %v807_v50 = vmul.f32 %v792_v48, %v743_v47  ;;  %v908_v47 = vld [vmem:[%s10079_s15 + $0x18] sm:$0xff]  ;;  %v1367_v38 = vld [vmem:[%s10086_s24 + $0x10] sm:$0xff]  ;;  %s10114_s15 = sld [smem:[#allocation114_spill]] }
 0x43e   :  { %7426 = vmatprep.subr.mxu0 %v1273_v42  ;;  %7387 = vmatprep.subr.mxu1 %v908_v47 }
 0x43f   :  { %7427 = vmatpush3.msra.mxu0 %v1273_v42  ;;  %v812_v51 = vsel %vm661_vm0, %v808_v49, 0.0  ;;  %v809_v52 = vsel %vm661_vm0, %v807_v50, 0.0  ;;  %7388 = vmatpush3.msra.mxu1 %v908_v47  ;;  %v1365_v42 = vld [vmem:[%s10086_s24] sm:$0xff]  ;;  %s6921_s24 = sshll.u32 %s8648_s9, 4  ;;  %s6922_s24 = int_to_ptr.vmem [resolvable:$true] %s6921_s24 }
 0x440   :  { %7429 = vmatmul.mubr.msk.f32.vlgmr.msra.gmra.mxu0 %vm661_vm0, %v1272_v46  ;;  %813 = vadd.xlane.f32.xlu1 %v812_v51  ;;  %p8496_p0 = scmp.lt.s32.totalorder %s6922_s24, %s6922_s24 }
 0x441   :  { %810 = vadd.xlane.f32.xlu0 %v809_v52  ;;  %7389 = vmatprep.subr.mxu1 %v907_v55 }
 0x442   :  { %7390 = vmatpush3.msra.mxu1 %v907_v55 }
 0x443   :  { %7391 = vmatprep.subr.mxu1 %v906_v0 }
 0x444   :  { %7392 = vmatpush3.msra.mxu1 %v906_v0 }
 0x445   :  { %7393 = vmatprep.subr.mxu1 %v905_v2 }
 0x446   :  { %7394 = vmatpush3.msra.mxu1 %v905_v2 }
 0x447   :  { %7409 = vmatprep.subr.mxu1 %v1154_v3 }
 0x4c9   :  { %v814_v56 = vpop.xlane.xlu1 %813 }
 0x4ca   :  { %v811_v53 = vpop.xlane.xlu0 %810  ;;  %v822_v61 = vadd.f32 %v7033_v17, %v814_v56  ;;  %v7037_v56 = vld [vmem:[%s10087_s11] ss:$0 sm:$0xff]  ;;  %s8491_s11 = scalar_lea.vmem %s6922_s24, 256 }
 0x4cb   :  { %v821_v40 = vadd.f32 %v7033_v17, %v811_v53  ;;  %p8492_p13 = scmp.ne.s32.totalorder %s6922_s24, %s8491_s11  ;;  %p8497_p1 = scmp.lt.s32.totalorder %s8491_s11, %s8491_s11 }
 0x4cc   :  { %v902_v1 = vadd.f32 %v822_v61, %v9123_v54 }
 0x4cd   :  { %v901_v43 = vadd.f32 %v821_v40, %v9127_v58  ;;  %p8498_p2 = por %p8497_p1, %p8496_p0 }
 0x4cf   :  { %912 = vperm.xlu0 %7843, %v901_v43   ;;  %p8499_p3 = pnand %p8498_p2, %p8492_p13 }
 0x4d3   :  { %1158 = vperm.xlu0 %7843, %v9127_v58  }
 0x4f8   :  { %v9189_v44 = vpop.f32.mrf.mxu0 }
 0x4fa   :  { %v9193_v57 = vpop.f32.mrf.mxu0 }
 0x500   :  { %v7430_v60 = vpop.f32.mrf.mxu0 }
 0x501   :  { %v1362_v62 = vadd.f32 %v7430_v60, %v7050_v59  ;;  %v7042_v60 = vld [vmem:[%s10088_s7] ss:$0 sm:$0xff] }
 0x502   :  { %v1356_v63 = vpop.f32.mrf.mxu0  ;;  %v1146_v2 = vadd.f32 %v9189_v44, %v7042_v60 }
 0x503   :  { %v1357_v58 = vadd.f32 %v7050_v59, %v1356_v63  ;;  %1621 = vrot.lane.b32.xlu1 %v1362_v62, %s8646_s29 }
 0x505   :  { %1619 = vrot.lane.b32.xlu0 %v1357_v58, %s8646_s29  ;;  %s10107_s29 = sld [smem:[#allocation107_spill]] }
 0x507   :  { %917 = vperm.xlu1 %7844, %v902_v1  }
 0x50b   :  { %1163 = vperm.xlu1 %7844, %v9123_v54  }
 0x523   :  { %1457 = vxpose.xlu0.b32.start [1/2] (short) (narrow) %v1357_v58, 32 }
 0x527   :  { %1458 = vxpose.xlu0.b32.end [2/2] (short) (narrow) %v1362_v62, 32  ;;  %v1141_v62 = vadd.f32 %v7042_v60, %v9193_v57 }
 0x54a   :  { %v913_v5 = vpop.permute.xlu0 %912 }
 0x54b   :  { %v926_v7 = vmul.f32 %v7035_v4, %v913_v5 }
 0x54d   :  { %v934_v8 = vadd.f32 %v7036_v6, %v926_v7  ;;  %v7059_v7 = vmul.f32 -1.442695, %v1146_v2 }
 0x54e   :  { %v1159_v11 = vpop.permute.xlu0 %1158 }
 0x54f   :  { %v936_v9 = vmax.f32 %v934_v8, 0.0  ;;  %v1172_v54 = vmul.f32 %v7045_v14, %v1159_v11 }
 0x551   :  { %7395 = vmatprep.mubr.msk.f32.mxu1 %vm661_vm0, %v936_v9  ;;  %v1180_v22 = vadd.f32 %v7046_v15, %v1172_v54 }
 0x553   :  { %v1182_v30 = vmax.f32 %v1180_v22, 0.0 }
 0x575   :  { %v1622_v13 = vpop.permute.xlu1 %1621 }
 0x577   :  { %v1620_v12 = vpop.permute.xlu0 %1619 }
 0x578   :  { %1625 = vxpose.xlu0.b32.start [1/2] (short) (narrow) %v1620_v12, 32 }
 0x57c   :  { %1626 = vxpose.xlu0.b32.end [2/2] (short) (narrow) %v1622_v13, 32 }
 0x582   :  { %v918_v18 = vpop.permute.xlu1 %917 }
 0x583   :  { %v927_v20 = vmul.f32 %v7035_v4, %v918_v18  ;;  %v7047_v4 = vld [vmem:[%s10089_s16] ss:$0 sm:$0xff] }
 0x585   :  { %v935_v24 = vadd.f32 %v7036_v6, %v927_v20 }
 0x586   :  { %v1164_v26 = vpop.permute.xlu1 %1163 }
 0x587   :  { %v937_v27 = vmax.f32 %v935_v24, 0.0  ;;  %v1173_v29 = vmul.f32 %v7045_v14, %v1164_v26 }
 0x589   :  { %7396 = vmatmul.mubr.msk.f32.vlgmr.msra.gmra.mxu1 %vm661_vm0, %v937_v27  ;;  %v1181_v34 = vadd.f32 %v7046_v15, %v1173_v29 }
 0x58a   :  { %7410 = vmatpush3.msra.mxu1 %v1154_v3  ;;  %7417 = vmatprep.mubr.msk.f32.mxu1 %vm661_vm0, %v1182_v30  ;;  %v7058_v3 = vmul.f32 -1.442695, %v1141_v62 }
 0x58b   :  { %7411 = vmatprep.subr.mxu1 %v1153_v31  ;;  %v1183_v10 = vmax.f32 %v1181_v34, 0.0 }
 0x58c   :  { %7412 = vmatpush3.msra.mxu1 %v1153_v31 }
 0x58d   :  { %7413 = vmatprep.subr.mxu1 %v1152_v33 }
 0x58e   :  { %7414 = vmatpush3.msra.mxu1 %v1152_v33 }
 0x58f   :  { %7415 = vmatprep.subr.mxu1 %v1151_v35 }
 0x590   :  { %7416 = vmatpush3.msra.mxu1 %v1151_v35 }
 0x591   :  { %7418 = vmatmul.mubr.msk.f32.vlgmr.msra.gmra.mxu1 %vm661_vm0, %v1183_v10  ;;  %7431 = vmatprep.subr.mxu1 %v1368_v36 }
 0x592   :  { %7432 = vmatpush3.msra.mxu1 %v1368_v36  ;;  %7439 = vmatprep.mubr.msk.f32.mxu1 %vm661_vm0, %v9149_v23 }
 0x593   :  { %7433 = vmatprep.subr.mxu1 %v1367_v38 }
 0x594   :  { %7434 = vmatpush3.msra.mxu1 %v1367_v38  ;;  %v2259_v38 = vand.u32 1, %v9097_v21 }
 0x595   :  { %7435 = vmatprep.subr.mxu1 %v1366_v39 }
 0x596   :  { %7436 = vmatpush3.msra.mxu1 %v1366_v39 }
 0x597   :  { %7437 = vmatprep.subr.mxu1 %v1365_v42 }
 0x598   :  { %7438 = vmatpush3.msra.mxu1 %v1365_v42  ;;  %v2283_v42 = vand.u32 1, %v9095_v19 }
 0x599   :  { %7440 = vmatmul.mubr.msk.f32.vlgmr.msra.gmra.mxu1 %vm661_vm0, %v9168_v37 }
 0x59a   :  { %vm9237_vm8 = vcmp.eq.s32.totalorder %v2259_v38, %v2283_v42  ;;  %v9310_v38 = vsub.s32 3, %v9097_v21 }
 0x59f   :  { %v1473_v41 = vpop.trf.xlu0 }
 0x5a0   :  { %1489 = vxpose.xlu1.b32.start.end [1/1] (short) (narrow) %v1473_v41, 16 }
 0x5a3   :  { %v1474_v45 = vpop.trf.xlu0 }
 0x5a5   :  { %1521 = vxpose.xlu1.b32.start.end [1/1] (short) (narrow) %v1474_v45, 16 }
 0x5a7   :  { %v1475_v46 = vpop.trf.xlu0 }
 0x5aa   :  { %1553 = vxpose.xlu1.b32.start.end [1/1] (short) (narrow) %v1475_v46, 16 }
 0x5ab   :  { %v1476_v48 = vpop.trf.xlu0 }
 0x5ac   :  { %1585 = vxpose.xlu0.b32.start.end [1/1] (short) (narrow) %v1476_v48, 16  ;;  %v2254_v48 = vadd.s32 8, %v9097_v21 }
 0x5f4   :  { %v1641_v23 = vpop.trf.xlu0 }
 0x5f5   :  { %7442 = vmatprep.subr.mxu0 %v1641_v23 }
 0x5f6   :  { %7443 = vmatpush3.msra.mxu0 %v1641_v23 }
 0x5f8   :  { %v1642_v49 = vpop.trf.xlu0 }
 0x5f9   :  { %7447 = vmatprep.subr.mxu1 %v1642_v49 }
 0x5fa   :  { %7448 = vmatpush3.msra.mxu1 %v1642_v49 }
 0x5fc   :  { %v1643_v50 = vpop.trf.xlu0 }
 0x5fd   :  { %7452 = vmatprep.subr.mxu0 %v1643_v50 }
 0x600   :  { %v1644_v51 = vpop.trf.xlu0 }
 0x601   :  { %7457 = vmatprep.subr.mxu1 %v1644_v51 }
 0x61c   :  { %v1505_v52 = vpop.trf.xlu1 }
 0x61d   :  { %7444 = vmatprep.mubr.msk.f32.mxu0 %vm1919_vm7, %v1505_v52  ;;  %v2266_v52 = vand.u32 1, %v2254_v48 }
 0x61f   :  { %vm9248_vm10 = vcmp.eq.s32.totalorder %v2266_v52, %v2283_v42 }
 0x620   :  { %v1506_v37 = vpop.trf.xlu1 }
 0x621   :  { %7445 = vmatmul.mubr.msk.f32.vlgmr.msra.gmra.mxu0 %vm1919_vm7, %v1506_v37 }
 0x622   :  { %7453 = vmatpush3.msra.mxu0 %v1643_v50 }
 0x624   :  { %v1537_v17 = vpop.trf.xlu1 }
 0x625   :  { %7449 = vmatprep.mubr.msk.f32.mxu1 %vm1919_vm7, %v1537_v17 }
 0x628   :  { %v1538_v53 = vpop.trf.xlu1  ;;  %v1601_v40 = vpop.trf.xlu0 }
 0x629   :  { %7450 = vmatmul.mubr.msk.f32.vlgmr.msra.gmra.mxu1 %vm1919_vm7, %v1538_v53 }
 0x62a   :  { %7458 = vmatpush3.msra.mxu1 %v1644_v51  ;;  %7459 = vmatprep.mubr.msk.f32.mxu1 %vm1919_vm7, %v1601_v40 }
 0x62c   :  { %v1569_v43 = vpop.trf.xlu1  ;;  %v1602_v47 = vpop.trf.xlu0 }
 0x62d   :  { %7454 = vmatprep.mubr.msk.f32.mxu0 %vm1919_vm7, %v1569_v43  ;;  %7460 = vmatmul.mubr.msk.f32.vlgmr.msra.gmra.mxu1 %vm1919_vm7, %v1602_v47 }
 0x630   :  { %v1570_v55 = vpop.trf.xlu1 }
 0x631   :  { %7455 = vmatmul.mubr.msk.f32.vlgmr.msra.gmra.mxu0 %vm1919_vm7, %v1570_v55 }
 0x649   :  { %v7397_v59 = vpop.f32.mrf.mxu1 }
 0x64a   :  { %v1022_v61 = vadd.f32 %v7397_v59, %v7037_v56 }
 0x64b   :  { %v1016_v63 = vpop.f32.mrf.mxu1 }
 0x64c   :  { %v7057_v58 = vmul.f32 -1.442695, %v1022_v61  ;;  %v1017_v0 = vadd.f32 %v7037_v56, %v1016_v63 }
 0x64e   :  { %v7056_v1 = vmul.f32 -1.442695, %v1017_v0  ;;  %7845 = vpow2.f32 %v7057_v58 }
 0x650   :  { %7847 = vpow2.f32 %v7056_v1 }
 0x651   :  { %v7419_v5 = vpop.f32.mrf.mxu1  ;;  %7849 = vpow2.f32 %v7058_v3 }
 0x652   :  { %v1268_v6 = vadd.f32 %v7419_v5, %v7047_v4 }
 0x653   :  { %v1262_v8 = vpop.f32.mrf.mxu1 }
 0x654   :  { %v7061_v9 = vmul.f32 -1.442695, %v1268_v6  ;;  %v1263_v11 = vadd.f32 %v7047_v4, %v1262_v8  ;;  %v7053_v4 = vld [vmem:[%s10094_s3] ss:$0 sm:$0xff] }
 0x656   :  { %7851 = vpow2.f32 %v7061_v9  ;;  %v7060_v12 = vmul.f32 -1.442695, %v1263_v11 }
 0x657   :  { %7853 = vpow2.f32 %v7059_v7  ;;  %v9278_v7 = vsub.s32 2, %v9097_v21 }
 0x658   :  { %7855 = vpow2.f32 %v7060_v12 }
 0x659   :  { %v7441_v41 = vpop.f32.mrf.mxu1 }
 0x65a   :  { %v1454_v6 = vadd.f32 %v7441_v41, %v7053_v4 }
 0x65b   :  { %v7846_v57 = vpop.eup %7845  ;;  %v1448_v49 = vpop.f32.mrf.mxu1 }
 0x65c   :  { %v1824_v44 = vadd.f32 1.0, %v7846_v57  ;;  %v1449_v5 = vadd.f32 %v7053_v4, %v1448_v49 }
 0x65d   :  { %v7848_v13 = vpop.eup %7847 }
 0x65e   :  { %v1823_v14 = vadd.f32 1.0, %v7848_v13  ;;  %v7850_v54 = vpop.eup %7849 }
 0x65f   :  { %v1867_v18 = vadd.f32 1.0, %v7850_v54 }
 0x660   :  { %7857 = vrcp.f32 %v1823_v14 }
 0x661   :  { %7859 = vrcp.f32 %v1824_v44 }
 0x662   :  { %7861 = vrcp.f32 %v1867_v18 }
 0x663   :  { %v7852_v15 = vpop.eup %7851 }
 0x664   :  { %v7854_v20 = vpop.eup %7853  ;;  %v1880_v24 = vadd.f32 1.0, %v7852_v15 }
 0x665   :  { %v7856_v22 = vpop.eup %7855  ;;  %v1868_v27 = vadd.f32 1.0, %v7854_v20 }
 0x666   :  { %v1879_v26 = vadd.f32 1.0, %v7856_v22 }
 0x668   :  { %7863 = vrcp.f32 %v1879_v26 }
 0x669   :  { %7865 = vrcp.f32 %v1880_v24 }
 0x66a   :  { %7867 = vrcp.f32 %v1868_v27 }
 0x66d   :  { %v7858_v29 = vpop.eup %7857 }
 0x66e   :  { %1829 = vxpose.xlu0.b32.start [1/2] (short) (narrow) %v7858_v29, 8  ;;  %v7860_v30 = vpop.eup %7859 }
 0x66f   :  { %v7862_v31 = vpop.eup %7861 }
 0x672   :  { %1830 = vxpose.xlu0.b32.end [2/2] (short) (narrow) %v7860_v30, 8  ;;  %v9298_v30 = vsub.s32 0, %v9097_v21 }
 0x675   :  { %v7864_v33 = vpop.eup %7863 }
 0x676   :  { %v1885_v34 = vmul.f32 %v7864_v33, %v7862_v31  ;;  %v7866_v35 = vpop.eup %7865  ;;  %v9303_v33 = vsub.s32 1, %v9097_v21 }
 0x677   :  { %v7868_v36 = vpop.eup %7867 }
 0x678   :  { %1887 = vxpose.xlu1.b32.start [1/2] (short) (narrow) %v1885_v34, 8  ;;  %v1886_v10 = vmul.f32 %v7868_v36, %v7866_v35 }
 0x67c   :  { %1888 = vxpose.xlu1.b32.end [2/2] (short) (narrow) %v1886_v10, 8 }
 0x6e1   :  { %v7446_v39 = vpop.f32.mrf.mxu0 }
 0x6e2   :  { %v2245_v44 = vmul.f32 0.35355338, %v7446_v39 }
 0x6e3   :  { %v1992_v45 = vpop.f32.mrf.mxu0 }
 0x6e4   :  { %v2244_v23 = vmul.f32 0.35355338, %v1992_v45  ;;  %v2298_v18 = vsel %vm9248_vm10, %v2245_v44, -1e+30 }
 0x6e5   :  { %v2309_v20 = vsel %vm2305_vm9, %v2298_v18, -inf }
 0x6e6   :  { %v9244_v50 = vsel %vm9237_vm8, %v2244_v23, -1e+30 }
 0x6e7   :  { %v2306_v51 = vsel %vm2305_vm9, %v9244_v50, -inf }
 0x6e8   :  { %2307 = vmax.xlane.f32.xlu1 %v2306_v51 }
 0x6e9   :  { %v7451_v19 = vpop.f32.mrf.mxu1 }
 0x6ea   :  { %v2247_v37 = vmul.f32 0.35355338, %v7451_v19  ;;  %v1845_v34 = vpop.trf.xlu0 }
 0x6eb   :  { %v2073_v17 = vpop.f32.mrf.mxu1  ;;  %v2397_v36 = vrot.slane %v1845_v34, %v9298_v30  ;;  %v2408_v10 = vrot.slane %v1845_v34, %v9303_v33  ;;  %v2419_v41 = vrot.slane %v1845_v34, %v9278_v7  ;;  %v2430_v42 = vrot.slane %v1845_v34, %v9310_v38 }
 0x6ec   :  { %v2246_v40 = vmul.f32 0.35355338, %v2073_v17  ;;  %v9254_v43 = vsel %vm9248_vm10, %v2247_v37, -1e+30 }
 0x6ed   :  { %v2315_v47 = vsel %vm2305_vm9, %v9254_v43, -inf  ;;  %v7461_v55 = vpop.f32.mrf.mxu1 }
 0x6ee   :  { %2316 = vmax.xlane.f32.xlu1 %v2315_v47  ;;  %v9260_v56 = vsel %vm9237_vm8, %v2246_v40, -1e+30  ;;  %v2251_v22 = vmul.f32 0.35355338, %v7461_v55 }
 0x6ef   :  { %v2312_v60 = vsel %vm2305_vm9, %v9260_v56, -inf  ;;  %v2235_v61 = vpop.f32.mrf.mxu1 }
 0x6f0   :  { %v2250_v58 = vmul.f32 0.35355338, %v2235_v61  ;;  %v2304_v27 = vsel %vm9248_vm10, %v2251_v22, -1e+30 }
 0x6f1   :  { %v7456_v59 = vpop.f32.mrf.mxu0  ;;  %v2327_v29 = vsel %vm2305_vm9, %v2304_v27, -inf }
 0x6f2   :  { %2313 = vmax.xlane.f32.xlu1 %v2312_v60  ;;  %v9272_v2 = vsel %vm9237_vm8, %v2250_v58, -1e+30  ;;  %v2249_v15 = vmul.f32 0.35355338, %v7456_v59 }
 0x6f3   :  { %v2154_v62 = vpop.f32.mrf.mxu0  ;;  %v2324_v3 = vsel %vm2305_vm9, %v9272_v2, -inf }
 0x6f4   :  { %v2248_v63 = vmul.f32 0.35355338, %v2154_v62  ;;  %v9280_v8 = vpop.trf.xlu1  ;;  %v2302_v24 = vsel %vm9248_vm10, %v2249_v15, -1e+30 }
 0x6f5   :  { %v2471_v9 = vrot.slane %v9280_v8, %v9278_v7  ;;  %v2321_v26 = vsel %vm2305_vm9, %v2302_v24, -inf  ;;  %v2449_v31 = vrot.slane %v9280_v8, %v9298_v30  ;;  %v2460_v35 = vrot.slane %v9280_v8, %v9303_v33 }
 0x6f6   :  { %v9266_v0 = vsel %vm9237_vm8, %v2248_v63, -1e+30  ;;  %v2482_v39 = vrot.slane %v9280_v8, %v9310_v38 }
 0x6f7   :  { %v2318_v1 = vsel %vm2305_vm9, %v9266_v0, -inf }
 0x6f8   :  { %2319 = vmax.xlane.f32.xlu1 %v2318_v1 }
 0x6fc   :  { %2325 = vmax.xlane.f32.xlu1 %v2324_v3 }
 0x72f   :  { %1657 = vxpose.xlu1.b32.start [1/2] (short) (narrow) %v1449_v5, 32 }
 0x733   :  { %1658 = vxpose.xlu1.b32.end [2/2] (short) (narrow) %v1454_v6, 32 }
 0x759   :  { %2473 = vbcast.lane.b32.xlu1 %v2471_v9, 256 }
 0x771   :  { %v2308_v11 = vpop.xlane.xlu1 %2307 }
 0x772   :  { %v2330_v45 = vsub.f32 %v9244_v50, %v2308_v11 }
 0x774   :  { %v2338_v48 = vmul.f32 1.442695, %v2330_v45 }
 0x776   :  { %7869 = vpow2.f32 %v2338_v48 }
 0x777   :  { %v2317_v12 = vpop.xlane.xlu1 %2316 }
 0x778   :  { %v2333_v23 = vsub.f32 %v9254_v43, %v2317_v12 }
 0x77a   :  { %v2344_v49 = vmul.f32 1.442695, %v2333_v23 }
 0x77b   :  { %v2314_v57 = vpop.xlane.xlu1 %2313 }
 0x77c   :  { %7871 = vpow2.f32 %v2344_v49  ;;  %v2332_v40 = vsub.f32 %v9260_v56, %v2314_v57 }
 0x77e   :  { %v2342_v55 = vmul.f32 1.442695, %v2332_v40 }
 0x781   :  { %v9284_v13 = vpop.xlane.xlu1 %2319 }
 0x782   :  { %v2334_v59 = vsub.f32 %v9266_v0, %v9284_v13 }
 0x783   :  { %v9318_v51 = vpop.eup %7869 }
 0x784   :  { %v2354_v52 = vsel %vm2305_vm9, %v9318_v51, 0.0  ;;  %v2346_v63 = vmul.f32 1.442695, %v2334_v59 }
 0x785   :  { %v9286_v14 = vpop.xlane.xlu1 %2325 }
 0x786   :  { %v2336_v58 = vsub.f32 %v9272_v2, %v9286_v14 }
 0x788   :  { %v2350_v56 = vmul.f32 1.442695, %v2336_v58 }
 0x789   :  { %v9322_v19 = vpop.eup %7871 }
 0x78a   :  { %v2363_v37 = vsel %vm2305_vm9, %v9322_v19, 0.0 }
 0x7ab   :  { %v1673_v54 = vpop.trf.xlu1 }
 0x7ac   :  { %1689 = vxpose.xlu0.b32.start.end [1/1] (short) (narrow) %v1673_v54, 16 }
 0x7af   :  { %v1674_v34 = vpop.trf.xlu1 }
 0x7dd   :  { %2310 = vmax.xlane.f32.xlu0 %v2309_v20 }
 0x7e1   :  { %2322 = vmax.xlane.f32.xlu0 %v2321_v26 }
 0x7e5   :  { %2328 = vmax.xlane.f32.xlu0 %v2327_v29 }
 0x7fb   :  { %2455 = vbcast.lane.b32.xlu0 %v2449_v31, 264 }
 0x7ff   :  { %2451 = vbcast.lane.b32.xlu0 %v2449_v31, 256 }
 0x803   :  { %2466 = vbcast.lane.b32.xlu0 %v2460_v35, 264 }
 0x807   :  { %2399 = vbcast.lane.b32.xlu0 %v2397_v36, 256 }
 0x80b   :  { %2403 = vbcast.lane.b32.xlu0 %v2397_v36, 264  ;;  %v1675_v36 = vpop.trf.xlu1 }
 0x80f   :  { %2462 = vbcast.lane.b32.xlu0 %v2460_v35, 256 }
 0x813   :  { %2477 = vbcast.lane.b32.xlu0 %v2471_v9, 264 }
 0x817   :  { %2410 = vbcast.lane.b32.xlu0 %v2408_v10, 256 }
 0x81b   :  { %2414 = vbcast.lane.b32.xlu0 %v2408_v10, 264 }
 0x81f   :  { %2488 = vbcast.lane.b32.xlu0 %v2482_v39, 264 }
 0x823   :  { %2421 = vbcast.lane.b32.xlu0 %v2419_v41, 256 }
 0x827   :  { %2425 = vbcast.lane.b32.xlu0 %v2419_v41, 264 }
 0x828   :  { %v1705_v17 = vpop.trf.xlu0 }
 0x82b   :  { %2484 = vbcast.lane.b32.xlu0 %v2482_v39, 256  ;;  %v1676_v39 = vpop.trf.xlu1 }
 0x82c   :  { %v1706_v50 = vpop.trf.xlu0 }
 0x82f   :  { %2432 = vbcast.lane.b32.xlu0 %v2430_v42, 256 }
 0x833   :  { %2436 = vbcast.lane.b32.xlu0 %v2430_v42, 264 }
 0x852   :  { %2355 = vadd.xlane.f32.xlu0 %v2354_v52 }
 0x856   :  { %2364 = vadd.xlane.f32.xlu0 %v2363_v37  ;;  %v8647_v37 = vmov 1966171168  }
 0x866   :  { %v2311_v43 = vpop.xlane.xlu0 %2310 }
 0x867   :  { %v2331_v47 = vsub.f32 %v2298_v18, %v2311_v43 }
 0x869   :  { %v2340_v60 = vmul.f32 1.442695, %v2331_v47 }
 0x86a   :  { %v2323_v61 = vpop.xlane.xlu0 %2322 }
 0x86b   :  { %7873 = vpow2.f32 %v2340_v60  ;;  %v2335_v62 = vsub.f32 %v2302_v24, %v2323_v61 }
 0x86c   :  { %7875 = vpow2.f32 %v2342_v55 }
 0x86d   :  { %v2348_v1 = vmul.f32 1.442695, %v2335_v62 }
 0x86e   :  { %v2329_v3 = vpop.xlane.xlu0 %2328 }
 0x86f   :  { %7877 = vpow2.f32 %v2348_v1  ;;  %v2337_v4 = vsub.f32 %v2304_v27, %v2329_v3 }
 0x870   :  { %7879 = vpow2.f32 %v2346_v63 }
 0x871   :  { %v2352_v5 = vmul.f32 1.442695, %v2337_v4 }
 0x872   :  { %v2456_v6 = vpop.permute.xlu0 %2455 }
 0x873   :  { %7881 = vpow2.f32 %v2352_v5  ;;  %v2491_v9 = vmul.f32 %v2456_v6, %v1706_v50 }
 0x874   :  { %7883 = vpow2.f32 %v2350_v56 }
 0x875   :  { %7462 = vmatprep.subr.mxu0 %v2491_v9 }
 0x876   :  { %7463 = vmatpush3.msra.mxu0 %v2491_v9  ;;  %v2452_v0 = vpop.permute.xlu0 %2451  ;;  %v2474_v9 = vpop.permute.xlu1 %2473 }
 0x877   :  { %v2490_v11 = vmul.f32 %v2452_v0, %v1705_v17  ;;  %v2824_v17 = vunpack.c.l.s4 %v8647_v37 }
 0x878   :  { %v9331_v12 = vpop.eup %7873 }
 0x879   :  { %7464 = vmatprep.subr.mxu0 %v2490_v11  ;;  %v2357_v2 = vsel %vm2305_vm9, %v9331_v12, 0.0  ;;  %v9335_v57 = vpop.eup %7875  ;;  %v2825_v40 = vunpack.c.0.s8 %v2824_v17 }
 0x87a   :  { %2358 = vadd.xlane.f32.xlu1 %v2357_v2  ;;  %7465 = vmatpush3.msra.mxu0 %v2490_v11  ;;  %v2360_v14 = vsel %vm2305_vm9, %v9335_v57, 0.0  ;;  %v9355_v26 = vpop.permute.xlu0 %2466 }
 0x87b   :  { %v9374_v47 = vsub.s32 %v2825_v40, %v9097_v21 }
 0x87c   :  { %v9337_v13 = vpop.eup %7877 }
 0x87d   :  { %v2369_v54 = vsel %vm2305_vm9, %v9337_v13, 0.0  ;;  %v9343_v44 = vpop.eup %7879  ;;  %v2829_v55 = vrot.slane %v9280_v8, %v9374_v47 }
 0x87e   :  { %2361 = vadd.xlane.f32.xlu1 %v2360_v14  ;;  %2370 = vadd.xlane.f32.xlu0 %v2369_v54  ;;  %v2366_v18 = vsel %vm2305_vm9, %v9343_v44, 0.0  ;;  %v2400_v27 = vpop.permute.xlu0 %2399 }
 0x87f   :  { %v2837_v59 = vrot.slane %v2829_v55, %v9374_v47  ;;  %v2830_v60 = vcombine.high %v2829_v55, %v2829_v55 }
 0x880   :  { %v9345_v15 = vpop.eup %7881 }
 0x881   :  { %v2375_v20 = vsel %vm2305_vm9, %v9345_v15, 0.0  ;;  %v9351_v22 = vpop.eup %7883  ;;  %v2850_v58 = vrot.slane %v2837_v59, %v9298_v30  ;;  %v2844_v1 = vrot.slane %v2830_v60, %v9374_v47 }
 0x882   :  { %2367 = vadd.xlane.f32.xlu1 %v2366_v18  ;;  %2376 = vadd.xlane.f32.xlu0 %v2375_v20  ;;  %v2372_v24 = vsel %vm2305_vm9, %v9351_v22, 0.0  ;;  %v2404_v29 = vpop.permute.xlu0 %2403 }
 0x883   :  { %v2854_v5 = vrot.slane %v2844_v1, %v9298_v30 }
 0x886   :  { %2373 = vadd.xlane.f32.xlu1 %v2372_v24  ;;  %v9357_v31 = vpop.permute.xlu0 %2462 }
 0x88a   :  { %v9359_v35 = vpop.permute.xlu0 %2477 }
 0x88e   :  { %v9361_v10 = vpop.permute.xlu0 %2410 }
 0x892   :  { %v2415_v41 = vpop.permute.xlu0 %2414 }
 0x896   :  { %v9363_v42 = vpop.permute.xlu0 %2488 }
 0x89a   :  { %v9365_v45 = vpop.permute.xlu0 %2421 }
 0x89e   :  { %v2426_v48 = vpop.permute.xlu0 %2425 }
 0x8a2   :  { %v9367_v23 = vpop.permute.xlu0 %2484 }
 0x8a6   :  { %v9369_v49 = vpop.permute.xlu0 %2432 }
 0x8aa   :  { %v9371_v52 = vpop.permute.xlu0 %2436 }
 0x8af   :  { %1753 = vxpose.xlu0.b32.start.end [1/1] (short) (narrow) %v1675_v36, 16 }
 0x8b4   :  { %1785 = vxpose.xlu0.b32.start.end [1/1] (short) (narrow) %v1676_v39, 16 }
 0x8b9   :  { %1721 = vxpose.xlu1.b32.start.end [1/1] (short) (narrow) %v1674_v34, 16 }
 0x8db   :  { %v2356_v50 = vpop.xlane.xlu0 %2355 }
 0x8dc   :  { %7885 = vrcp.f32 %v2356_v50 }
 0x8df   :  { %v2365_v43 = vpop.xlane.xlu0 %2364 }
 0x8e0   :  { %7887 = vrcp.f32 %v2365_v43 }
 0x8e9   :  { %v7886_v61 = vpop.eup %7885 }
 0x8ea   :  { %v2379_v62 = vmul.f32 %v7886_v61, %v9318_v51  ;;  %v2846_v61 = vcombine.high %v2844_v1, %v2844_v1 }
 0x8ec   :  { %v2438_v63 = vmul.f32 %v2400_v27, %v2379_v62 }
 0x8ed   :  { %v7888_v3 = vpop.eup %7887 }
 0x8ee   :  { %7466 = vmatprep.mubr.msk.f32.mxu0 %vm2305_vm9, %v2438_v63  ;;  %v2867_v21 = vmul.f32 %v2850_v58, %v2438_v63  ;;  %v2385_v4 = vmul.f32 %v7888_v3, %v9322_v19 }
 0x8f0   :  { %v2875_v56 = vsel %vm2305_vm9, %v2867_v21, 0.0  ;;  %v9385_v8 = vmul.f32 %v2415_v41, %v2385_v4  ;;  %v2845_v41 = vcombine.high %v2837_v59, %v2837_v59 }
 0x8f1   :  { %2876 = vadd.xlane.f32.xlu0 %v2875_v56 }
 0x8f2   :  { %v2870_v51 = vmul.f32 %v2854_v5, %v9385_v8  ;;  %v2858_v60 = vrot.slane %v2845_v41, %v9298_v30 }
 0x8f4   :  { %v2884_v6 = vsel %vm2305_vm9, %v2870_v51, 0.0 }
 0x8f5   :  { %2885 = vadd.xlane.f32.xlu0 %v2884_v6 }
 0x903   :  { %v2359_v0 = vpop.xlane.xlu1 %2358 }
 0x904   :  { %7889 = vrcp.f32 %v2359_v0 }
 0x907   :  { %v2362_v11 = vpop.xlane.xlu1 %2361  ;;  %v2371_v2 = vpop.xlane.xlu0 %2370 }
 0x908   :  { %7891 = vrcp.f32 %v2362_v11 }
 0x909   :  { %7893 = vrcp.f32 %v2371_v2 }
 0x90b   :  { %v2368_v19 = vpop.xlane.xlu1 %2367  ;;  %v2377_v14 = vpop.xlane.xlu0 %2376 }
 0x90c   :  { %7895 = vrcp.f32 %v2368_v19 }
 0x90d   :  { %7897 = vrcp.f32 %v2377_v14 }
 0x90f   :  { %v2374_v54 = vpop.xlane.xlu1 %2373 }
 0x910   :  { %7899 = vrcp.f32 %v2374_v54 }
 0x911   :  { %v7890_v18 = vpop.eup %7889 }
 0x912   :  { %v2381_v20 = vmul.f32 %v7890_v18, %v9331_v12 }
 0x914   :  { %v2439_v24 = vmul.f32 %v2404_v29, %v2381_v20 }
 0x915   :  { %v7892_v27 = vpop.eup %7891 }
 0x916   :  { %v7894_v34 = vpop.eup %7893  ;;  %7467 = vmatmul.mubr.msk.f32.vlgmr.msra.gmra.mxu0 %vm2305_vm9, %v2439_v24  ;;  %v2868_v36 = vmul.f32 %v2850_v58, %v2439_v24  ;;  %v2383_v39 = vmul.f32 %v7892_v27, %v9335_v57 }
 0x917   :  { %v2389_v37 = vmul.f32 %v7894_v34, %v9337_v13 }
 0x918   :  { %v2878_v17 = vsel %vm2305_vm9, %v2868_v36, 0.0  ;;  %v2440_v50 = vmul.f32 %v9361_v10, %v2383_v39 }
 0x919   :  { %v7896_v40 = vpop.eup %7895  ;;  %2879 = vadd.xlane.f32.xlu1 %v2878_v17  ;;  %v2443_v43 = vmul.f32 %v2426_v48, %v2389_v37 }
 0x91a   :  { %v7898_v55 = vpop.eup %7897  ;;  %7473 = vmatprep.mubr.msk.f32.mxu1 %vm2305_vm9, %v2440_v50  ;;  %v2869_v12 = vmul.f32 %v2854_v5, %v2440_v50  ;;  %v2387_v29 = vmul.f32 %v7896_v40, %v9343_v44  ;;  %v2862_v44 = vrot.slane %v2846_v61, %v9298_v30 }
 0x91b   :  { %v2393_v57 = vmul.f32 %v7898_v55, %v9345_v15  ;;  %v2872_v62 = vmul.f32 %v2858_v60, %v2443_v43 }
 0x91c   :  { %v2881_v13 = vsel %vm2305_vm9, %v2869_v12, 0.0  ;;  %v2442_v59 = vmul.f32 %v9365_v45, %v2387_v29 }
 0x91d   :  { %v7900_v10 = vpop.eup %7899  ;;  %2882 = vadd.xlane.f32.xlu0 %v2881_v13  ;;  %v2445_v48 = vmul.f32 %v9371_v52, %v2393_v57  ;;  %v2890_v15 = vsel %vm2305_vm9, %v2872_v62, 0.0 }
 0x91e   :  { %7480 = vmatprep.mubr.msk.f32.mxu0 %vm2305_vm9, %v2442_v59  ;;  %v2871_v63 = vmul.f32 %v2858_v60, %v2442_v59  ;;  %v2391_v58 = vmul.f32 %v7900_v10, %v9351_v22  ;;  %v3278_v10 = vld [vmem:[%s10095_s13] sm:$0xf] }
 0x91f   :  { %v2874_v21 = vmul.f32 %v2862_v44, %v2445_v48 }
 0x920   :  { %v2887_v1 = vsel %vm2305_vm9, %v2871_v63, 0.0  ;;  %v2444_v3 = vmul.f32 %v9369_v49, %v2391_v58  ;;  %v3442_v63 = vld [vmem:[%s10096_s19 + $0x18] sm:$0xff] }
 0x921   :  { %2888 = vadd.xlane.f32.xlu1 %v2887_v1  ;;  %2891 = vadd.xlane.f32.xlu0 %v2890_v15  ;;  %v2896_v52 = vsel %vm2305_vm9, %v2874_v21, 0.0  ;;  %v3597_v1 = vld [vmem:[%s10097_s18 + $0x10] sm:$0xff]  ;;  %v3598_v15 = vld [vmem:[%s10097_s18 + $0x18] sm:$0xff]  ;;  %v3281_v21 = vld [vmem:[%s10098_s27 + $0x8] sm:$0xff] }
 0x922   :  { %v2873_v45 = vmul.f32 %v2862_v44, %v2444_v3  ;;  %v3595_v44 = vld [vmem:[%s10097_s18] sm:$0xff] }
 0x924   :  { %v2893_v4 = vsel %vm2305_vm9, %v2873_v45, 0.0  ;;  %v3283_v45 = vld [vmem:[%s10098_s27 + $0x18] sm:$0xff] }
 0x925   :  { %2894 = vadd.xlane.f32.xlu1 %v2893_v4  ;;  %2897 = vadd.xlane.f32.xlu0 %v2896_v52  ;;  %v3445_v4 = vld [vmem:[%s10099_s14 + $0x8] sm:$0xff]  ;;  %v3142_v52 = vld [vmem:[%s10100_s23 + $0x18] sm:$0xff] }
 0x92b   :  { %v1769_v56 = vpop.trf.xlu0 }
 0x92c   :  { %v2494_v51 = vmul.f32 %v2474_v9, %v1769_v56  ;;  %v3141_v56 = vld [vmem:[%s10100_s23 + $0x10] sm:$0xff] }
 0x92f   :  { %v1770_v22 = vpop.trf.xlu0 }
 0x930   :  { %v2495_v5 = vmul.f32 %v9359_v35, %v1770_v22  ;;  %v3447_v22 = vld [vmem:[%s10099_s14 + $0x18] sm:$0xff] }
 0x932   :  { %7476 = vmatprep.subr.mxu0 %v2495_v5 }
 0x933   :  { %7477 = vmatpush3.msra.mxu0 %v2495_v5  ;;  %v1801_v6 = vpop.trf.xlu0  ;;  %v3140_v5 = vld [vmem:[%s10100_s23 + $0x8] sm:$0xff] }
 0x934   :  { %7478 = vmatprep.subr.mxu0 %v2494_v51  ;;  %v2496_v35 = vmul.f32 %v9367_v23, %v1801_v6  ;;  %v3139_v6 = vld [vmem:[%s10100_s23] sm:$0xff] }
 0x935   :  { %v1737_v49 = vpop.trf.xlu1  ;;  %7479 = vmatpush3.msra.mxu0 %v2494_v51 }
 0x936   :  { %7481 = vmatmul.mubr.msk.f32.vlgmr.msra.gmra.mxu0 %vm2305_vm9, %v2443_v43  ;;  %v2492_v19 = vmul.f32 %v9357_v31, %v1737_v49  ;;  %7490 = vmatprep.subr.mxu0 %v3142_v52  ;;  %v3593_v49 = vld [vmem:[%s10101_s26 + $0x18] sm:$0xff] }
 0x937   :  { %v1802_v2 = vpop.trf.xlu0  ;;  %7491 = vmatpush3.msra.mxu0 %v3142_v52 }
 0x938   :  { %v2497_v14 = vmul.f32 %v9363_v42, %v1802_v2  ;;  %7492 = vmatprep.subr.mxu0 %v3141_v56 }
 0x939   :  { %v1738_v0 = vpop.trf.xlu1  ;;  %7493 = vmatpush3.msra.mxu0 %v3141_v56 }
 0x93a   :  { %v2493_v11 = vmul.f32 %v9355_v26, %v1738_v0  ;;  %7494 = vmatprep.subr.mxu0 %v3140_v5 }
 0x93b   :  { %7495 = vmatpush3.msra.mxu0 %v3140_v5 }
 0x93c   :  { %7469 = vmatprep.subr.mxu1 %v2493_v11  ;;  %7496 = vmatprep.subr.mxu0 %v3139_v6 }
 0x93d   :  { %7470 = vmatpush3.msra.mxu1 %v2493_v11  ;;  %7497 = vmatpush3.msra.mxu0 %v3139_v6 }
 0x93e   :  { %7471 = vmatprep.subr.mxu1 %v2492_v19  ;;  %7517 = vmatprep.subr.mxu0 %v3593_v49 }
 0x93f   :  { %7472 = vmatpush3.msra.mxu1 %v2492_v19 }
 0x940   :  { %7474 = vmatmul.mubr.msk.f32.vlgmr.msra.gmra.mxu1 %vm2305_vm9, %v9385_v8  ;;  %7483 = vmatprep.subr.mxu1 %v2497_v14 }
 0x941   :  { %7484 = vmatpush3.msra.mxu1 %v2497_v14  ;;  %7487 = vmatprep.mubr.msk.f32.mxu1 %vm2305_vm9, %v2444_v3  ;;  %v3280_v3 = vld [vmem:[%s10098_s27] sm:$0xff] }
 0x942   :  { %7485 = vmatprep.subr.mxu1 %v2496_v35 }
 0x943   :  { %7486 = vmatpush3.msra.mxu1 %v2496_v35  ;;  %v3441_v35 = vld [vmem:[%s10096_s19 + $0x10] sm:$0xff] }
 0x944   :  { %7488 = vmatmul.mubr.msk.f32.vlgmr.msra.gmra.mxu1 %vm2305_vm9, %v2445_v48  ;;  %7501 = vmatprep.subr.msk.mxu1 %vm3298_vm14, %v3278_v10 }
 0x945   :  { %7502 = vmatpush3.msk.msra.mxu1 %vm3298_vm14, %v3278_v10  ;;  %v7987_v10 = vld [vmem:[%s10078_s4 + $0x8] sm:$0xff] }
 0x946   :  { %7506 = vmatprep.subr.mxu1 %v3442_v63 }
 0x97a   :  { %v2877_v42 = vpop.xlane.xlu0 %2876 }
 0x97b   :  { %v3070_v29 = vrot.slane %v2877_v42, %v9145_v16  ;;  %v3439_v42 = vld [vmem:[%s10096_s19] sm:$0xff] }
 0x97e   :  { %v2886_v9 = vpop.xlane.xlu0 %2885 }
 0x97f   :  { %v3083_v41 = vrot.slane %v2886_v9, %v9152_v25  ;;  %v9464_v9 = vld [vmem:[%s10069_s1 + $0x8] sm:$0xff] }
 0x9a2   :  { %v2880_v18 = vpop.xlane.xlu1 %2879 }
 0x9a3   :  { %v3074_v43 = vrot.slane %v2880_v18, %v9152_v25  ;;  %v3282_v18 = vld [vmem:[%s10098_s27 + $0x10] sm:$0xff] }
 0x9a5   :  { %v3075_v13 = vsel %vm777_vm4, %v3074_v43, %v3070_v29 }
 0x9a6   :  { %v2883_v54 = vpop.xlane.xlu0 %2882 }
 0x9a7   :  { %v3079_v39 = vrot.slane %v2883_v54, %v9145_v16  ;;  %v3596_v54 = vld [vmem:[%s10097_s18 + $0x8] sm:$0xff] }
 0x9a9   :  { %v3084_v60 = vsel %vm777_vm4, %v3083_v41, %v3079_v39  ;;  %v3590_v39 = vld [vmem:[%s10101_s26] sm:$0xff]  ;;  %v9483_v41 = vld [vmem:[%s10102_s5 + $0x8] sm:$0xff] }
 0x9aa   :  { %v2889_v23 = vpop.xlane.xlu1 %2888  ;;  %v2892_v20 = vpop.xlane.xlu0 %2891  ;;  %v3103_v62 = vsel %vm793_vm11, %v3084_v60, %v3075_v13 }
 0x9ab   :  { %v3088_v37 = vrot.slane %v2889_v23, %v9145_v16  ;;  %v3092_v17 = vrot.slane %v2892_v20, %v9152_v25  ;;  %v3444_v23 = vld [vmem:[%s10099_s14] sm:$0xff]  ;;  %v3446_v20 = vld [vmem:[%s10099_s14 + $0x10] sm:$0xff] }
 0x9ad   :  { %v3093_v61 = vsel %vm777_vm4, %v3092_v17, %v3088_v37  ;;  %v9486_v37 = vld [vmem:[%s10102_s5 + $0x10] sm:$0xff]  ;;  %v9493_v17 = vld [vmem:[%s10102_s5 + $0x18] sm:$0xff] }
 0x9ae   :  { %v2895_v27 = vpop.xlane.xlu1 %2894  ;;  %v2898_v34 = vpop.xlane.xlu0 %2897  ;;  %v3104_v48 = vsel %vm794_vm12, %v3093_v61, %v3103_v62 }
 0x9af   :  { %v3097_v55 = vrot.slane %v2895_v27, %v9145_v16  ;;  %v3101_v12 = vrot.slane %v2898_v34, %v9152_v25  ;;  %v3592_v34 = vld [vmem:[%s10101_s26 + $0x10] sm:$0xff] }
 0x9b1   :  { %v3102_v59 = vsel %vm777_vm4, %v3101_v12, %v3097_v55 }
 0x9b2   :  { %v3105_v58 = vsel %vm796_vm13, %v3102_v59, %v3104_v48 }
 0x9d6   :  { %v7468_v26 = vpop.f32.mrf.mxu0 }
 0x9d8   :  { %v2570_v31 = vpop.f32.mrf.mxu0 }
 0x9d9   :  { %2899 = vxpose.xlu1.b32.start [1/2] (short) (narrow) %v2570_v31, 8  ;;  %v9458_v31 = vld [vmem:[%s10069_s1] sm:$0xff]  ;;  %s10103_s1 = sld [smem:[#allocation74_spill]] }
 0x9dd   :  { %2900 = vxpose.xlu1.b32.end [2/2] (short) (narrow) %v7468_v26, 8  ;;  %v3440_v26 = vld [vmem:[%s10096_s19 + $0x8] sm:$0xff] }
 0x9df   :  { %v7078_v29 = vld [vmem:[%s10103_s1] ss:$0 sm:$0xff] }
 0x9f6   :  { %v7482_v50 = vpop.f32.mrf.mxu0 }
 0x9f8   :  { %v2732_v57 = vpop.f32.mrf.mxu0 }
 0xa00   :  { %v7475_v24 = vpop.f32.mrf.mxu1 }
 0xa02   :  { %v2651_v8 = vpop.f32.mrf.mxu1 }
 0xa03   :  { %2931 = vxpose.xlu0.b32.start [1/2] (short) (narrow) %v2651_v8, 8  ;;  %v9474_v8 = vld [vmem:[%s10102_s5] sm:$0xff] }
 0xa04   :  { %v7489_v36 = vpop.f32.mrf.mxu1 }
 0xa06   :  { %v2813_v40 = vpop.f32.mrf.mxu1 }
 0xa07   :  { %2932 = vxpose.xlu0.b32.end [2/2] (short) (narrow) %v7475_v24, 8  ;;  %2995 = vxpose.xlu1.b32.start [1/2] (short) (narrow) %v2813_v40, 8 }
 0xa0b   :  { %2963 = vxpose.xlu0.b32.start [1/2] (short) (narrow) %v2732_v57, 8  ;;  %2996 = vxpose.xlu1.b32.end [2/2] (short) (narrow) %v7489_v36, 8  ;;  %v3591_v36 = vld [vmem:[%s10101_s26 + $0x8] sm:$0xff] }
 0xa0f   :  { %2964 = vxpose.xlu0.b32.end [2/2] (short) (narrow) %v7482_v50, 8  ;;  %3107 = vxpose.xlu1.b32.start.end [1/1] (short) (narrow) %v3105_v58, 16 }
 0xa31   :  { %3712 = vperm.xlu1 %7844, %v3595_v44  }
 0xa35   :  { %3718 = vperm.xlu1 %7844, %v3597_v1   ;;  %v7988_v1 = vld [vmem:[%s10078_s4] sm:$0xff]  ;;  %s10113_s4 = sld [smem:[#allocation100_spill]] }
 0xa39   :  { %3721 = vperm.xlu1 %7844, %v3598_v15  }
 0xa3d   :  { %3384 = vperm.xlu1 %7844, %v3280_v3  }
 0xa41   :  { %3387 = vperm.xlu1 %7844, %v3281_v21  }
 0xa45   :  { %3393 = vperm.xlu1 %7844, %v3283_v45   ;;  %v7092_v45 = vld [vmem:[#allocation21] ss:$0 sm:$0xff] }
 0xa49   :  { %3540 = vperm.xlu1 %7844, %v3445_v4  }
 0xa4d   :  { %3546 = vperm.xlu1 %7844, %v3447_v22  }
 0xa55   :  { %v2915_v51 = vpop.trf.xlu1 }
 0xa56   :  { %3027 = vxpose.xlu0.b32.start [1/4] (short) (narrow) %v2915_v51, 16 }
 0xa7f   :  { %v2947_v0 = vpop.trf.xlu0 }
 0xa80   :  { %3028 = vxpose.xlu0.b32.cont [2/4] (short) (narrow) %v2947_v0, 16 }
 0xa83   :  { %v3011_v11 = vpop.trf.xlu1 }
 0xa87   :  { %v2979_v2 = vpop.trf.xlu0 }
 0xa88   :  { %3029 = vxpose.xlu0.b32.cont [3/4] (short) (narrow) %v2979_v2, 16 }
 0xa8b   :  { %v3123_v19 = vpop.trf.xlu1 }
 0xa8c   :  { %3030 = vxpose.xlu0.b32.end [4/4] (short) (narrow) %v3011_v11, 16  ;;  %7503 = vmatprep.mubr.msk.f32.mxu1 %vm3291_vm15, %v3123_v19 }
 0xa8f   :  { %v3124_v14 = vpop.trf.xlu1 }
 0xa90   :  { %7504 = vmatmul.mubr.msk.f32.vlgmr.msra.gmra.mxu1 %vm3291_vm15, %v3124_v14 }
 0xa91   :  { %7507 = vmatpush3.msra.mxu1 %v3442_v63  ;;  %7514 = vmatprep.mubr.msk.f32.mxu1 %vm661_vm0, %v9458_v31 }
 0xa92   :  { %7508 = vmatprep.subr.mxu1 %v3441_v35 }
 0xa93   :  { %7509 = vmatpush3.msra.mxu1 %v3441_v35  ;;  %v7083_v35 = vld [vmem:[%s10104_s8] ss:$0 sm:$0xff] }
 0xa94   :  { %7510 = vmatprep.subr.mxu1 %v3440_v26 }
 0xa95   :  { %7511 = vmatpush3.msra.mxu1 %v3440_v26 }
 0xa96   :  { %7512 = vmatprep.subr.mxu1 %v3439_v42 }
 0xa97   :  { %7513 = vmatpush3.msra.mxu1 %v3439_v42 }
 0xa98   :  { %7515 = vmatmul.mubr.msk.f32.vlgmr.msra.gmra.mxu1 %vm661_vm0, %v9464_v9 }
 0xaac   :  { %v3713_v50 = vpop.permute.xlu1 %3712 }
 0xaad   :  { %v3726_v21 = vrot.slane %v3713_v50, %v9145_v16 }
 0xab0   :  { %v3719_v40 = vpop.permute.xlu1 %3718 }
 0xab1   :  { %v3735_v51 = vrot.slane %v3719_v40, %v9155_v28 }
 0xab4   :  { %v3722_v43 = vpop.permute.xlu1 %3721 }
 0xab5   :  { %3715 = vperm.xlu0 %7843, %v3596_v54   ;;  %v3740_v42 = vrot.slane %v3722_v43, %v9161_v32 }
 0xab8   :  { %v3385_v55 = vpop.permute.xlu1 %3384 }
 0xab9   :  { %3390 = vperm.xlu0 %7843, %v3282_v18   ;;  %v3398_v54 = vrot.slane %v3385_v55, %v9145_v16 }
 0xabc   :  { %v3388_v60 = vpop.permute.xlu1 %3387 }
 0xabd   :  { %3537 = vperm.xlu0 %7843, %v3444_v23   ;;  %v3402_v0 = vrot.slane %v3388_v60, %v9152_v25  ;;  %v7088_v60 = vld [vmem:[#allocation20] ss:$0 sm:$0xff] }
 0xac0   :  { %v3394_v44 = vpop.permute.xlu1 %3393 }
 0xac1   :  { %3543 = vperm.xlu0 %7843, %v3446_v20   ;;  %v3412_v50 = vrot.slane %v3394_v44, %v9161_v32 }
 0xac4   :  { %v3541_v2 = vpop.permute.xlu1 %3540 }
 0xac5   :  { %v3555_v40 = vrot.slane %v3541_v2, %v9152_v25 }
 0xafc   :  { %v3043_v24 = vpop.trf.xlu0 }
 0xafd   :  { %7498 = vmatprep.mubr.msk.f32.mxu0 %vm661_vm0, %v3043_v24 }
 0xb00   :  { %v3044_v27 = vpop.trf.xlu0 }
 0xb01   :  { %7499 = vmatmul.mubr.msk.f32.vlgmr.msra.gmra.mxu0 %vm661_vm0, %v3044_v27 }
 0xb02   :  { %7518 = vmatpush3.msra.mxu0 %v3593_v49  ;;  %7525 = vmatprep.mubr.msk.f32.mxu0 %vm661_vm0, %v9474_v8 }
 0xb03   :  { %7519 = vmatprep.subr.mxu0 %v3592_v34 }
 0xb04   :  { %7520 = vmatpush3.msra.mxu0 %v3592_v34 }
 0xb05   :  { %7521 = vmatprep.subr.mxu0 %v3591_v36 }
 0xb06   :  { %7522 = vmatpush3.msra.mxu0 %v3591_v36 }
 0xb07   :  { %7523 = vmatprep.subr.mxu0 %v3590_v39 }
 0xb08   :  { %7524 = vmatpush3.msra.mxu0 %v3590_v39  ;;  %v3403_v39 = vsel %vm777_vm4, %v3402_v0, %v3398_v54 }
 0xb09   :  { %7526 = vmatmul.mubr.msk.f32.vlgmr.msra.gmra.mxu0 %vm661_vm0, %v9483_v41 }
 0xb0a   :  { %7528 = vmatprep.mubr.msk.f32.mxu0 %vm661_vm0, %v9486_v37 }
 0xb0d   :  { %7529 = vmatmul.mubr.msk.f32.gmra.mxu0 %vm661_vm0, %v9493_v17 }
 0xb30   :  { %v3716_v12 = vpop.permute.xlu0 %3715 }
 0xb31   :  { %v3730_v58 = vrot.slane %v3716_v12, %v9152_v25 }
 0xb33   :  { %v3731_v22 = vsel %vm777_vm4, %v3730_v58, %v3726_v21  ;;  %v3547_v21 = vpop.permute.xlu1 %3546 }
 0xb34   :  { %v3391_v57 = vpop.permute.xlu0 %3390  ;;  %v3736_v19 = vsel %vm784_vm5, %v3735_v51, %v3731_v22  ;;  %v3565_v2 = vrot.slane %v3547_v21, %v9161_v32  ;;  %v647_v21 = vld [vmem:[%s10105_s0 + $0x8] sm:$0xff] }
 0xb35   :  { %v3407_v14 = vrot.slane %v3391_v57, %v9155_v28  ;;  %v3741_v12 = vsel %vm791_vm6, %v3740_v42, %v3736_v19 }
 0xb37   :  { %v3408_v55 = vsel %vm784_vm5, %v3407_v14, %v3403_v39 }
 0xb38   :  { %v3538_v4 = vpop.permute.xlu0 %3537 }
 0xb39   :  { %v3551_v43 = vrot.slane %v3538_v4, %v9145_v16  ;;  %v3413_v4 = vsel %vm791_vm6, %v3412_v50, %v3408_v55 }
 0xb3c   :  { %v3544_v20 = vpop.permute.xlu0 %3543 }
 0xb50   :  { %v7505_v62 = vpop.f32.mrf.mxu1 }
 0xb52   :  { %v3368_v52 = vpop.f32.mrf.mxu1 }
 0xb53   :  { %v3369_v18 = vadd.f32 %v7083_v35, %v3368_v52  ;;  %v3556_v52 = vsel %vm777_vm4, %v3555_v40, %v3551_v43 }
 0xb58   :  { %v7516_v6 = vpop.f32.mrf.mxu1 }
 0xb5a   :  { %v3521_v24 = vpop.f32.mrf.mxu1 }
 0xbc1   :  { %v7500_v61 = vpop.f32.mrf.mxu0 }
 0xbc2   :  { %v3228_v13 = vadd.f32 %v7500_v61, %v7078_v29 }
 0xbc3   :  { %v3222_v59 = vpop.f32.mrf.mxu0 }
 0xbc4   :  { %v9499_v48 = vadd.f32 %v7987_v10, %v3228_v13  ;;  %v3223_v63 = vadd.f32 %v7078_v29, %v3222_v59  ;;  %v3560_v13 = vrot.slane %v3544_v20, %v9155_v28  ;;  %v3374_v59 = vadd.f32 %v7505_v62, %v7083_v35 }
 0xbc5   :  { %v3377_v10 = vmax.f32 %v3369_v18, 0.0 }
 0xbc6   :  { %v9503_v15 = vadd.f32 %v7988_v1, %v3223_v63  ;;  %v3238_v3 = vsel %vm661_vm0, %v9499_v48, 0.0  ;;  %v3522_v63 = vadd.f32 %v7088_v60, %v3521_v24  ;;  %v3378_v22 = vmax.f32 %v3374_v59, 0.0  ;;  %v646_v59 = vld [vmem:[%s10105_s0] sm:$0xff] }
 0xbc7   :  { %3239 = vadd.xlane.f32.xlu1 %v3238_v3  ;;  %v3561_v51 = vsel %vm784_vm5, %v3560_v13, %v3556_v52  ;;  %v7091_v52 = vld [vmem:[#allocation5] ss:$0 sm:$0xff] }
 0xbc8   :  { %v3235_v56 = vsel %vm661_vm0, %v9503_v15, 0.0  ;;  %v3530_v62 = vmax.f32 %v3522_v63, 0.0  ;;  %v3422_v19 = vmul.f32 %v3413_v4, %v3378_v22  ;;  %v3566_v14 = vsel %vm791_vm6, %v3565_v2, %v3561_v51 }
 0xbc9   :  { %v7527_v5 = vpop.f32.mrf.mxu0  ;;  %3236 = vadd.xlane.f32.xlu0 %v3235_v56 }
 0xbca   :  { %v3690_v49 = vadd.f32 %v7527_v5, %v7092_v45  ;;  %v3421_v5 = vmul.f32 %v3413_v4, %v3377_v10  ;;  %v3426_v18 = vsel %vm661_vm0, %v3422_v19, 0.0  ;;  %v7087_v10 = vld [vmem:[#allocation4] ss:$0 sm:$0xff]  ;;  %v649_v19 = vld [vmem:[%s10105_s0 + $0x18] sm:$0xff] }
 0xbcb   :  { %v3684_v11 = vpop.f32.mrf.mxu0 }
 0xbcc   :  { %v3685_v26 = vadd.f32 %v7092_v45, %v3684_v11  ;;  %v3704_v27 = vmax.f32 %v3690_v49, 0.0 }
 0xbcd   :  { %v7530_v23 = vpop.f32.mrf.mxu0 }
 0xbce   :  { %v3703_v34 = vmax.f32 %v3685_v26, 0.0  ;;  %v3700_v36 = vadd.f32 %v7530_v23, %v7092_v45  ;;  %v3750_v58 = vmul.f32 %v3741_v12, %v3704_v27  ;;  %v3574_v26 = vmul.f32 %v3566_v14, %v3530_v62  ;;  %v3906_v62 = vld [vmem:[%s10106_s25 + $0x8] sm:$0xff] }
 0xbcf   :  { %v3694_v29 = vpop.f32.mrf.mxu0 }
 0xbd0   :  { %v3749_v61 = vmul.f32 %v3741_v12, %v3703_v34  ;;  %v3695_v57 = vadd.f32 %v7092_v45, %v3694_v29  ;;  %v3706_v1 = vmax.f32 %v3700_v36, 0.0  ;;  %v3527_v45 = vadd.f32 %v7516_v6, %v7088_v60 }
 0xbd1   :  { %v3756_v11 = vsel %vm661_vm0, %v3750_v58, 0.0  ;;  %v3423_v6 = vsel %vm661_vm0, %v3421_v5, 0.0  ;;  %v3576_v23 = vsel %vm661_vm0, %v3574_v26, 0.0  ;;  %v3907_v5 = vld [vmem:[%s10106_s25 + $0x10] sm:$0xff] }
 0xbd2   :  { %v3705_v44 = vmax.f32 %v3695_v57, 0.0  ;;  %v3753_v3 = vsel %vm661_vm0, %v3749_v61, 0.0  ;;  %v3752_v49 = vmul.f32 %v3741_v12, %v3706_v1  ;;  %v3531_v35 = vmax.f32 %v3527_v45, 0.0  ;;  %v3908_v1 = vld [vmem:[%s10106_s25 + $0x18] sm:$0xff] }
 0xbd3   :  { %3754 = vadd.xlane.f32.xlu0 %v3753_v3  ;;  %7542 = vmatprep.subr.mxu0 %v3908_v1 }
 0xbd4   :  { %v3751_v56 = vmul.f32 %v3741_v12, %v3705_v44  ;;  %v3762_v42 = vsel %vm661_vm0, %v3752_v49, 0.0  ;;  %v3575_v54 = vmul.f32 %v3566_v14, %v3531_v35  ;;  %7543 = vmatpush3.msra.mxu0 %v3908_v1  ;;  %v3905_v35 = vld [vmem:[%s10106_s25] sm:$0xff] }
 0xbd5   :  { %7544 = vmatprep.subr.mxu0 %v3907_v5 }
 0xbd6   :  { %v3759_v0 = vsel %vm661_vm0, %v3751_v56, 0.0  ;;  %v3579_v20 = vsel %vm661_vm0, %v3575_v54, 0.0  ;;  %v648_v56 = vld [vmem:[%s10105_s0 + $0x10] sm:$0xff]  ;;  %7545 = vmatpush3.msra.mxu0 %v3907_v5 }
 0xbd7   :  { %3760 = vadd.xlane.f32.xlu1 %v3759_v0  ;;  %3757 = vadd.xlane.f32.xlu0 %v3756_v11  ;;  %v7989_v11 = vld [vmem:[%s10072_s17] sm:$0xff] }
 0xbd8   :  { %7546 = vmatprep.subr.mxu0 %v3906_v62 }
 0xbd9   :  { %7547 = vmatpush3.msra.mxu0 %v3906_v62  ;;  %v7110_v62 = vld [vmem:[#allocation32] ss:$0 sm:$0xff] }
 0xbda   :  { %7548 = vmatprep.subr.mxu0 %v3905_v35 }
 0xbdb   :  { %3763 = vadd.xlane.f32.xlu0 %v3762_v42  ;;  %3424 = vadd.xlane.f32.xlu1 %v3423_v6 }
 0xbdc   :  { %7549 = vmatpush3.msra.mxu0 %v3905_v35  ;;  %v4214_v35 = vld [vmem:[%s10108_s30 + $0x8] sm:$0xff] }
 0xbdf   :  { %3427 = vadd.xlane.f32.xlu0 %v3426_v18  ;;  %3577 = vadd.xlane.f32.xlu1 %v3576_v23  ;;  %v3782_v18 = vld [vmem:[%s10107_s29 + $0x18] sm:$0xff]  ;;  %v7990_v23 = vld [vmem:[%s10072_s17 + $0x8] sm:$0xff]  ;;  %s10110_s17 = sld [smem:[#allocation66_spill]] }
 0xbe0   :  { %7531 = vmatprep.subr.mxu1 %v3782_v18 }
 0xbe1   :  { %7532 = vmatpush3.msra.mxu1 %v3782_v18 }
 0xbe3   :  { %3580 = vadd.xlane.f32.xlu0 %v3579_v20 }
 0xc50   :  { %v3240_v24 = vpop.xlane.xlu1 %3239 }
 0xc51   :  { %v3243_v27 = vmul.f32 0.03125, %v3240_v24  ;;  %v3781_v24 = vld [vmem:[%s10107_s29 + $0x10] sm:$0xff] }
 0xc52   :  { %v3237_v34 = vpop.xlane.xlu0 %3236  ;;  %7533 = vmatprep.subr.mxu1 %v3781_v24 }
 0xc53   :  { %v9539_v36 = vsub.f32 %v9499_v48, %v3243_v27  ;;  %v3242_v39 = vmul.f32 0.03125, %v3237_v34  ;;  %7534 = vmatpush3.msra.mxu1 %v3781_v24  ;;  %v3780_v34 = vld [vmem:[%s10107_s29 + $0x8] sm:$0xff]  ;;  %v4213_v24 = vld [vmem:[%s10108_s30] sm:$0xff] }
 0xc54   :  { %7535 = vmatprep.subr.mxu1 %v3780_v34 }
 0xc55   :  { %v9542_v50 = vsub.f32 %v9503_v15, %v3242_v39  ;;  %v3247_v40 = vmul.f32 %v9539_v36, %v9539_v36  ;;  %v7097_v15 = vld [vmem:[#allocation6] ss:$0 sm:$0xff]  ;;  %7536 = vmatpush3.msra.mxu1 %v3780_v34 }
 0xc56   :  { %v3779_v39 = vld [vmem:[%s10107_s29] sm:$0xff] }
 0xc57   :  { %v3251_v12 = vsel %vm661_vm0, %v3247_v40, 0.0  ;;  %v3246_v29 = vmul.f32 %v9542_v50, %v9542_v50  ;;  %v4216_v40 = vld [vmem:[%s10108_s30 + $0x18] sm:$0xff]  ;;  %7537 = vmatprep.subr.mxu1 %v3779_v39 }
 0xc58   :  { %3252 = vadd.xlane.f32.xlu0 %v3251_v12  ;;  %7570 = vmatprep.subr.mxu0 %v4216_v40  ;;  %v9572_v12 = vld [vmem:[%s10109_s21 + $0x18] sm:$0xff] }
 0xc59   :  { %v3248_v43 = vsel %vm661_vm0, %v3246_v29, 0.0  ;;  %7538 = vmatpush3.msra.mxu1 %v3779_v39  ;;  %v7081_v39 = vld [vmem:[#allocation9] ss:$0 sm:$0xff] }
 0xc5a   :  { %3249 = vadd.xlane.f32.xlu1 %v3248_v43  ;;  %7556 = vmatprep.subr.mxu1 %v9572_v12 }
 0xc5c   :  { %v3755_v48 = vpop.xlane.xlu0 %3754 }
 0xc5d   :  { %v3771_v13 = vadd.f32 %v7097_v15, %v3755_v48 }
 0xc5f   :  { %v3899_v44 = vadd.f32 %v3771_v13, %v646_v59 }
 0xc60   :  { %v3761_v55 = vpop.xlane.xlu1 %3760  ;;  %v3758_v60 = vpop.xlane.xlu0 %3757 }
 0xc61   :  { %v3772_v63 = vadd.f32 %v7097_v15, %v3758_v60  ;;  %v3773_v3 = vadd.f32 %v7097_v15, %v3761_v55 }
 0xc63   :  { %v3900_v45 = vadd.f32 %v3772_v63, %v647_v21  ;;  %v3901_v49 = vadd.f32 %v3773_v3, %v648_v56 }
 0xc64   :  { %v3425_v61 = vpop.xlane.xlu1 %3424  ;;  %v3764_v57 = vpop.xlane.xlu0 %3763 }
 0xc65   :  { %v3435_v22 = vadd.f32 %v7087_v10, %v3425_v61  ;;  %v3774_v0 = vadd.f32 %v7097_v15, %v3764_v57  ;;  %v7103_v15 = vld [vmem:[#allocation27] ss:$0 sm:$0xff]  ;;  %v7104_v57 = vld [vmem:[#allocation29] ss:$0 sm:$0xff] }
 0xc67   :  { %v9557_v2 = vadd.f32 %v7989_v11, %v3435_v22  ;;  %v3902_v6 = vadd.f32 %v3774_v0, %v649_v19 }
 0xc68   :  { %v3428_v58 = vpop.xlane.xlu0 %3427  ;;  %v3578_v4 = vpop.xlane.xlu1 %3577 }
 0xc69   :  { %v3588_v51 = vadd.f32 %v7091_v52, %v3578_v4  ;;  %v3436_v26 = vadd.f32 %v7087_v10, %v3428_v58 }
 0xc6b   :  { %3912 = vperm.xlu1 %7844, %v3899_v44   ;;  %v3775_v42 = vadd.f32 %v3588_v51, %v9557_v2  ;;  %v9564_v20 = vadd.f32 %v7990_v23, %v3436_v26  ;;  %v7098_v44 = vld [vmem:[#allocation23] ss:$0 sm:$0xff] }
 0xc6c   :  { %v3581_v14 = vpop.xlane.xlu0 %3580 }
 0xc6d   :  { %v3589_v54 = vadd.f32 %v7091_v52, %v3581_v14 }
 0xc6e   :  { %3917 = vperm.xlu0 %7843, %v3900_v45  }
 0xc6f   :  { %3922 = vperm.xlu1 %7844, %v3901_v49   ;;  %v3776_v27 = vadd.f32 %v3589_v54, %v9564_v20  ;;  %v4215_v49 = vld [vmem:[%s10108_s30 + $0x10] sm:$0xff] }
 0xc72   :  { %3786 = vperm.xlu0 %7843, %v3775_v42   ;;  %v7111_v42 = vld [vmem:[#allocation33] ss:$0 sm:$0xff] }
 0xc73   :  { %3927 = vperm.xlu1 %7844, %v3902_v6  }
 0xc76   :  { %4066 = vperm.xlu0 %7843, %v646_v59  }
 0xc77   :  { %3791 = vperm.xlu1 %7844, %v3776_v27  }
 0xc7a   :  { %4076 = vperm.xlu0 %7843, %v648_v56   ;;  %v7099_v56 = vld [vmem:[#allocation24] ss:$0 sm:$0xff] }
 0xc7b   :  { %4071 = vperm.xlu1 %7844, %v647_v21  }
 0xc7f   :  { %4081 = vperm.xlu1 %7844, %v649_v19  }
 0xce1   :  { %v3253_v29 = vpop.xlane.xlu0 %3252 }
 0xce2   :  { %v3255_v43 = vmul.f32 0.03125, %v3253_v29 }
 0xce3   :  { %v3250_v48 = vpop.xlane.xlu1 %3249 }
 0xce4   :  { %v3257_v55 = vadd.f32 1e-05, %v3255_v43  ;;  %v3254_v60 = vmul.f32 0.03125, %v3250_v48 }
 0xce6   :  { %7901 = vrsqrt.f32 %v3257_v55  ;;  %v3256_v61 = vadd.f32 1e-05, %v3254_v60  ;;  %v7082_v60 = vld [vmem:[#allocation12] ss:$0 sm:$0xff] }
 0xce7   :  { %v3913_v13 = vpop.permute.xlu1 %3912 }
 0xce8   :  { %7903 = vrsqrt.f32 %v3256_v61  ;;  %v3936_v59 = vmul.f32 %v7103_v15, %v3913_v13 }
 0xce9   :  { %v3918_v10 = vpop.permute.xlu0 %3917 }
 0xcea   :  { %v3946_v63 = vadd.f32 %v7104_v57, %v3936_v59  ;;  %v3937_v58 = vmul.f32 %v7103_v15, %v3918_v10 }
 0xceb   :  { %v3923_v1 = vpop.permute.xlu1 %3922 }
 0xcec   :  { %v3950_v3 = vmax.f32 %v3946_v63, 0.0  ;;  %v3947_v21 = vadd.f32 %v7104_v57, %v3937_v58  ;;  %v3938_v52 = vmul.f32 %v7103_v15, %v3923_v1  ;;  %v4061_v58 = vld [vmem:[%s10109_s21 + $0x10] sm:$0xff] }
 0xced   :  { %v3787_v4 = vpop.permute.xlu0 %3786 }
 0xcee   :  { %v3951_v22 = vmax.f32 %v3947_v21, 0.0  ;;  %v3948_v5 = vadd.f32 %v7104_v57, %v3938_v52  ;;  %7550 = vmatprep.mubr.msk.f32.mxu0 %vm661_vm0, %v3950_v3  ;;  %v3800_v45 = vmul.f32 %v7098_v44, %v3787_v4  ;;  %v4060_v3 = vld [vmem:[%s10109_s21 + $0x8] sm:$0xff] }
 0xcef   :  { %v3928_v51 = vpop.permute.xlu1 %3927 }
 0xcf0   :  { %v3952_v0 = vmax.f32 %v3948_v5, 0.0  ;;  %v3939_v11 = vmul.f32 %v7103_v15, %v3928_v51  ;;  %7551 = vmatmul.mubr.msk.f32.vlgmr.msra.gmra.mxu0 %vm661_vm0, %v3951_v22  ;;  %v3808_v19 = vadd.f32 %v7099_v56, %v3800_v45  ;;  %v4059_v5 = vld [vmem:[%s10109_s21] sm:$0xff]  ;;  %v4312_v45 = vld [vmem:[%s10111_s12 + $0x18] sm:$0xff] }
 0xcf1   :  { %v4067_v14 = vpop.permute.xlu0 %4066  ;;  %7571 = vmatpush3.msra.mxu0 %v4216_v40 }
 0xcf2   :  { %v3949_v26 = vadd.f32 %v7104_v57, %v3939_v11  ;;  %v4090_v6 = vmul.f32 %v7110_v62, %v4067_v14  ;;  %7553 = vmatprep.mubr.msk.f32.mxu0 %vm661_vm0, %v3952_v0  ;;  %v3810_v54 = vmax.f32 %v3808_v19, 0.0  ;;  %7572 = vmatprep.subr.mxu0 %v4215_v49  ;;  %v9608_v0 = vld [vmem:[%s10110_s17 + $0x8] sm:$0xff]  ;;  %v9613_v19 = vld [vmem:[%s10110_s17 + $0x10] sm:$0xff] }
 0xcf3   :  { %v7902_v18 = vpop.eup %7901  ;;  %v3792_v23 = vpop.permute.xlu1 %3791  ;;  %7573 = vmatpush3.msra.mxu0 %v4215_v49  ;;  %v4310_v11 = vld [vmem:[%s10111_s12 + $0x8] sm:$0xff] }
 0xcf4   :  { %v3953_v27 = vmax.f32 %v3949_v26, 0.0  ;;  %v3801_v34 = vmul.f32 %v7098_v44, %v3792_v23  ;;  %7539 = vmatprep.mubr.msk.f32.mxu1 %vm661_vm0, %v3810_v54  ;;  %7574 = vmatprep.subr.mxu0 %v4214_v35  ;;  %v3261_v40 = vmul.f32 %v7902_v18, %v9539_v36  ;;  %v4100_v43 = vadd.f32 %v7111_v42, %v4090_v6 }
 0xcf5   :  { %v7904_v29 = vpop.eup %7903  ;;  %7575 = vmatpush3.msra.mxu0 %v4214_v35  ;;  %v4077_v55 = vpop.permute.xlu0 %4076  ;;  %v4309_v35 = vld [vmem:[%s10111_s12] sm:$0xff]  ;;  %v4306_v26 = vadd.f32 %v9483_v41, %v9608_v0 }
 0xcf6   :  { %v3809_v48 = vadd.f32 %v7099_v56, %v3801_v34  ;;  %7554 = vmatmul.mubr.msk.f32.gmra.mxu0 %vm661_vm0, %v3953_v27  ;;  %7576 = vmatprep.subr.mxu0 %v4213_v24  ;;  %v3260_v15 = vmul.f32 %v7904_v29, %v9542_v50  ;;  %v3269_v57 = vmul.f32 %v7081_v39, %v3261_v40  ;;  %v4104_v36 = vmax.f32 %v4100_v43, 0.0  ;;  %v7117_v43 = vld [vmem:[#allocation14] ss:$0 sm:$0xff] }
 0xcf7   :  { %v4072_v61 = vpop.permute.xlu1 %4071  ;;  %7577 = vmatpush3.msra.mxu0 %v4213_v24  ;;  %v4092_v63 = vmul.f32 %v7110_v62, %v4077_v55 }
 0xcf8   :  { %v3811_v13 = vmax.f32 %v3809_v48, 0.0  ;;  %v4091_v59 = vmul.f32 %v7110_v62, %v4072_v61  ;;  %v3268_v10 = vmul.f32 %v7081_v39, %v3260_v15  ;;  %v9586_v1 = vadd.f32 %v7082_v60, %v3269_v57 }
 0xcf9   :  { %v4102_v56 = vadd.f32 %v7111_v42, %v4092_v63 }
 0xcfa   :  { %7540 = vmatmul.mubr.msk.f32.vlgmr.msra.gmra.mxu1 %vm661_vm0, %v3811_v13  ;;  %v9589_v44 = vadd.f32 %v7082_v60, %v3268_v10  ;;  %v4101_v21 = vadd.f32 %v7111_v42, %v4091_v59  ;;  %v4212_v22 = vadd.f32 %v9464_v9, %v9586_v1  ;;  %v4311_v9 = vld [vmem:[%s10111_s12 + $0x10] sm:$0xff] }
 0xcfb   :  { %7557 = vmatpush3.msra.mxu1 %v9572_v12  ;;  %v4082_v50 = vpop.permute.xlu1 %4081  ;;  %7564 = vmatprep.mubr.msk.f32.mxu1 %vm661_vm0, %v4104_v36  ;;  %v638_v12 = vld [vmem:[%s10110_s17] sm:$0xff] }
 0xcfc   :  { %v4093_v52 = vmul.f32 %v7110_v62, %v4082_v50  ;;  %7558 = vmatprep.subr.mxu1 %v4061_v58  ;;  %v4211_v4 = vadd.f32 %v9458_v31, %v9589_v44  ;;  %v4105_v51 = vmax.f32 %v4101_v21, 0.0  ;;  %v4106_v62 = vmax.f32 %v4102_v56, 0.0 }
 0xcfd   :  { %7559 = vmatpush3.msra.mxu1 %v4061_v58  ;;  %v4305_v49 = vadd.f32 %v9474_v8, %v638_v12  ;;  %v4307_v8 = vadd.f32 %v9486_v37, %v9613_v19  ;;  %v7105_v37 = vld [vmem:[#allocation30] ss:$0 sm:$0xff] }
 0xcfe   :  { %7560 = vmatprep.subr.mxu1 %v4060_v3  ;;  %7578 = vmatprep.mubr.msk.f32.mxu0 %vm661_vm0, %v4211_v4  ;;  %v4103_v31 = vadd.f32 %v7111_v42, %v4093_v52  ;;  %v9622_v42 = vld [vmem:[%s10110_s17 + $0x18] sm:$0xff] }
 0xcff   :  { %7561 = vmatpush3.msra.mxu1 %v4060_v3  ;;  %7579 = vmatmul.mubr.msk.f32.vlgmr.msra.gmra.mxu0 %vm661_vm0, %v4212_v22  ;;  %v4308_v6 = vadd.f32 %v9493_v17, %v9622_v42  ;;  %v7112_v17 = vld [vmem:[#allocation35] ss:$0 sm:$0xff]  ;;  %v7120_v22 = vld [vmem:[#allocation15] ss:$0 sm:$0xff] }
 0xd00   :  { %7562 = vmatprep.subr.mxu1 %v4059_v5  ;;  %7603 = vmatprep.mubr.msk.f32.mxu0 %vm661_vm0, %v638_v12  ;;  %v4107_v14 = vmax.f32 %v4103_v31, 0.0 }
 0xd01   :  { %7563 = vmatpush3.msra.mxu1 %v4059_v5 }
 0xd02   :  { %7565 = vmatmul.mubr.msk.f32.vlgmr.msra.gmra.mxu1 %vm661_vm0, %v4105_v51  ;;  %7581 = vmatprep.subr.mxu1 %v4312_v45 }
 0xd03   :  { %7567 = vmatprep.mubr.msk.f32.mxu1 %vm661_vm0, %v4106_v62  ;;  %7582 = vmatpush3.msra.mxu1 %v4312_v45 }
 0xd04   :  { %7583 = vmatprep.subr.mxu1 %v4311_v9 }
 0xd05   :  { %7584 = vmatpush3.msra.mxu1 %v4311_v9 }
 0xd06   :  { %7568 = vmatmul.mubr.msk.f32.gmra.mxu1 %vm661_vm0, %v4107_v14  ;;  %7585 = vmatprep.subr.mxu1 %v4310_v11 }
 0xd07   :  { %7586 = vmatpush3.msra.mxu1 %v4310_v11  ;;  %7589 = vmatprep.mubr.msk.f32.mxu1 %vm661_vm0, %v4305_v49 }
 0xd08   :  { %7587 = vmatprep.subr.mxu1 %v4309_v35 }
 0xd09   :  { %7588 = vmatpush3.msra.mxu1 %v4309_v35 }
 0xd0a   :  { %7590 = vmatmul.mubr.msk.f32.vlgmr.msra.gmra.mxu1 %vm661_vm0, %v4306_v26 }
 0xd0b   :  { %7592 = vmatprep.mubr.msk.f32.mxu1 %vm661_vm0, %v4307_v8 }
 0xd0e   :  { %7593 = vmatmul.mubr.msk.f32.gmra.mxu1 %vm661_vm0, %v4308_v6 }
 0xdb0   :  { %v7552_v41 = vpop.f32.mrf.mxu0 }
 0xdb1   :  { %v4044_v34 = vadd.f32 %v7552_v41, %v7105_v37 }
 0xdb2   :  { %v4038_v54 = vpop.f32.mrf.mxu0 }
 0xdb3   :  { %v4039_v23 = vadd.f32 %v7105_v37, %v4038_v54  ;;  %v7133_v15 = vmul.f32 -1.442695, %v4044_v34 }
 0xdb5   :  { %v7132_v40 = vmul.f32 -1.442695, %v4039_v23  ;;  %v4420_v23 = vld [vmem:[%s10112_s22 + $0x18] sm:$0xff] }
 0xdb6   :  { %v7555_v18 = vpop.f32.mrf.mxu0  ;;  %7595 = vmatprep.subr.mxu0 %v4420_v23 }
 0xdb7   :  { %7905 = vpow2.f32 %v7132_v40  ;;  %v4054_v21 = vadd.f32 %v7555_v18, %v7105_v37  ;;  %7596 = vmatpush3.msra.mxu0 %v4420_v23 }
 0xdb8   :  { %v4048_v27 = vpop.f32.mrf.mxu0  ;;  %7907 = vpow2.f32 %v7133_v15 }
 0xdb9   :  { %v4049_v13 = vadd.f32 %v7105_v37, %v4048_v27  ;;  %v7135_v51 = vmul.f32 -1.442695, %v4054_v21  ;;  %v4419_v27 = vld [vmem:[%s10112_s22 + $0x10] sm:$0xff] }
 0xdba   :  { %v9630_v24 = vpop.f32.mrf.mxu1  ;;  %7597 = vmatprep.subr.mxu0 %v4419_v27 }
 0xdbb   :  { %v7134_v52 = vmul.f32 -1.442695, %v4049_v13  ;;  %7598 = vmatpush3.msra.mxu0 %v4419_v27 }
 0xdbc   :  { %v9632_v29 = vpop.f32.mrf.mxu1 }
 0xdbf   :  { %v7580_v39 = vpop.f32.mrf.mxu0 }
 0xdc0   :  { %v4302_v36 = vadd.f32 %v7580_v39, %v7117_v43 }
 0xdc1   :  { %v4296_v48 = vpop.f32.mrf.mxu0 }
 0xdc2   :  { %v7566_v55 = vpop.f32.mrf.mxu1  ;;  %v4297_v60 = vadd.f32 %v7117_v43, %v4296_v48 }
 0xdc3   :  { %v4198_v61 = vadd.f32 %v7566_v55, %v7112_v17 }
 0xdc4   :  { %v4192_v57 = vpop.f32.mrf.mxu1  ;;  %4525 = vxpose.xlu0.b32.start [1/2] (short) (narrow) %v4297_v60, 32  ;;  %v7906_v9 = vpop.eup %7905 }
 0xdc5   :  { %v7137_v59 = vmul.f32 -1.442695, %v4198_v61  ;;  %v4193_v10 = vadd.f32 %v7112_v17, %v4192_v57  ;;  %v7908_v14 = vpop.eup %7907  ;;  %v4933_v35 = vadd.f32 1.0, %v7906_v9 }
 0xdc6   :  { %v7569_v63 = vpop.f32.mrf.mxu1  ;;  %v4934_v18 = vadd.f32 1.0, %v7908_v14 }
 0xdc7   :  { %v7136_v58 = vmul.f32 -1.442695, %v4193_v10  ;;  %v4208_v50 = vadd.f32 %v7569_v63, %v7112_v17  ;;  %7909 = vpow2.f32 %v7137_v59 }
 0xdc8   :  { %v4202_v3 = vpop.f32.mrf.mxu1  ;;  %4526 = vxpose.xlu0.b32.end [2/2] (short) (narrow) %v4302_v36, 32 }
 0xdc9   :  { %7911 = vpow2.f32 %v7136_v58  ;;  %v4203_v4 = vadd.f32 %v7112_v17, %v4202_v3  ;;  %v7139_v5 = vmul.f32 -1.442695, %v4208_v50 }
 0xdca   :  { %v7591_v56 = vpop.f32.mrf.mxu1  ;;  %7913 = vpow2.f32 %v7134_v52  ;;  %v7100_v52 = vld [vmem:[#allocation26] ss:$0 sm:$0xff] }
 0xdcb   :  { %v7138_v12 = vmul.f32 -1.442695, %v4203_v4  ;;  %v4404_v49 = vadd.f32 %v7591_v56, %v7120_v22  ;;  %v3891_v4 = vadd.f32 %v7100_v52, %v9632_v29  ;;  %v3896_v56 = vadd.f32 %v9630_v24, %v7100_v52 }
 0xdcc   :  { %v4398_v45 = vpop.f32.mrf.mxu1 }
 0xdcd   :  { %v4399_v31 = vadd.f32 %v7120_v22, %v4398_v45  ;;  %7915 = vpow2.f32 %v7138_v12  ;;  %v4418_v12 = vld [vmem:[%s10112_s22 + $0x8] sm:$0xff]  ;;  %v4417_v45 = vld [vmem:[%s10112_s22] sm:$0xff] }
 0xdce   :  { %v7594_v62 = vpop.f32.mrf.mxu1  ;;  %7917 = vpow2.f32 %v7139_v5  ;;  %v7131_v5 = vmul.f32 -1.442695, %v3896_v56  ;;  %7599 = vmatprep.subr.mxu0 %v4418_v12 }
 0xdcf   :  { %7919 = vpow2.f32 %v7135_v51  ;;  %v4414_v37 = vadd.f32 %v7594_v62, %v7120_v22  ;;  %7600 = vmatpush3.msra.mxu0 %v4418_v12 }
 0xdd0   :  { %v4408_v11 = vpop.f32.mrf.mxu1  ;;  %7921 = vrcp.f32 %v4933_v35  ;;  %7601 = vmatprep.subr.mxu0 %v4417_v45 }
 0xdd1   :  { %4685 = vxpose.xlu0.b32.start [1/4] (short) (narrow) %v4399_v31, 32  ;;  %v4409_v8 = vadd.f32 %v7120_v22, %v4408_v11  ;;  %v7130_v22 = vmul.f32 -1.442695, %v3891_v4  ;;  %7602 = vmatpush3.msra.mxu0 %v4417_v45 }
 0xdd2   :  { %7604 = vmatmul.mubr.msk.f32.vlgmr.msra.gmra.mxu0 %vm661_vm0, %v9608_v0 }
 0xdd3   :  { %7606 = vmatprep.mubr.msk.f32.mxu0 %vm661_vm0, %v9613_v19 }
 0xdd4   :  { %v7910_v26 = vpop.eup %7909 }
 0xdd5   :  { %4686 = vxpose.xlu0.b32.cont [2/4] (short) (narrow) %v4404_v49, 32  ;;  %v4958_v41 = vadd.f32 1.0, %v7910_v26 }
 0xdd6   :  { %v7912_v6 = vpop.eup %7911  ;;  %7607 = vmatmul.mubr.msk.f32.gmra.mxu0 %vm661_vm0, %v9622_v42 }
 0xdd7   :  { %v4957_v54 = vadd.f32 1.0, %v7912_v6  ;;  %v7914_v34 = vpop.eup %7913 }
 0xdd8   :  { %v4935_v43 = vadd.f32 1.0, %v7914_v34 }
 0xdd9   :  { %7923 = vrcp.f32 %v4957_v54  ;;  %4687 = vxpose.xlu0.b32.cont [3/4] (short) (narrow) %v4409_v8, 32 }
 0xdda   :  { %v7916_v39 = vpop.eup %7915  ;;  %7925 = vrcp.f32 %v4958_v41 }
 0xddb   :  { %v7918_v40 = vpop.eup %7917  ;;  %v4959_v17 = vadd.f32 1.0, %v7916_v39  ;;  %7927 = vrcp.f32 %v4934_v18 }
 0xddc   :  { %v7920_v48 = vpop.eup %7919  ;;  %v4960_v55 = vadd.f32 1.0, %v7918_v40 }
 0xddd   :  { %4688 = vxpose.xlu0.b32.end [4/4] (short) (narrow) %v4414_v37, 32  ;;  %7929 = vrcp.f32 %v4959_v17  ;;  %v4936_v60 = vadd.f32 1.0, %v7920_v48  ;;  %v7922_v15 = vpop.eup %7921 }
 0xdde   :  { %7931 = vrcp.f32 %v4935_v43 }
 0xddf   :  { %7933 = vrcp.f32 %v4960_v55 }
 0xde0   :  { %7935 = vrcp.f32 %v4936_v60 }
 0xde1   :  { %7937 = vpow2.f32 %v7130_v22 }
 0xde2   :  { %7939 = vpow2.f32 %v7131_v5 }
 0xde6   :  { %v7924_v61 = vpop.eup %7923 }
 0xde7   :  { %v4969_v57 = vmul.f32 %v7924_v61, %v7922_v15  ;;  %v7926_v13 = vpop.eup %7925 }
 0xde8   :  { %v7928_v59 = vpop.eup %7927 }
 0xde9   :  { %4973 = vxpose.xlu0.b32.start [1/4] (short) (narrow) %v4969_v57, 8  ;;  %v4970_v10 = vmul.f32 %v7928_v59, %v7926_v13 }
 0xdea   :  { %v7930_v36 = vpop.eup %7929 }
 0xdeb   :  { %v7932_v63 = vpop.eup %7931 }
 0xdec   :  { %v4971_v58 = vmul.f32 %v7932_v63, %v7930_v36  ;;  %v7934_v50 = vpop.eup %7933 }
 0xded   :  { %4974 = vxpose.xlu0.b32.cont [2/4] (short) (narrow) %v4970_v10, 8  ;;  %v7936_v3 = vpop.eup %7935 }
 0xdee   :  { %v4972_v21 = vmul.f32 %v7936_v3, %v7934_v50  ;;  %v7938_v51 = vpop.eup %7937 }
 0xdef   :  { %v4883_v62 = vadd.f32 1.0, %v7938_v51  ;;  %v7940_v24 = vpop.eup %7939  ;;  %v7125_v51 = vld [vmem:[#allocation17] ss:$0 sm:$0xff] }
 0xdf0   :  { %v4884_v9 = vadd.f32 1.0, %v7940_v24 }
 0xdf1   :  { %4975 = vxpose.xlu0.b32.cont [3/4] (short) (narrow) %v4971_v58, 8  ;;  %7941 = vrcp.f32 %v4883_v62 }
 0xdf2   :  { %7943 = vrcp.f32 %v4884_v9 }
 0xdf5   :  { %4976 = vxpose.xlu0.b32.end [4/4] (short) (narrow) %v4972_v21, 8 }
 0xdfe   :  { %v7942_v0 = vpop.eup %7941 }
 0xdff   :  { %v7944_v19 = vpop.eup %7943 }
 0xe40   :  { %v4541_v31 = vpop.trf.xlu0 }
 0xe41   :  { %4557 = vxpose.xlu1.b32.start.end [1/1] (short) (narrow) %v4541_v31, 16 }
 0xe44   :  { %v4542_v29 = vpop.trf.xlu0 }
 0xe46   :  { %4589 = vxpose.xlu1.b32.start.end [1/1] (short) (narrow) %v4542_v29, 16 }
 0xe48   :  { %v4543_v49 = vpop.trf.xlu0 }
 0xe4b   :  { %4621 = vxpose.xlu1.b32.start.end [1/1] (short) (narrow) %v4543_v49, 16 }
 0xe4c   :  { %v4544_v11 = vpop.trf.xlu0 }
 0xe50   :  { %4653 = vxpose.xlu1.b32.start.end [1/1] (short) (narrow) %v4544_v11, 16  ;;  %v4701_v14 = vpop.trf.xlu0 }
 0xe51   :  { %7609 = vmatprep.subr.mxu1 %v4701_v14 }
 0xe52   :  { %7610 = vmatpush3.msra.mxu1 %v4701_v14 }
 0xe54   :  { %v4702_v35 = vpop.trf.xlu0 }
 0xe55   :  { %4889 = vxpose.xlu1.b32.start [1/2] (short) (narrow) %v7942_v0, 8  ;;  %7614 = vmatprep.subr.mxu0 %v4702_v35 }
 0xe56   :  { %7615 = vmatpush3.msra.mxu0 %v4702_v35 }
 0xe58   :  { %v4703_v26 = vpop.trf.xlu0 }
 0xe59   :  { %4890 = vxpose.xlu1.b32.end [2/2] (short) (narrow) %v7944_v19, 8  ;;  %7619 = vmatprep.subr.mxu1 %v4703_v26 }
 0xe5c   :  { %v4704_v42 = vpop.trf.xlu0 }
 0xe5d   :  { %7624 = vmatprep.subr.mxu0 %v4704_v42 }
 0xe65   :  { %v9682_v11 = vpop.trf.xlu0 }
 0xe66   :  { %v5545_v46 = vrot.slane %v9682_v11, %v9310_v38  ;;  %v5526_v53 = vrot.slane %v9682_v11, %v9278_v7 }
 0xe92   :  { %v7605_v34 = vpop.f32.mrf.mxu0 }
 0xe93   :  { %v4512_v62 = vadd.f32 %v7605_v34, %v7125_v51 }
 0xe94   :  { %v4506_v39 = vpop.f32.mrf.mxu0 }
 0xe95   :  { %v4507_v31 = vadd.f32 %v7125_v51, %v4506_v39 }
 0xe96   :  { %v7608_v17 = vpop.f32.mrf.mxu0 }
 0xe97   :  { %v4522_v29 = vadd.f32 %v7608_v17, %v7125_v51 }
 0xe98   :  { %v4516_v61 = vpop.f32.mrf.mxu0 }
 0xe99   :  { %v4517_v24 = vadd.f32 %v7125_v51, %v4516_v61  ;;  %v5507_v61 = vrot.slane %v9682_v11, %v9303_v33 }
 0xebd   :  { %v4573_v8 = vpop.trf.xlu1 }
 0xebe   :  { %7611 = vmatprep.mubr.msk.f32.mxu1 %vm1919_vm7, %v4573_v8 }
 0xec1   :  { %v4574_v6 = vpop.trf.xlu1 }
 0xec2   :  { %7612 = vmatmul.mubr.msk.f32.vlgmr.msra.gmra.mxu1 %vm1919_vm7, %v4574_v6 }
 0xec3   :  { %7620 = vmatpush3.msra.mxu1 %v4703_v26 }
 0xec5   :  { %v4605_v41 = vpop.trf.xlu1 }
 0xec6   :  { %7616 = vmatprep.mubr.msk.f32.mxu0 %vm1919_vm7, %v4605_v41 }
 0xec9   :  { %v4606_v54 = vpop.trf.xlu1 }
 0xeca   :  { %7617 = vmatmul.mubr.msk.f32.vlgmr.msra.gmra.mxu0 %vm1919_vm7, %v4606_v54 }
 0xecb   :  { %7625 = vmatpush3.msra.mxu0 %v4704_v42 }
 0xecd   :  { %v4637_v18 = vpop.trf.xlu1 }
 0xece   :  { %7621 = vmatprep.mubr.msk.f32.mxu1 %vm1919_vm7, %v4637_v18 }
 0xed1   :  { %v4638_v37 = vpop.trf.xlu1 }
 0xed2   :  { %7622 = vmatmul.mubr.msk.f32.vlgmr.msra.gmra.mxu1 %vm1919_vm7, %v4638_v37 }
 0xed5   :  { %v4669_v23 = vpop.trf.xlu1 }
 0xed6   :  { %7626 = vmatprep.mubr.msk.f32.mxu0 %vm1919_vm7, %v4669_v23 }
 0xed9   :  { %v4670_v27 = vpop.trf.xlu1 }
 0xeda   :  { %7627 = vmatmul.mubr.msk.f32.vlgmr.msra.gmra.mxu0 %vm1919_vm7, %v4670_v27 }
 0xedd   :  { %v4905_v9 = vpop.trf.xlu1 }
 0xede   :  { %v5436_v49 = vrot.slane %v4905_v9, %v9298_v30  ;;  %v5458_v14 = vrot.slane %v4905_v9, %v9278_v7  ;;  %v5469_v0 = vrot.slane %v4905_v9, %v9310_v38 }
 0xf82   :  { %v7613_v40 = vpop.f32.mrf.mxu1 }
 0xf83   :  { %v5330_v43 = vmul.f32 0.35355338, %v7613_v40 }
 0xf84   :  { %v5077_v48 = vpop.f32.mrf.mxu1 }
 0xf85   :  { %v5338_v55 = vsel %vm9248_vm10, %v5330_v43, -1e+30  ;;  %v5329_v60 = vmul.f32 0.35355338, %v5077_v48 }
 0xf86   :  { %v5348_v15 = vsel %vm661_vm0, %v5338_v55, -inf }
 0xf87   :  { %v9659_v57 = vsel %vm9237_vm8, %v5329_v60, -1e+30  ;;  %5349 = vmax.xlane.f32.xlu1 %v5348_v15  ;;  %v5488_v15 = vrot.slane %v9682_v11, %v9298_v30 }
 0xf88   :  { %v5345_v13 = vsel %vm661_vm0, %v9659_v57, -inf }
 0xf89   :  { %5346 = vmax.xlane.f32.xlu0 %v5345_v13  ;;  %v5447_v13 = vrot.slane %v4905_v9, %v9303_v33 }
 0xf8a   :  { %v7618_v59 = vpop.f32.mrf.mxu0 }
 0xf8b   :  { %v5332_v27 = vmul.f32 0.35355338, %v7618_v59 }
 0xf8c   :  { %v5158_v10 = vpop.f32.mrf.mxu0 }
 0xf8d   :  { %v5331_v36 = vmul.f32 0.35355338, %v5158_v10  ;;  %v5340_v34 = vsel %vm9248_vm10, %v5332_v27, -1e+30 }
 0xf8e   :  { %v5354_v40 = vsel %vm661_vm0, %v5340_v34, -inf }
 0xf8f   :  { %v9665_v63 = vsel %vm9237_vm8, %v5331_v36, -1e+30 }
 0xf90   :  { %v5351_v58 = vsel %vm661_vm0, %v9665_v63, -inf }
 0xf91   :  { %5352 = vmax.xlane.f32.xlu0 %v5351_v58 }
 0xf92   :  { %v7623_v50 = vpop.f32.mrf.mxu1 }
 0xf93   :  { %v5334_v39 = vmul.f32 0.35355338, %v7623_v50 }
 0xf94   :  { %v5239_v3 = vpop.f32.mrf.mxu1 }
 0xf95   :  { %v5333_v21 = vmul.f32 0.35355338, %v5239_v3  ;;  %v5342_v17 = vsel %vm9248_vm10, %v5334_v39, -1e+30 }
 0xf96   :  { %v5360_v48 = vsel %vm661_vm0, %v5342_v17, -inf }
 0xf97   :  { %v9671_v52 = vsel %vm9237_vm8, %v5333_v21, -1e+30 }
 0xf98   :  { %v5357_v4 = vsel %vm661_vm0, %v9671_v52, -inf }
 0xf99   :  { %5358 = vmax.xlane.f32.xlu0 %v5357_v4 }
 0xf9a   :  { %v7628_v56 = vpop.f32.mrf.mxu0 }
 0xf9b   :  { %v5336_v43 = vmul.f32 0.35355338, %v7628_v56 }
 0xf9c   :  { %v5320_v22 = vpop.f32.mrf.mxu0 }
 0xf9d   :  { %v5335_v5 = vmul.f32 0.35355338, %v5320_v22 }
 0xf9f   :  { %v9677_v12 = vsel %vm9237_vm8, %v5335_v5, -1e+30 }
 0xfa0   :  { %v5363_v45 = vsel %vm661_vm0, %v9677_v12, -inf }
 0xfa1   :  { %5364 = vmax.xlane.f32.xlu0 %v5363_v45 }
 0xfce   :  { %4717 = vxpose.xlu0.b32.start [1/4] (short) (narrow) %v4507_v31, 32 }
 0xfd2   :  { %4718 = vxpose.xlu0.b32.cont [2/4] (short) (narrow) %v4512_v62, 32 }
 0xfd6   :  { %4719 = vxpose.xlu0.b32.cont [3/4] (short) (narrow) %v4517_v24, 32 }
 0xfda   :  { %4720 = vxpose.xlu0.b32.end [4/4] (short) (narrow) %v4522_v29, 32 }
0x1003   :  { %5438 = vbcast.lane.b32.xlu0 %v5436_v49, 256 }
0x1007   :  { %5551 = vbcast.lane.b32.xlu0 %v5545_v46, 264 }
0x100b   :  { %5464 = vbcast.lane.b32.xlu0 %v5458_v14, 264 }
0x100f   :  { %5471 = vbcast.lane.b32.xlu0 %v5469_v0, 256 }
0x1010   :  { %v5350_v35 = vpop.xlane.xlu1 %5349 }
0x1011   :  { %v5370_v19 = vsub.f32 %v5338_v55, %v5350_v35  ;;  %v9706_v55 = vsel %vm9248_vm10, %v5336_v43, -1e+30 }
0x1012   :  { %v5347_v6 = vpop.xlane.xlu0 %5346  ;;  %v5366_v60 = vsel %vm661_vm0, %v9706_v55, -inf }
0x1013   :  { %v5379_v26 = vmul.f32 1.442695, %v5370_v19  ;;  %v5369_v7 = vsub.f32 %v9659_v57, %v5347_v6 }
0x1015   :  { %7945 = vpow2.f32 %v5379_v26  ;;  %v5377_v50 = vmul.f32 1.442695, %v5369_v7 }
0x1017   :  { %7947 = vpow2.f32 %v5377_v50 }
0x101a   :  { %v9692_v41 = vpop.xlane.xlu0 %5352 }
0x101b   :  { %v5371_v57 = vsub.f32 %v9665_v63, %v9692_v41 }
0x101d   :  { %v5381_v29 = vmul.f32 1.442695, %v5371_v57 }
0x1022   :  { %v9688_v42 = vpop.eup %7945  ;;  %v9694_v54 = vpop.xlane.xlu0 %5358 }
0x1023   :  { %v5396_v8 = vsel %vm661_vm0, %v9688_v42, 0.0 }
0x1024   :  { %v9736_v45 = vpop.eup %7947 }
0x1025   :  { %v5393_v31 = vsel %vm661_vm0, %v9736_v45, 0.0 }
0x102a   :  { %v9696_v18 = vpop.xlane.xlu0 %5364 }
0x102e   :  { %5397 = vadd.xlane.f32.xlu0 %v5396_v8 }
0x104a   :  { %v4733_v37 = vpop.trf.xlu0 }
0x104e   :  { %v4734_v38 = vpop.trf.xlu0 }
0x104f   :  { %4781 = vxpose.xlu1.b32.start.end [1/1] (short) (narrow) %v4734_v38, 32 }
0x1052   :  { %v4735_v23 = vpop.trf.xlu0 }
0x1056   :  { %v9717_v59 = vpop.trf.xlu0 }
0x105b   :  { %4749 = vxpose.xlu0.b32.start.end [1/1] (short) (narrow) %v4733_v37, 32  ;;  %v5375_v37 = vsub.f32 %v9677_v12, %v9696_v18 }
0x1068   :  { %4813 = vxpose.xlu0.b32.start.end [1/1] (short) (narrow) %v4735_v23, 32 }
0x1075   :  { %v9719_v10 = vpop.permute.xlu0 %5438 }
0x1079   :  { %v9721_v36 = vpop.permute.xlu0 %5551 }
0x107d   :  { %v9724_v58 = vpop.permute.xlu0 %5464 }
0x1081   :  { %v9728_v3 = vpop.permute.xlu0 %5471 }
0x1082   :  { %5355 = vmax.xlane.f32.xlu1 %v5354_v40 }
0x1086   :  { %5361 = vmax.xlane.f32.xlu1 %v5360_v48 }
0x108a   :  { %5367 = vmax.xlane.f32.xlu1 %v5366_v60 }
0x109b   :  { %5502 = vbcast.lane.b32.xlu1 %v5488_v15, 280 }
0x109f   :  { %5498 = vbcast.lane.b32.xlu1 %v5488_v15, 272 }
0x10a3   :  { %5521 = vbcast.lane.b32.xlu1 %v5507_v61, 280 }
0x10a7   :  { %5494 = vbcast.lane.b32.xlu1 %v5488_v15, 264 }
0x10ab   :  { %5517 = vbcast.lane.b32.xlu1 %v5507_v61, 272 }
0x10af   :  { %5490 = vbcast.lane.b32.xlu1 %v5488_v15, 256 }
0x10b3   :  { %5513 = vbcast.lane.b32.xlu1 %v5507_v61, 264 }
0x10b7   :  { %5509 = vbcast.lane.b32.xlu1 %v5507_v61, 256  ;;  %v9732_v4 = vpop.xlane.xlu0 %5397 }
0x10bb   :  { %5540 = vbcast.lane.b32.xlu1 %v5526_v53, 280 }
0x10bf   :  { %5442 = vbcast.lane.b32.xlu1 %v5436_v49, 264 }
0x10c3   :  { %5449 = vbcast.lane.b32.xlu1 %v5447_v13, 256 }
0x10c7   :  { %5536 = vbcast.lane.b32.xlu1 %v5526_v53, 272 }
0x10cb   :  { %5559 = vbcast.lane.b32.xlu1 %v5545_v46, 280  ;;  %v9726_v33 = vpop.trf.xlu1 }
0x10cf   :  { %5453 = vbcast.lane.b32.xlu1 %v5447_v13, 264  ;;  %v9730_v21 = vpop.trf.xlu1 }
0x10d3   :  { %5532 = vbcast.lane.b32.xlu1 %v5526_v53, 264  ;;  %v4799_v56 = vpop.trf.xlu1 }
0x10d7   :  { %5555 = vbcast.lane.b32.xlu1 %v5545_v46, 272  ;;  %v9734_v22 = vpop.trf.xlu0  ;;  %v4800_v5 = vpop.trf.xlu1 }
0x10db   :  { %5528 = vbcast.lane.b32.xlu1 %v5526_v53, 256  ;;  %v4766_v51 = vpop.trf.xlu0 }
0x10df   :  { %5460 = vbcast.lane.b32.xlu1 %v5458_v14, 256 }
0x10e3   :  { %5547 = vbcast.lane.b32.xlu1 %v5545_v46, 256  ;;  %v4767_v46 = vpop.trf.xlu0 }
0x10e7   :  { %5475 = vbcast.lane.b32.xlu1 %v5469_v0, 264  ;;  %v5373_v0 = vsub.f32 %v9671_v52, %v9694_v54  ;;  %v4768_v26 = vpop.trf.xlu0  ;;  %v5389_v52 = vmul.f32 1.442695, %v5375_v37 }
0x10e9   :  { %v5385_v63 = vmul.f32 1.442695, %v5373_v0 }
0x10eb   :  { %v9757_v48 = vpop.trf.xlu0 }
0x10ef   :  { %v4830_v13 = vpop.trf.xlu0 }
0x110b   :  { %5394 = vadd.xlane.f32.xlu1 %v5393_v31  ;;  %v5356_v62 = vpop.xlane.xlu1 %5355 }
0x110c   :  { %v5372_v24 = vsub.f32 %v5340_v34, %v5356_v62  ;;  %v4831_v62 = vpop.trf.xlu0 }
0x110e   :  { %v5383_v9 = vmul.f32 1.442695, %v5372_v24 }
0x110f   :  { %v5362_v49 = vpop.xlane.xlu1 %5361 }
0x1110   :  { %7949 = vpow2.f32 %v5383_v9  ;;  %v5374_v14 = vsub.f32 %v5342_v17, %v5362_v49  ;;  %v4832_v49 = vpop.trf.xlu0 }
0x1111   :  { %7951 = vpow2.f32 %v5381_v29 }
0x1112   :  { %v5387_v35 = vmul.f32 1.442695, %v5374_v14 }
0x1113   :  { %v5368_v19 = vpop.xlane.xlu1 %5367 }
0x1114   :  { %7953 = vpow2.f32 %v5387_v35  ;;  %v5376_v8 = vsub.f32 %v9706_v55, %v5368_v19 }
0x1115   :  { %7955 = vpow2.f32 %v5385_v63 }
0x1116   :  { %v5391_v38 = vmul.f32 1.442695, %v5376_v8 }
0x1117   :  { %v5503_v6 = vpop.permute.xlu1 %5502 }
0x1118   :  { %v5564_v41 = vmul.f32 %v5503_v6, %v4768_v26  ;;  %7957 = vpow2.f32 %v5391_v38 }
0x1119   :  { %7959 = vpow2.f32 %v5389_v52 }
0x111a   :  { %7629 = vmatprep.subr.mxu1 %v5564_v41  ;;  %7961 = vrcp.f32 %v9732_v4 }
0x111b   :  { %v5499_v23 = vpop.permute.xlu1 %5498  ;;  %7630 = vmatpush3.msra.mxu1 %v5564_v41 }
0x111c   :  { %v5563_v27 = vmul.f32 %v5499_v23, %v4767_v46 }
0x111d   :  { %v9747_v34 = vpop.eup %7949 }
0x111e   :  { %7631 = vmatprep.subr.mxu1 %v5563_v27  ;;  %v5402_v54 = vsel %vm661_vm0, %v9747_v34, 0.0  ;;  %v9751_v39 = vpop.eup %7951 }
0x111f   :  { %5403 = vadd.xlane.f32.xlu1 %v5402_v54  ;;  %v5522_v40 = vpop.permute.xlu1 %5521  ;;  %7632 = vmatpush3.msra.mxu1 %v5563_v27  ;;  %v5399_v12 = vsel %vm661_vm0, %v9751_v39, 0.0 }
0x1120   :  { %v5568_v17 = vmul.f32 %v5522_v40, %v4800_v5 }
0x1121   :  { %v9755_v18 = vpop.eup %7953 }
0x1122   :  { %7640 = vmatprep.subr.mxu0 %v5568_v17  ;;  %v5408_v60 = vsel %vm661_vm0, %v9755_v18, 0.0  ;;  %v9761_v15 = vpop.eup %7955 }
0x1123   :  { %5400 = vadd.xlane.f32.xlu1 %v5399_v12  ;;  %7641 = vmatpush3.msra.mxu0 %v5568_v17  ;;  %v5495_v43 = vpop.permute.xlu1 %5494  ;;  %v5405_v7 = vsel %vm661_vm0, %v9761_v15, 0.0 }
0x1124   :  { %v5562_v55 = vmul.f32 %v5495_v43, %v4766_v51 }
0x1125   :  { %v9765_v50 = vpop.eup %7957 }
0x1126   :  { %7633 = vmatprep.subr.mxu1 %v5562_v55  ;;  %v5414_v57 = vsel %vm661_vm0, %v9765_v50, 0.0  ;;  %v9770_v31 = vpop.eup %7959 }
0x1127   :  { %5409 = vadd.xlane.f32.xlu1 %v5408_v60  ;;  %v5518_v61 = vpop.permute.xlu1 %5517  ;;  %7634 = vmatpush3.msra.mxu1 %v5562_v55  ;;  %v5411_v29 = vsel %vm661_vm0, %v9770_v31, 0.0  ;;  %v7962_v23 = vpop.eup %7961 }
0x1128   :  { %v5567_v53 = vmul.f32 %v5518_v61, %v4799_v56 }
0x112a   :  { %7642 = vmatprep.subr.mxu0 %v5567_v53 }
0x112b   :  { %5406 = vadd.xlane.f32.xlu1 %v5405_v7  ;;  %7643 = vmatpush3.msra.mxu0 %v5567_v53  ;;  %v5491_v5 = vpop.permute.xlu1 %5490 }
0x112c   :  { %v5561_v51 = vmul.f32 %v5491_v5, %v9734_v22 }
0x112e   :  { %7635 = vmatprep.subr.mxu1 %v5561_v51 }
0x112f   :  { %5415 = vadd.xlane.f32.xlu1 %v5414_v57  ;;  %v5514_v56 = vpop.permute.xlu1 %5513  ;;  %7636 = vmatpush3.msra.mxu1 %v5561_v51 }
0x1130   :  { %v5566_v24 = vmul.f32 %v5514_v56, %v9730_v21 }
0x1132   :  { %7644 = vmatprep.subr.mxu0 %v5566_v24 }
0x1133   :  { %5412 = vadd.xlane.f32.xlu1 %v5411_v29  ;;  %7645 = vmatpush3.msra.mxu0 %v5566_v24  ;;  %v5510_v9 = vpop.permute.xlu1 %5509 }
0x1134   :  { %v5565_v22 = vmul.f32 %v5510_v9, %v9726_v33 }
0x1136   :  { %7646 = vmatprep.subr.mxu0 %v5565_v22 }
0x1137   :  { %7647 = vmatpush3.msra.mxu0 %v5565_v22  ;;  %v5541_v46 = vpop.permute.xlu1 %5540 }
0x1138   :  { %v5572_v14 = vmul.f32 %v5541_v46, %v4832_v49 }
0x113a   :  { %7651 = vmatprep.subr.mxu1 %v5572_v14 }
0x113b   :  { %v5443_v0 = vpop.permute.xlu1 %5442 }
0x113f   :  { %v5450_v35 = vpop.permute.xlu1 %5449 }
0x1143   :  { %v5537_v19 = vpop.permute.xlu1 %5536 }
0x1144   :  { %v5571_v17 = vmul.f32 %v5537_v19, %v4831_v62 }
0x1147   :  { %v9776_v26 = vpop.permute.xlu1 %5559 }
0x114b   :  { %v5454_v21 = vpop.permute.xlu1 %5453 }
0x114f   :  { %v5533_v63 = vpop.permute.xlu1 %5532 }
0x1150   :  { %v5570_v4 = vmul.f32 %v5533_v63, %v4830_v13 }
0x1153   :  { %v9779_v8 = vpop.permute.xlu1 %5555 }
0x1157   :  { %v5529_v6 = vpop.permute.xlu1 %5528 }
0x115b   :  { %v5461_v41 = vpop.permute.xlu1 %5460 }
0x115f   :  { %v9781_v33 = vpop.permute.xlu1 %5547 }
0x1163   :  { %v9783_v37 = vpop.permute.xlu1 %5475 }
0x1166   :  { %4845 = vxpose.xlu1.b32.start.end [1/1] (short) (narrow) %v9717_v59, 32  ;;  %v5420_v59 = vmul.f32 %v7962_v23, %v9688_v42  ;;  %v5569_v42 = vmul.f32 %v5529_v6, %v9757_v48  ;;  %v6221_v6 = vld [vmem:[%s10113_s4 + $0x18] sm:$0xff] }
0x1168   :  { %v9791_v40 = vmul.f32 %v5443_v0, %v5420_v59 }
0x1194   :  { %v5395_v38 = vpop.xlane.xlu1 %5394 }
0x1195   :  { %7963 = vrcp.f32 %v5395_v38 }
0x11a2   :  { %v7964_v27 = vpop.eup %7963 }
0x11a3   :  { %v5418_v52 = vmul.f32 %v7964_v27, %v9736_v45  ;;  %v6219_v27 = vld [vmem:[%s10113_s4 + $0x8] sm:$0xff] }
0x11a5   :  { %v9789_v54 = vmul.f32 %v9719_v10, %v5418_v52  ;;  %v6218_v52 = vld [vmem:[%s10113_s4] sm:$0xff] }
0x11a7   :  { %7637 = vmatprep.mubr.msk.f32.mxu1 %vm661_vm0, %v9789_v54 }
0x11a8   :  { %v5404_v12 = vpop.xlane.xlu1 %5403  ;;  %7638 = vmatmul.mubr.msk.f32.vlgmr.msra.gmra.mxu1 %vm661_vm0, %v9791_v40 }
0x11a9   :  { %7652 = vmatpush3.msra.mxu1 %v5572_v14  ;;  %7965 = vrcp.f32 %v5404_v12 }
0x11aa   :  { %7653 = vmatprep.subr.mxu1 %v5571_v17 }
0x11ab   :  { %7654 = vmatpush3.msra.mxu1 %v5571_v17 }
0x11ac   :  { %7655 = vmatprep.subr.mxu1 %v5570_v4  ;;  %v5401_v10 = vpop.xlane.xlu1 %5400 }
0x11ad   :  { %7967 = vrcp.f32 %v5401_v10  ;;  %7656 = vmatpush3.msra.mxu1 %v5570_v4  ;;  %v5908_v4 = vrot.slane %v9682_v11, %v9374_v47  ;;  %v7156_v10 = vld [vmem:[#allocation18] ss:$0 sm:$0xff] }
0x11ae   :  { %7657 = vmatprep.subr.mxu1 %v5569_v42 }
0x11af   :  { %7658 = vmatpush3.msra.mxu1 %v5569_v42  ;;  %v5909_v42 = vcombine.high %v5908_v4, %v5908_v4 }
0x11b0   :  { %v5410_v45 = vpop.xlane.xlu1 %5409  ;;  %7673 = vmatprep.subr.mxu1 %v6221_v6 }
0x11b1   :  { %7969 = vrcp.f32 %v5410_v45  ;;  %v5916_v45 = vrot.slane %v5908_v4, %v9374_v47 }
0x11b4   :  { %v5407_v43 = vpop.xlane.xlu1 %5406 }
0x11b5   :  { %7971 = vrcp.f32 %v5407_v43  ;;  %v5923_v43 = vrot.slane %v5909_v42, %v9374_v47 }
0x11b6   :  { %v7966_v55 = vpop.eup %7965 }
0x11b7   :  { %v5424_v53 = vmul.f32 %v7966_v55, %v9747_v34 }
0x11b8   :  { %v5416_v60 = vpop.xlane.xlu1 %5415 }
0x11b9   :  { %v9802_v5 = vmul.f32 %v5454_v21, %v5424_v53 }
0x11ba   :  { %v7968_v61 = vpop.eup %7967 }
0x11bb   :  { %v5422_v13 = vmul.f32 %v7968_v61, %v9751_v39 }
0x11bc   :  { %v5413_v7 = vpop.xlane.xlu1 %5412 }
0x11bd   :  { %7973 = vrcp.f32 %v5413_v7  ;;  %v9800_v48 = vmul.f32 %v5450_v35, %v5422_v13  ;;  %v5933_v7 = vrot.slane %v5923_v43, %v9298_v30 }
0x11be   :  { %v7970_v51 = vpop.eup %7969  ;;  %7975 = vrcp.f32 %v5416_v60 }
0x11bf   :  { %7648 = vmatprep.mubr.msk.f32.mxu0 %vm661_vm0, %v9800_v48  ;;  %v5428_v56 = vmul.f32 %v7970_v51, %v9755_v18  ;;  %v5924_v51 = vcombine.high %v5916_v45, %v5916_v45 }
0x11c0   :  { %7649 = vmatmul.mubr.msk.f32.vlgmr.msra.gmra.mxu0 %vm661_vm0, %v9802_v5 }
0x11c1   :  { %v9813_v39 = vmul.f32 %v9724_v58, %v5428_v56 }
0x11c2   :  { %v7972_v57 = vpop.eup %7971 }
0x11c3   :  { %v5426_v34 = vmul.f32 %v7972_v57, %v9761_v15  ;;  %v5929_v57 = vrot.slane %v5916_v45, %v9298_v30 }
0x11c5   :  { %v9810_v62 = vmul.f32 %v5461_v41, %v5426_v34  ;;  %v6220_v41 = vld [vmem:[%s10113_s4 + $0x10] sm:$0xff]  ;;  %v5948_v34 = vmul.f32 %v5933_v7, %v9800_v48 }
0x11c7   :  { %7659 = vmatprep.mubr.msk.f32.mxu1 %vm661_vm0, %v9810_v62 }
0x11c8   :  { %7660 = vmatmul.mubr.msk.f32.vlgmr.msra.gmra.mxu1 %vm661_vm0, %v9813_v39 }
0x11c9   :  { %7674 = vmatpush3.msra.mxu1 %v6221_v6 }
0x11ca   :  { %v7974_v24 = vpop.eup %7973  ;;  %7675 = vmatprep.subr.mxu1 %v6220_v41 }
0x11cb   :  { %v5430_v29 = vmul.f32 %v7974_v24, %v9770_v31  ;;  %v7976_v46 = vpop.eup %7975  ;;  %7676 = vmatpush3.msra.mxu1 %v6220_v41  ;;  %v5946_v24 = vmul.f32 %v5929_v57, %v9789_v54 }
0x11cc   :  { %7677 = vmatprep.subr.mxu1 %v6219_v27 }
0x11cd   :  { %v9821_v9 = vmul.f32 %v9728_v3, %v5430_v29  ;;  %v5432_v3 = vmul.f32 %v7976_v46, %v9765_v50  ;;  %7678 = vmatpush3.msra.mxu1 %v6219_v27  ;;  %v5937_v29 = vrot.slane %v5924_v51, %v9298_v30  ;;  %v5949_v46 = vmul.f32 %v5933_v7, %v9802_v5 }
0x11ce   :  { %7679 = vmatprep.subr.mxu1 %v6218_v52 }
0x11cf   :  { %7670 = vmatprep.mubr.msk.f32.mxu0 %vm661_vm0, %v9821_v9  ;;  %v9831_v35 = vmul.f32 %v9783_v37, %v5432_v3  ;;  %7680 = vmatpush3.msra.mxu1 %v6218_v52 }
0x11e2   :  { %v4861_v18 = vpop.trf.xlu1 }
0x11e3   :  { %v5573_v0 = vmul.f32 %v9781_v33, %v4861_v18  ;;  %v5960_v18 = vsel %vm661_vm0, %v5948_v34, 0.0 }
0x11e6   :  { %v4862_v15 = vpop.trf.xlu1 }
0x11e7   :  { %v5574_v31 = vmul.f32 %v9721_v36, %v4862_v15  ;;  %v5950_v15 = vmul.f32 %v5937_v29, %v9810_v62 }
0x11ea   :  { %v4863_v58 = vpop.trf.xlu1 }
0x11eb   :  { %v5575_v14 = vmul.f32 %v9779_v8, %v4863_v58  ;;  %v5954_v58 = vsel %vm661_vm0, %v5946_v24, 0.0 }
0x11ee   :  { %v4864_v22 = vpop.trf.xlu1 }
0x11ef   :  { %v5576_v49 = vmul.f32 %v9776_v26, %v4864_v22  ;;  %v5966_v22 = vsel %vm661_vm0, %v5950_v15, 0.0 }
0x11f1   :  { %7662 = vmatprep.subr.mxu0 %v5576_v49 }
0x11f2   :  { %7663 = vmatpush3.msra.mxu0 %v5576_v49 }
0x11f3   :  { %7664 = vmatprep.subr.mxu0 %v5575_v14 }
0x11f4   :  { %7665 = vmatpush3.msra.mxu0 %v5575_v14  ;;  %v5951_v14 = vmul.f32 %v5937_v29, %v9813_v39 }
0x11f5   :  { %7666 = vmatprep.subr.mxu0 %v5574_v31 }
0x11f6   :  { %7667 = vmatpush3.msra.mxu0 %v5574_v31 }
0x11f7   :  { %7668 = vmatprep.subr.mxu0 %v5573_v0 }
0x11f8   :  { %7669 = vmatpush3.msra.mxu0 %v5573_v0 }
0x11f9   :  { %7671 = vmatmul.mubr.msk.f32.vlgmr.msra.gmra.mxu0 %vm661_vm0, %v9831_v35 }
0x1268   :  { %v7639_v19 = vpop.f32.mrf.mxu1 }
0x126a   :  { %v5649_v36 = vpop.f32.mrf.mxu1 }
0x126b   :  { %5978 = vxpose.xlu0.b32.start [1/2] (short) (narrow) %v5649_v36, 8 }
0x126f   :  { %5979 = vxpose.xlu0.b32.end [2/2] (short) (narrow) %v7639_v19, 8 }
0x1280   :  { %v7650_v50 = vpop.f32.mrf.mxu0 }
0x1282   :  { %v5730_v26 = vpop.f32.mrf.mxu0 }
0x1283   :  { %6010 = vxpose.xlu1.b32.start [1/2] (short) (narrow) %v5730_v26, 8 }
0x1287   :  { %6011 = vxpose.xlu1.b32.end [2/2] (short) (narrow) %v7650_v50, 8 }
0x1288   :  { %v7661_v21 = vpop.f32.mrf.mxu1 }
0x128a   :  { %v5811_v63 = vpop.f32.mrf.mxu1 }
0x128b   :  { %6042 = vxpose.xlu0.b32.start [1/2] (short) (narrow) %v5811_v63, 8 }
0x128f   :  { %6043 = vxpose.xlu0.b32.end [2/2] (short) (narrow) %v7661_v21, 8 }
0x12b9   :  { %v7672_v8 = vpop.f32.mrf.mxu0 }
0x12bb   :  { %v5892_v33 = vpop.f32.mrf.mxu0 }
0x12bc   :  { %6074 = vxpose.xlu0.b32.start [1/2] (short) (narrow) %v5892_v33, 8 }
0x12c0   :  { %6075 = vxpose.xlu0.b32.end [2/2] (short) (narrow) %v7672_v8, 8 }
0x12e7   :  { %v5994_v37 = vpop.trf.xlu0 }
0x12e8   :  { %6106 = vxpose.xlu1.b32.start [1/4] (short) (narrow) %v5994_v37, 16 }
0x12ff   :  { %v6026_v38 = vpop.trf.xlu1 }
0x1300   :  { %6107 = vxpose.xlu1.b32.cont [2/4] (short) (narrow) %v6026_v38, 16 }
0x1307   :  { %v6058_v23 = vpop.trf.xlu0 }
0x1308   :  { %6108 = vxpose.xlu1.b32.cont [3/4] (short) (narrow) %v6058_v23, 16 }
0x1338   :  { %v6090_v59 = vpop.trf.xlu0 }
0x1339   :  { %6109 = vxpose.xlu1.b32.end [4/4] (short) (narrow) %v6090_v59, 16 }
0x13a9   :  { %v6122_v17 = vpop.trf.xlu1 }
0x13aa   :  { %7681 = vmatprep.mubr.msk.f32.mxu1 %vm661_vm0, %v6122_v17 }
0x13ad   :  { %v6123_v12 = vpop.trf.xlu1 }
0x13ae   :  { %7682 = vmatmul.mubr.msk.f32.vlgmr.msra.gmra.mxu1 %vm661_vm0, %v6123_v12 }
0x146e   :  { %v7683_v55 = vpop.f32.mrf.mxu1 }
0x146f   :  { %v6307_v60 = vadd.f32 %v7683_v55, %v7156_v10 }
0x1470   :  { %v6301_v61 = vpop.f32.mrf.mxu1 }
0x1471   :  { %v6311_v53 = vadd.f32 %v6307_v60, %v9586_v1  ;;  %v6302_v13 = vadd.f32 %v7156_v10, %v6301_v61  ;;  %v5925_v1 = vcombine.high %v5923_v43, %v5923_v43  ;;  %v6356_v61 = vld [vmem:[%s10114_s15] sm:$0xf] }
0x1472   :  { %7684 = vmatprep.subr.msk.mxu0 %vm3298_vm14, %v6356_v61 }
0x1473   :  { %v6310_v56 = vadd.f32 %v6302_v13, %v9589_v44  ;;  %v6317_v11 = vsel %vm661_vm0, %v6311_v53, 0.0  ;;  %v5947_v44 = vmul.f32 %v5929_v57, %v9791_v40  ;;  %v5941_v48 = vrot.slane %v5925_v1, %v9298_v30  ;;  %v6518_v13 = vld [vmem:[%s10115_s28 + $0x18] sm:$0xff]  ;;  %7685 = vmatpush3.msk.msra.mxu0 %vm3298_vm14, %v6356_v61 }
0x1474   :  { %6318 = vadd.xlane.f32.xlu1 %v6317_v11  ;;  %v5963_v40 = vsel %vm661_vm0, %v5949_v46, 0.0  ;;  %v5969_v30 = vsel %vm661_vm0, %v5951_v14, 0.0  ;;  %7689 = vmatprep.subr.mxu0 %v6518_v13  ;;  %v6616_v57 = vld [vmem:[%s10116_s20 + $0x38] sm:$0xff]  ;;  %v6516_v14 = vld [vmem:[%s10115_s28 + $0x8] sm:$0xff] }
0x1475   :  { %v6314_v47 = vsel %vm661_vm0, %v6310_v56, 0.0  ;;  %v5952_v54 = vmul.f32 %v5941_v48, %v9821_v9  ;;  %v5957_v49 = vsel %vm661_vm0, %v5947_v44, 0.0  ;;  %v5953_v31 = vmul.f32 %v5941_v48, %v9831_v35  ;;  %7700 = vmatprep.subr.mxu1 %v6616_v57  ;;  %v7159_v44 = vld [vmem:[#allocation38] ss:$0 sm:$0xff] }
0x1476   :  { %6315 = vadd.xlane.f32.xlu0 %v6314_v47  ;;  %7701 = vmatpush3.msra.mxu1 %v6616_v57  ;;  %v6358_v57 = vld [vmem:[%s10118_s6] sm:$0xff] }
0x1477   :  { %v5972_v62 = vsel %vm661_vm0, %v5952_v54, 0.0  ;;  %v5975_v9 = vsel %vm661_vm0, %v5953_v31, 0.0  ;;  %v7160_v54 = vld [vmem:[#allocation39] ss:$0 sm:$0xff]  ;;  %v6515_v31 = vld [vmem:[%s10115_s28] sm:$0xff] }
0x1478   :  { %5961 = vadd.xlane.f32.xlu1 %v5960_v18 }
0x147a   :  { %5955 = vadd.xlane.f32.xlu0 %v5954_v58 }
0x147c   :  { %5967 = vadd.xlane.f32.xlu1 %v5966_v22 }
0x147e   :  { %5958 = vadd.xlane.f32.xlu0 %v5957_v49 }
0x1480   :  { %5973 = vadd.xlane.f32.xlu1 %v5972_v62  ;;  %v6517_v62 = vld [vmem:[%s10115_s28 + $0x10] sm:$0xff] }
0x1482   :  { %5964 = vadd.xlane.f32.xlu0 %v5963_v40 }
0x1486   :  { %5970 = vadd.xlane.f32.xlu0 %v5969_v30 }
0x148a   :  { %5976 = vadd.xlane.f32.xlu0 %v5975_v9 }
0x14fd   :  { %v6319_v3 = vpop.xlane.xlu1 %6318 }
0x14fe   :  { %v6321_v0 = vmul.f32 0.03125, %v6319_v3  ;;  %v6615_v3 = vld [vmem:[%s10116_s20 + $0x30] sm:$0xff] }
0x14ff   :  { %v6316_v5 = vpop.xlane.xlu0 %6315  ;;  %7702 = vmatprep.subr.mxu1 %v6615_v3 }
0x1500   :  { %v6323_v19 = vsub.f32 %v6311_v53, %v6321_v0  ;;  %v6320_v36 = vmul.f32 0.03125, %v6316_v5  ;;  %7703 = vmatpush3.msra.mxu1 %v6615_v3  ;;  %v6614_v0 = vld [vmem:[%s10116_s20 + $0x28] sm:$0xff]  ;;  %v6613_v5 = vld [vmem:[%s10116_s20 + $0x20] sm:$0xff] }
0x1501   :  { %v5962_v41 = vpop.xlane.xlu1 %5961  ;;  %7704 = vmatprep.subr.mxu1 %v6614_v0 }
0x1502   :  { %v6322_v50 = vsub.f32 %v6310_v56, %v6320_v36  ;;  %v6325_v26 = vmul.f32 %v6323_v19, %v6323_v19  ;;  %v6158_v59 = vrot.slane %v5962_v41, %v9145_v16  ;;  %v6757_v56 = vld [vmem:[%s10117_s2] sm:$0xff]  ;;  %7705 = vmatpush3.msra.mxu1 %v6614_v0  ;;  %v6611_v36 = vld [vmem:[%s10116_s20 + $0x10] sm:$0xff] }
0x1503   :  { %v5956_v8 = vpop.xlane.xlu0 %5955  ;;  %7706 = vmatprep.subr.mxu1 %v6613_v5  ;;  %v7173_v0 = vld [vmem:[#allocation47] ss:$0 sm:$0xff] }
0x1504   :  { %v6329_v21 = vsel %vm661_vm0, %v6325_v26, 0.0  ;;  %v6324_v63 = vmul.f32 %v6322_v50, %v6322_v50  ;;  %v6149_v42 = vrot.slane %v5956_v8, %v9145_v16  ;;  %7707 = vmatpush3.msra.mxu1 %v6613_v5  ;;  %v6609_v26 = vld [vmem:[%s10116_s20] sm:$0xff] }
0x1505   :  { %6330 = vadd.xlane.f32.xlu0 %v6329_v21  ;;  %v5968_v37 = vpop.xlane.xlu1 %5967 }
0x1506   :  { %v6326_v39 = vsel %vm661_vm0, %v6324_v63, 0.0  ;;  %v6167_v4 = vrot.slane %v5968_v37, %v9145_v16 }
0x1507   :  { %6327 = vadd.xlane.f32.xlu1 %v6326_v39  ;;  %v5959_v35 = vpop.xlane.xlu0 %5958  ;;  %v7166_v39 = vld [vmem:[#allocation41] ss:$0 sm:$0xff] }
0x1508   :  { %v6153_v17 = vrot.slane %v5959_v35, %v9152_v25 }
0x1509   :  { %v5974_v27 = vpop.xlane.xlu1 %5973 }
0x150a   :  { %v6176_v10 = vrot.slane %v5974_v27, %v9145_v16  ;;  %v6154_v55 = vsel %vm777_vm4, %v6153_v17, %v6149_v42 }
0x150b   :  { %v5965_v6 = vpop.xlane.xlu0 %5964 }
0x150c   :  { %v6162_v23 = vrot.slane %v5965_v6, %v9152_v25 }
0x150e   :  { %v6163_v45 = vsel %vm777_vm4, %v6162_v23, %v6158_v59  ;;  %v7169_v23 = vld [vmem:[#allocation42] ss:$0 sm:$0xff] }
0x150f   :  { %v5971_v33 = vpop.xlane.xlu0 %5970  ;;  %v6182_v53 = vsel %vm793_vm11, %v6163_v45, %v6154_v55 }
0x1510   :  { %v6171_v52 = vrot.slane %v5971_v33, %v9152_v25 }
0x1512   :  { %v6172_v43 = vsel %vm777_vm4, %v6171_v52, %v6167_v4 }
0x1513   :  { %v5977_v38 = vpop.xlane.xlu0 %5976  ;;  %v6183_v7 = vsel %vm794_vm12, %v6172_v43, %v6182_v53 }
0x1514   :  { %v6180_v12 = vrot.slane %v5977_v38, %v9152_v25 }
0x1516   :  { %v6181_v60 = vsel %vm777_vm4, %v6180_v12, %v6176_v10 }
0x1517   :  { %v6184_v51 = vsel %vm796_vm13, %v6181_v60, %v6183_v7 }
0x153a   :  { %6186 = vxpose.xlu1.b32.start.end [1/1] (short) (narrow) %v6184_v51, 16 }
0x155c   :  { %6856 = vperm.xlu1 %7844, %v6757_v56   ;;  %v6359_v56 = vld [vmem:[%s10118_s6 + $0x8] sm:$0xff] }
0x158e   :  { %v6331_v47 = vpop.xlane.xlu0 %6330 }
0x158f   :  { %v6333_v29 = vmul.f32 0.03125, %v6331_v47  ;;  %v6754_v47 = vld [vmem:[%s10119_s10 + $0x10] sm:$0xff] }
0x1590   :  { %v6328_v11 = vpop.xlane.xlu1 %6327 }
0x1591   :  { %v6332_v34 = vmul.f32 0.03125, %v6328_v11  ;;  %v6335_v1 = vadd.f32 1e-05, %v6333_v29  ;;  %v6755_v11 = vld [vmem:[%s10119_s10 + $0x18] sm:$0xff] }
0x1592   :  { %v6361_v29 = vld [vmem:[%s10118_s6 + $0x18] sm:$0xff] }
0x1593   :  { %v6334_v24 = vadd.f32 1e-05, %v6332_v34  ;;  %v6360_v34 = vld [vmem:[%s10118_s6 + $0x10] sm:$0xff] }
0x1595   :  { %7977 = vrsqrt.f32 %v6334_v24  ;;  %v6753_v24 = vld [vmem:[%s10119_s10 + $0x8] sm:$0xff] }
0x1596   :  { %7979 = vrsqrt.f32 %v6335_v1  ;;  %v6752_v1 = vld [vmem:[%s10119_s10] sm:$0xff] }
0x15a2   :  { %v7978_v18 = vpop.eup %7977 }
0x15a3   :  { %v6338_v15 = vmul.f32 %v7978_v18, %v6322_v50  ;;  %v7980_v58 = vpop.eup %7979  ;;  %v6610_v50 = vld [vmem:[%s10116_s20 + $0x8] sm:$0xff] }
0x15a4   :  { %v6339_v49 = vmul.f32 %v7980_v58, %v6323_v19  ;;  %v6612_v19 = vld [vmem:[%s10116_s20 + $0x18] sm:$0xff]  ;;  %v6758_v18 = vld [vmem:[%s10117_s2 + $0x8] sm:$0xff] }
0x15a5   :  { %v6346_v22 = vmul.f32 %v7159_v44, %v6338_v15  ;;  %7708 = vmatprep.subr.mxu1 %v6612_v19  ;;  %v6759_v15 = vld [vmem:[%s10117_s2 + $0x10] sm:$0xff] }
0x15a6   :  { %v6347_v30 = vmul.f32 %v7159_v44, %v6339_v49  ;;  %7709 = vmatpush3.msra.mxu1 %v6612_v19  ;;  %v6760_v44 = vld [vmem:[%s10117_s2 + $0x18] sm:$0xff] }
0x15a7   :  { %v6354_v40 = vadd.f32 %v7160_v54, %v6346_v22  ;;  %7710 = vmatprep.subr.mxu1 %v6611_v36 }
0x15a8   :  { %v6355_v9 = vadd.f32 %v7160_v54, %v6347_v30  ;;  %7711 = vmatpush3.msra.mxu1 %v6611_v36  ;;  %v7172_v30 = vld [vmem:[#allocation45] ss:$0 sm:$0xff] }
0x15a9   :  { %7712 = vmatprep.subr.mxu1 %v6610_v50 }
0x15aa   :  { %7713 = vmatpush3.msra.mxu1 %v6610_v50 }
0x15ab   :  { %7714 = vmatprep.subr.mxu1 %v6609_v26 }
0x15ac   :  { %7715 = vmatpush3.msra.mxu1 %v6609_v26 }
0x15b6   :  { %v6202_v48 = vpop.trf.xlu1 }
0x15b7   :  { %7686 = vmatprep.mubr.msk.f32.mxu0 %vm3291_vm15, %v6202_v48 }
0x15ba   :  { %v6203_v46 = vpop.trf.xlu1 }
0x15bb   :  { %7687 = vmatmul.mubr.msk.f32.vlgmr.msra.gmra.mxu0 %vm3291_vm15, %v6203_v46 }
0x15bc   :  { %7690 = vmatpush3.msra.mxu0 %v6518_v13  ;;  %7697 = vmatprep.mubr.msk.f32.mxu0 %vm661_vm0, %v6354_v40 }
0x15bd   :  { %7691 = vmatprep.subr.mxu0 %v6517_v62 }
0x15be   :  { %7692 = vmatpush3.msra.mxu0 %v6517_v62 }
0x15bf   :  { %7693 = vmatprep.subr.mxu0 %v6516_v14 }
0x15c0   :  { %7694 = vmatpush3.msra.mxu0 %v6516_v14 }
0x15c1   :  { %7695 = vmatprep.subr.mxu0 %v6515_v31 }
0x15c2   :  { %7696 = vmatpush3.msra.mxu0 %v6515_v31  ;;  %v7161_v31 = vld [vmem:[#allocation36] ss:$0 sm:$0xff] }
0x15c3   :  { %7698 = vmatmul.mubr.msk.f32.vlgmr.msra.gmra.mxu0 %vm661_vm0, %v6355_v9  ;;  %7719 = vmatprep.subr.mxu0 %v6755_v11 }
0x15c4   :  { %7720 = vmatpush3.msra.mxu0 %v6755_v11 }
0x15c5   :  { %7721 = vmatprep.subr.mxu0 %v6754_v47 }
0x15c6   :  { %7722 = vmatpush3.msra.mxu0 %v6754_v47 }
0x15c7   :  { %7723 = vmatprep.subr.mxu0 %v6753_v24 }
0x15c8   :  { %7724 = vmatpush3.msra.mxu0 %v6753_v24 }
0x15c9   :  { %7725 = vmatprep.subr.mxu0 %v6752_v1 }
0x15ca   :  { %7726 = vmatpush3.msra.mxu0 %v6752_v1 }
0x167b   :  { %v9906_v21 = vpop.f32.mrf.mxu0 }
0x167c   :  { %v6450_v50 = vadd.f32 %v9906_v21, %v7161_v31 }
0x167d   :  { %v9908_v63 = vpop.f32.mrf.mxu0 }
0x167e   :  { %v6445_v26 = vadd.f32 %v7161_v31, %v9908_v63 }
0x1680   :  { %v6453_v21 = vmax.f32 %v6445_v26, 0.0 }
0x1683   :  { %v7699_v8 = vpop.f32.mrf.mxu0 }
0x1684   :  { %v6604_v35 = vadd.f32 %v7699_v8, %v7166_v39 }
0x1685   :  { %v6598_v6 = vpop.f32.mrf.mxu0 }
0x1686   :  { %v6599_v41 = vadd.f32 %v7166_v39, %v6598_v6  ;;  %v6608_v37 = vmax.f32 %v6604_v35, 0.0 }
0x1688   :  { %v6607_v33 = vmax.f32 %v6599_v41, 0.0 }
0x168a   :  { %7716 = vmatprep.mubr.msk.f32.mxu1 %vm6624_vm1, %v6607_v33 }
0x168b   :  { %7717 = vmatmul.mubr.msk.f32.vlgmr.msra.gmra.mxu1 %vm6624_vm1, %v6608_v37 }
0x174b   :  { %v7718_v38 = vpop.f32.mrf.mxu1 }
0x174c   :  { %v6703_v52 = vadd.f32 %v7718_v38, %v7169_v23 }
0x174d   :  { %v6697_v27 = vpop.f32.mrf.mxu1 }
0x174e   :  { %v6698_v59 = vadd.f32 %v7169_v23, %v6697_v27  ;;  %v6707_v12 = vadd.f32 %v6703_v52, %v6355_v9  ;;  %v6454_v23 = vmax.f32 %v6450_v50, 0.0 }
0x1750   :  { %v6706_v17 = vadd.f32 %v6698_v59, %v6354_v40  ;;  %v6713_v42 = vsel %vm661_vm0, %v6707_v12, 0.0 }
0x1752   :  { %v6710_v4 = vsel %vm661_vm0, %v6706_v17, 0.0 }
0x1753   :  { %6711 = vadd.xlane.f32.xlu0 %v6710_v4 }
0x1757   :  { %6714 = vadd.xlane.f32.xlu0 %v6713_v42 }
0x17dc   :  { %v6712_v10 = vpop.xlane.xlu0 %6711 }
0x17dd   :  { %v6716_v45 = vmul.f32 0.03125, %v6712_v10 }
0x17df   :  { %v6718_v43 = vsub.f32 %v6706_v17, %v6716_v45  ;;  %v7174_v45 = vld [vmem:[#allocation44] ss:$0 sm:$0xff] }
0x17e0   :  { %v6715_v55 = vpop.xlane.xlu0 %6714 }
0x17e1   :  { %v6717_v60 = vmul.f32 0.03125, %v6715_v55  ;;  %v6720_v61 = vmul.f32 %v6718_v43, %v6718_v43 }
0x17e3   :  { %v6719_v53 = vsub.f32 %v6707_v12, %v6717_v60  ;;  %v6722_v13 = vsel %vm661_vm0, %v6720_v61, 0.0 }
0x17e4   :  { %6723 = vadd.xlane.f32.xlu0 %v6722_v13 }
0x17e5   :  { %v6721_v7 = vmul.f32 %v6719_v53, %v6719_v53 }
0x17e7   :  { %v6725_v51 = vsel %vm661_vm0, %v6721_v7, 0.0 }
0x17e8   :  { %6726 = vadd.xlane.f32.xlu0 %v6725_v51 }
0x17fe   :  { %6460 = vperm.xlu0 %7843, %v6358_v57  }
0x1802   :  { %6463 = vperm.xlu0 %7843, %v6359_v56  }
0x1806   :  { %6466 = vperm.xlu0 %7843, %v6360_v34  }
0x180a   :  { %6469 = vperm.xlu0 %7843, %v6361_v29  }
0x180e   :  { %6859 = vperm.xlu0 %7843, %v6758_v18  }
0x1812   :  { %6862 = vperm.xlu0 %7843, %v6759_v15  }
0x1816   :  { %6865 = vperm.xlu0 %7843, %v6760_v44  }
0x186d   :  { %v6724_v58 = vpop.xlane.xlu0 %6723 }
0x186e   :  { %v6728_v48 = vmul.f32 0.03125, %v6724_v58 }
0x1870   :  { %v6730_v22 = vadd.f32 1e-05, %v6728_v48 }
0x1871   :  { %v6727_v54 = vpop.xlane.xlu0 %6726 }
0x1872   :  { %7981 = vrsqrt.f32 %v6730_v22  ;;  %v6729_v49 = vmul.f32 0.03125, %v6727_v54 }
0x1874   :  { %v6731_v46 = vadd.f32 1e-05, %v6729_v49 }
0x1876   :  { %7983 = vrsqrt.f32 %v6731_v46 }
0x1879   :  { %v6461_v62 = vpop.permute.xlu0 %6460 }
0x187a   :  { %v6474_v8 = vrot.slane %v6461_v62, %v9145_v16 }
0x187d   :  { %v6464_v40 = vpop.permute.xlu0 %6463 }
0x187e   :  { %v6478_v5 = vrot.slane %v6464_v40, %v9152_v25 }
0x187f   :  { %v7982_v14 = vpop.eup %7981 }
0x1880   :  { %v6734_v9 = vmul.f32 %v7982_v14, %v6718_v43  ;;  %v6479_v33 = vsel %vm777_vm4, %v6478_v5, %v6474_v8  ;;  %v6857_v43 = vpop.permute.xlu1 %6856 }
0x1881   :  { %v6467_v3 = vpop.permute.xlu0 %6466  ;;  %v6870_v7 = vrot.slane %v6857_v43, %v9145_v16 }
0x1882   :  { %v6742_v19 = vmul.f32 %v7172_v30, %v6734_v9  ;;  %v6483_v39 = vrot.slane %v6467_v3, %v9155_v28 }
0x1883   :  { %v7984_v36 = vpop.eup %7983 }
0x1884   :  { %v6735_v35 = vmul.f32 %v7984_v36, %v6719_v53  ;;  %v6750_v6 = vadd.f32 %v7173_v0, %v6742_v19  ;;  %v6484_v63 = vsel %vm784_vm5, %v6483_v39, %v6479_v33 }
0x1885   :  { %v6470_v41 = vpop.permute.xlu0 %6469 }
0x1886   :  { %v6488_v37 = vrot.slane %v6470_v41, %v9161_v32  ;;  %v6743_v38 = vmul.f32 %v7172_v30, %v6735_v35  ;;  %7727 = vmatprep.mubr.msk.f32.mxu0 %vm661_vm0, %v6750_v6  ;;  %6911 = vst.msk [vmem:[#allocation48] sm:$0xff] %vm661_vm0, %v6750_v6 }
0x1888   :  { %v6751_v27 = vadd.f32 %v7173_v0, %v6743_v38  ;;  %v6489_v52 = vsel %vm791_vm6, %v6488_v37, %v6484_v63 }
0x1889   :  { %v6498_v59 = vmul.f32 %v6489_v52, %v6454_v23  ;;  %v6497_v17 = vmul.f32 %v6489_v52, %v6453_v21  ;;  %v6860_v42 = vpop.permute.xlu0 %6859 }
0x188a   :  { %6912 = vst.msk [vmem:[#allocation48 + $0x8] sm:$0xff] %vm661_vm0, %v6751_v27  ;;  %7728 = vmatmul.mubr.msk.f32.vlgmr.msra.gmra.mxu0 %vm661_vm0, %v6751_v27  ;;  %v6874_v60 = vrot.slane %v6860_v42, %v9152_v25 }
0x188b   :  { %v6502_v12 = vsel %vm661_vm0, %v6498_v59, 0.0  ;;  %v6499_v4 = vsel %vm661_vm0, %v6497_v17, 0.0 }
0x188c   :  { %6503 = vadd.xlane.f32.xlu1 %v6502_v12  ;;  %6500 = vadd.xlane.f32.xlu0 %v6499_v4  ;;  %v6875_v11 = vsel %vm777_vm4, %v6874_v60, %v6870_v7 }
0x188d   :  { %v6863_v10 = vpop.permute.xlu0 %6862 }
0x188e   :  { %v6879_v53 = vrot.slane %v6863_v10, %v9155_v28 }
0x1890   :  { %v6880_v34 = vsel %vm784_vm5, %v6879_v53, %v6875_v11 }
0x1891   :  { %v6866_v55 = vpop.permute.xlu0 %6865 }
0x1892   :  { %v6884_v51 = vrot.slane %v6866_v55, %v9161_v32 }
0x1894   :  { %v6885_v29 = vsel %vm791_vm6, %v6884_v51, %v6880_v34 }
0x194a   :  { %v7729_v61 = vpop.f32.mrf.mxu0 }
0x194b   :  { %v6846_v13 = vadd.f32 %v7729_v61, %v7174_v45 }
0x194c   :  { %v6840_v57 = vpop.f32.mrf.mxu0 }
0x194d   :  { %v6841_v56 = vadd.f32 %v7174_v45, %v6840_v57  ;;  %v6850_v47 = vmax.f32 %v6846_v13, 0.0 }
0x194f   :  { %v6849_v24 = vmax.f32 %v6841_v56, 0.0  ;;  %v6894_v25 = vmul.f32 %v6885_v29, %v6850_v47 }
0x1951   :  { %v6893_v1 = vmul.f32 %v6885_v29, %v6849_v24  ;;  %v6898_v28 = vsel %vm661_vm0, %v6894_v25, 0.0 }
0x1953   :  { %v6895_v18 = vsel %vm661_vm0, %v6893_v1, 0.0 }
0x1954   :  { %6896 = vadd.xlane.f32.xlu0 %v6895_v18 }
0x1958   :  { %6899 = vadd.xlane.f32.xlu0 %v6898_v28 }
0x1959   :  { %8502 = shalt.err (!%p8499_p3)
}
0x195a   :  { %s8649_s7 = smov 128   ;;  %s10120_s16 = sld [smem:[#allocation126_spill]]  ;;  %v7165_v16 = vld [vmem:[#allocation7] ss:$0 sm:$0xff]  ;;  %v6501_v32 = vpop.xlane.xlu0 %6500  ;;  %v6504_v44 = vpop.xlane.xlu1 %6503  ;;  %v7177_v58 = vld [vmem:[#allocation8] ss:$0 sm:$0xff] }
0x195b   :  { %s10121_s3 = sld [smem:[#allocation127_spill]]  ;;  %s8650_s13 = smov 8   ;;  %v6511_v15 = vadd.f32 %v7165_v16, %v6501_v32  ;;  %v6512_v22 = vadd.f32 %v7165_v16, %v6504_v44  ;;  %vm6913_vm0 = vcmask 7168  }
0x195d   :  { %v6513_v54 = vadd.f32 %v6511_v15, %v9557_v2  ;;  %v6514_v40 = vadd.f32 %v6512_v22, %v9564_v20 }
0x1960   :  { %6927 = dma.vmem_to_hbm [thread:$0]  %s6922_s24, 256, %s10120_s16, [#allocation11], %s8649_s7, %s8649_s7, %s8650_s13  }
0x19dd   :  { %v6897_v48 = vpop.xlane.xlu0 %6896 }
0x19de   :  { %v6907_v49 = vadd.f32 %v7177_v58, %v6897_v48 }
0x19e0   :  { %v6909_v46 = vadd.f32 %v6907_v49, %v6513_v54 }
0x19e1   :  { %v6900_v62 = vpop.xlane.xlu0 %6899 }
0x19e2   :  { %6914 = vst.msk [vmem:[%s10121_s3] sm:$0xff] %vm6913_vm0, %v6909_v46  ;;  %v6908_v14 = vadd.f32 %v7177_v58, %v6900_v62 }
0x19e4   :  { %v6910_v30 = vadd.f32 %v6908_v14, %v6514_v40 }
0x19e6   :  { %6915 = vst.msk [vmem:[%s10121_s3 + $0x8] sm:$0xff] %vm6913_vm0, %v6910_v30 }
0x19e7   :  { %8537 = dma.done.wait [#allocation11], 256  }
0x19e8   :  { %8538 = vsyncadd [#allocation11], 4294967040 }
0x19e9   :  { %6935 = vsyncpa [#allocation10], 1 }
0x19ea   :  { %6936 = vsyncpa [#allocation13], 1 }
0x19eb   :  { %6937 = vsyncpa [#allocation16], 1 }
0x19ec   :  { %6938 = vsyncpa [#allocation19], 1 }
0x19ed   :  { %6939 = vsyncpa [#allocation22], 1 }
0x19ee   :  { %6940 = vsyncpa [#allocation25], 1 }
0x19ef   :  { %6941 = vsyncpa [#allocation28], 1 }
0x19f0   :  { %6942 = vsyncpa [#allocation31], 1 }
0x19f1   :  { %6943 = vsyncpa [#allocation34], 1 }
0x19f2   :  { %6944 = vsyncpa [#allocation37], 1 }
0x19f3   :  { %6945 = vsyncpa [#allocation40], 1 }
0x19f4   :  { %6946 = vsyncpa [#allocation43], 1 }
0x19f5   :  { %6947 = vsyncpa [#allocation46], 1 }
0x19f6   :  { %6948 = vsyncpa [#allocation11], 1 }

</bundles_post_ra>
